<compile_context>
chip_gen: v5e
topology: v5e:2x2
jax: 0.10.0
libtpu: 0.0.40
codegen_flags: <defaults>
</compile_context>

<pallas_src>
import jax
import jax.numpy as jnp
from jax import lax
from jax.experimental import pallas as pl
from jax.experimental.pallas import tpu as pltpu


# ------------------------------- fused Pallas kernel -------------------------------- #

def _ode_euler_fused_kernel(x_ref, w1_ref, bt1_ref, w2_ref, bt2_ref, dt_ref,
                            out_ref, pad_ref):
    """One Euler step of f(t0, x) = conv2(relu(conv1([x, t0]))), time folded into bt*.

    x_ref:   (1, C, H*W)     input image, spatial flattened onto the lane axis
    w*_ref:  (Cout, 9*C)     conv weights in im2col layout (time channel removed)
    bt*_ref: (Cout, H*W)     bias + border-corrected t0-channel contribution
    dt_ref:  (1, 1) SMEM     Euler step size (all_time[1] - all_time[0])
    out_ref: (1, C, H*W)     lane-dense output block
    pad_ref: (C, H+2, W+2)   fp32 VMEM halo scratch, reused for x and then h
    """
    C = x_ref.shape[1]
    HW = x_ref.shape[2]
    Hp, Wp = pad_ref.shape[1], pad_ref.shape[2]
    H, W = Hp - 2, Wp - 2
    Cout = out_ref.shape[1]

    def conv3x3(w_ref, bt_ref):
        # im2col: K rows ordered (tap k = dy*3+dx, channel ci) to match w*_ref's K axis.
        cols = []
        for k in range(9):                       # static unroll: 9 halo-window slices
            dy, dx = k // 3, k % 3
            cols.append(pad_ref[:, dy:dy + H, dx:dx + W].reshape(C, HW))
        p = jnp.concatenate(cols, axis=0)        # (9*C, HW), lane-dense N = H*W
        acc = jnp.dot(w_ref[...], p, preferred_element_type=jnp.float32)   # (Cout, HW)
        return acc + bt_ref[...].astype(jnp.float32)

    xs = x_ref[0].astype(jnp.float32)            # (C, HW)

    # in-kernel zero padding of x into the halo scratch (no wrapper jnp.pad)
    pad_ref[...] = jnp.zeros_like(pad_ref)
    pad_ref[:, 1:H + 1, 1:W + 1] = xs.reshape(C, H, W)

    # stage 1: h = relu(conv1([x, t0]))
    h = jnp.maximum(conv3x3(w1_ref, bt1_ref), 0.0)               # (Cout, HW), stays in VMEM

    # stage 2: reuse the same scratch for h's halo (halo already zero), then conv2 + Euler
    pad_ref[:, 1:H + 1, 1:W + 1] = h.reshape(Cout, H, W)
    f = conv3x3(w2_ref, bt2_ref)                                 # (Cout, HW)

    dt = dt_ref[0, 0]
    out_ref[0] = (xs + dt * f).astype(out_ref.dtype)


# ------------------------------- wrapper / glue -------------------------------------- #

def _time_border_map(w, t0, H, W):
    """t0-channel contribution of a zero-padded 3x3 ConcatConv, with border (halo) correction.

    w: (9, Cin, Cout), time channel at input index Cin-1.  Returns (Cout, H*W)."""
    Cout = w.shape[-1]
    wt = w[:, -1, :].reshape(3, 3, Cout)                         # time-channel taps
    d3 = jnp.arange(3)[:, None]
    ii = jnp.arange(H)[None, :]
    jj = jnp.arange(W)[None, :]
    rv = ((ii + d3 - 1 >= 0) & (ii + d3 - 1 < H)).astype(w.dtype)    # (3, H) tap-row validity
    cv = ((jj + d3 - 1 >= 0) & (jj + d3 - 1 < W)).astype(w.dtype)    # (3, W) tap-col validity
    m = jnp.einsum('yxc,yi,xj->cij', wt, rv, cv)                 # (Cout, H, W)
    return (t0.astype(w.dtype) * m).reshape(Cout, H * W)


def ode_block_time_last(x_nchw, t_list, params, solver="euler"):
    """Pallas port of ODEBlockTimeLast.forward(x, t): out[1] = x + dt * odefunc(t0, x)."""
    w1, b1, w2, b2 = params["w1"], params["b1"], params["w2"], params["b2"]

    # time handling (mirrors the module): cat(t_list), append constant 4.0, type_as(x)
    odetime = jnp.concatenate([jnp.atleast_1d(t) for t in t_list], axis=0)
    one = jnp.array([4.0], dtype=odetime.dtype)
    all_time = jnp.concatenate([odetime, one], axis=0).astype(x_nchw.dtype)
    t0, t1 = all_time[0], all_time[1]
    dt = (t1 - t0).astype(jnp.float32)

    # TODO(synk): only the fixed-grid 'euler' path is ported (out[1] == one Euler step);
    #             adaptive 'dopri5' / fixed 'rk4' stepping is not implemented.

    B, C, H, W = x_nchw.shape
    HW = H * W
    Cout = w1.shape[-1]
    assert Cout == C, "odefunc must preserve the channel count"

    # weights -> im2col layout (Cout, 9*C); time channel folded into border-corrected bias maps
    w1m = jnp.transpose(w1[:, :C, :], (2, 0, 1)).reshape(Cout, 9 * C)
    w2m = jnp.transpose(w2[:, :C, :], (2, 0, 1)).reshape(Cout, 9 * C)
    bt1 = b1.reshape(Cout, 1) + _time_border_map(w1, t0, H, W)       # (Cout, HW)
    bt2 = b2.reshape(Cout, 1) + _time_border_map(w2, t0, H, W)       # (Cout, HW)

    x_flat = x_nchw.reshape(B, C, HW)        # contiguous split of (H, W): lane-dense, no copy
    dt_arr = dt.reshape(1, 1)

    y_flat = pl.pallas_call(
        _ode_euler_fused_kernel,
        out_shape=jax.ShapeDtypeStruct((B, C, HW), x_nchw.dtype),
        grid=(B,),
        in_specs=[
            pl.BlockSpec((1, C, HW), lambda b: (b, 0, 0)),           # per-batch image tile
            pl.BlockSpec((Cout, 9 * C), lambda b: (0, 0)),           # conv1 weights (resident)
            pl.BlockSpec((Cout, HW), lambda b: (0, 0)),              # conv1 bias+time map
            pl.BlockSpec((Cout, 9 * C), lambda b: (0, 0)),           # conv2 weights
            pl.BlockSpec((Cout, HW), lambda b: (0, 0)),              # conv2 bias+time map
            pl.BlockSpec(memory_space=pltpu.MemorySpace.SMEM),       # dt scalar
        ],
        out_specs=pl.BlockSpec((1, C, HW), lambda b: (b, 0, 0)),
        scratch_shapes=[pltpu.VMEM((C, H + 2, W + 2), jnp.float32)],
        compiler_params=pltpu.CompilerParams(
            dimension_semantics=("parallel",)),                      # batch across TCs (v7x)
    )(x_flat, w1m, bt1, w2m, bt2, dt_arr)

    return y_flat.reshape(B, C, H, W)


# ------------------------------- params & pure-JAX reference ------------------------- #

def init_params(key, C):
    k1, k2, k3, k4 = jax.random.split(key, 4)
    Cin = C + 1  # ConcatConv2d: +1 time channel
    w1 = 0.1 * jax.random.normal(k1, (9, Cin, C), jnp.float32)
    b1 = 0.1 * jax.random.normal(k2, (1, C), jnp.float32)
    w2 = 0.1 * jax.random.normal(k3, (9, Cin, C), jnp.float32)
    b2 = 0.1 * jax.random.normal(k4, (1, C), jnp.float32)
    return dict(w1=w1, b1=b1, w2=w2, b2=b2)


def _ref_forward(x_nchw, t_list, params):
    """Pure-JAX reference (lax.conv, explicit time-channel concat) for correctness check."""
    odetime = jnp.concatenate([jnp.atleast_1d(t) for t in t_list], axis=0)
    all_time = jnp.concatenate([odetime, jnp.array([4.0], odetime.dtype)], 0).astype(x_nchw.dtype)
    t0, t1 = all_time[0], all_time[1]
    x = jnp.transpose(x_nchw, (0, 2, 3, 1))
    B, H, W, C = x.shape
    tchan = jnp.full((B, H, W, 1), t0, x.dtype)

    def conv(z, w, b):
        w_hwio = w.reshape(3, 3, z.shape[-1], -1)
        out = lax.conv_general_dilated(z, w_hwio, (1, 1), "SAME",
                                       dimension_numbers=("NHWC", "HWIO", "NHWC"))
        return out + b.reshape(1, 1, 1, -1)

    h = jnp.maximum(conv(jnp.concatenate([x, tchan], -1), params["w1"], params["b1"]), 0.0)
    f = conv(jnp.concatenate([h, tchan], -1), params["w2"], params["b2"])
    y = x + (t1 - t0) * f
    return jnp.transpose(y, (0, 3, 1, 2))


if __name__ == "__main__":
    key = jax.random.PRNGKey(0)
    kx, kp = jax.random.split(key)

    B, C, H, W = 2, 4, 16, 16                       # small NCHW image batch
    x = jax.random.normal(kx, (B, C, H, W), jnp.float32)
    # forward(x, t): t is a list of time tensors; nonzero t0 exercises the time-channel fold
    t_list = [jnp.array([0.5], jnp.float32), jnp.array([1.5], jnp.float32)]
    params = init_params(kp, C)

    out = ode_block_time_last(x, t_list, params, solver="euler")
    out = jax.block_until_ready(out)

    ref = _ref_forward(x, t_list, params)
    assert out.shape == (B, C, H, W), out.shape
    err = float(jnp.max(jnp.abs(out - ref)))
    assert err < 2e-4, f"mismatch vs pure-JAX reference: {err}"

    print("KERNEL_OK")
</pallas_src>

<mosaic_0001>
module attributes {stable_mosaic.version = 11 : i64} {
  func.func @_ode_euler_fused_kernel(%arg0: i32, %arg1: memref<1x4x256xf32, #tpu.memory_space<vmem>>, %arg2: memref<4x36xf32, #tpu.memory_space<vmem>>, %arg3: memref<4x256xf32, #tpu.memory_space<vmem>>, %arg4: memref<4x36xf32, #tpu.memory_space<vmem>>, %arg5: memref<4x256xf32, #tpu.memory_space<vmem>>, %arg6: memref<1x1xf32, #tpu.memory_space<smem>>, %arg7: memref<1x4x256xf32, #tpu.memory_space<vmem>>, %arg8: memref<4x18x18xf32, #tpu.memory_space<vmem>>) attributes {dimension_semantics = [#tpu.dimension_semantics<parallel>], iteration_bounds = array<i64: 2>, scalar_prefetch = 0 : i64, scratch_operands = 1 : i64, tpu.core_type = #tpu.core_type<tc>, window_params = [{transform_indices = @transform_0, window_bounds = array<i64: 1, 4, 256>}, {pipeline_mode = #tpu.pipeline_mode<synchronous>, transform_indices = @transform_1, window_bounds = array<i64: 4, 36>}, {pipeline_mode = #tpu.pipeline_mode<synchronous>, transform_indices = @transform_2, window_bounds = array<i64: 4, 256>}, {pipeline_mode = #tpu.pipeline_mode<synchronous>, transform_indices = @transform_3, window_bounds = array<i64: 4, 36>}, {pipeline_mode = #tpu.pipeline_mode<synchronous>, transform_indices = @transform_4, window_bounds = array<i64: 4, 256>}, {transform_indices = @transform_5, window_bounds = array<i64: 1, 1>}, {transform_indices = @transform_6, window_bounds = array<i64: 1, 4, 256>}]} {
    %c0 = arith.constant 0 : index
    %c0_0 = arith.constant 0 : index
    %c0_1 = arith.constant 0 : index
    %0 = vector.load %arg1[%c0, %c0_0, %c0_1] : memref<1x4x256xf32, #tpu.memory_space<vmem>>, vector<1x4x256xf32>
    %1 = vector.shape_cast %0 : vector<1x4x256xf32> to vector<4x256xf32>
    %cst = arith.constant 0.000000e+00 : f32
    %2 = vector.broadcast %cst : f32 to vector<4x18x18xf32>
    %c0_2 = arith.constant 0 : index
    %c0_3 = arith.constant 0 : index
    %c0_4 = arith.constant 0 : index
    %3 = vector.load %arg8[%c0_2, %c0_3, %c0_4] : memref<4x18x18xf32, #tpu.memory_space<vmem>>, vector<4x18x18xf32>
    tpu.vector_store %arg8[%c0_2, %c0_3, %c0_4], %2 {strides = array<i32>} : memref<4x18x18xf32, #tpu.memory_space<vmem>>, vector<4x18x18xf32>,
    %4 = vector.shape_cast %1 : vector<4x256xf32> to vector<4x16x16xf32>
    %c0_5 = arith.constant 0 : index
    %c1 = arith.constant 1 : index
    %c1_6 = arith.constant 1 : index
    %5 = vector.load %arg8[%c0_5, %c1, %c1_6] : memref<4x18x18xf32, #tpu.memory_space<vmem>>, vector<4x16x16xf32>
    tpu.vector_store %arg8[%c0_5, %c1, %c1_6], %4 {strides = array<i32>} : memref<4x18x18xf32, #tpu.memory_space<vmem>>, vector<4x16x16xf32>,
    %c0_7 = arith.constant 0 : index
    %c0_8 = arith.constant 0 : index
    %c0_9 = arith.constant 0 : index
    %6 = vector.load %arg8[%c0_7, %c0_8, %c0_9] : memref<4x18x18xf32, #tpu.memory_space<vmem>>, vector<4x16x16xf32>
    %7 = vector.shape_cast %6 : vector<4x16x16xf32> to vector<4x256xf32>
    %c0_10 = arith.constant 0 : index
    %c0_11 = arith.constant 0 : index
    %c1_12 = arith.constant 1 : index
    %8 = vector.load %arg8[%c0_10, %c0_11, %c1_12] : memref<4x18x18xf32, #tpu.memory_space<vmem>>, vector<4x16x16xf32>
    %9 = vector.shape_cast %8 : vector<4x16x16xf32> to vector<4x256xf32>
    %c0_13 = arith.constant 0 : index
    %c0_14 = arith.constant 0 : index
    %c2 = arith.constant 2 : index
    %10 = vector.load %arg8[%c0_13, %c0_14, %c2] : memref<4x18x18xf32, #tpu.memory_space<vmem>>, vector<4x16x16xf32>
    %11 = vector.shape_cast %10 : vector<4x16x16xf32> to vector<4x256xf32>
    %c0_15 = arith.constant 0 : index
    %c1_16 = arith.constant 1 : index
    %c0_17 = arith.constant 0 : index
    %12 = vector.load %arg8[%c0_15, %c1_16, %c0_17] : memref<4x18x18xf32, #tpu.memory_space<vmem>>, vector<4x16x16xf32>
    %13 = vector.shape_cast %12 : vector<4x16x16xf32> to vector<4x256xf32>
    %c0_18 = arith.constant 0 : index
    %c1_19 = arith.constant 1 : index
    %c1_20 = arith.constant 1 : index
    %14 = vector.load %arg8[%c0_18, %c1_19, %c1_20] : memref<4x18x18xf32, #tpu.memory_space<vmem>>, vector<4x16x16xf32>
    %15 = vector.shape_cast %14 : vector<4x16x16xf32> to vector<4x256xf32>
    %c0_21 = arith.constant 0 : index
    %c1_22 = arith.constant 1 : index
    %c2_23 = arith.constant 2 : index
    %16 = vector.load %arg8[%c0_21, %c1_22, %c2_23] : memref<4x18x18xf32, #tpu.memory_space<vmem>>, vector<4x16x16xf32>
    %17 = vector.shape_cast %16 : vector<4x16x16xf32> to vector<4x256xf32>
    %c0_24 = arith.constant 0 : index
    %c2_25 = arith.constant 2 : index
    %c0_26 = arith.constant 0 : index
    %18 = vector.load %arg8[%c0_24, %c2_25, %c0_26] : memref<4x18x18xf32, #tpu.memory_space<vmem>>, vector<4x16x16xf32>
    %19 = vector.shape_cast %18 : vector<4x16x16xf32> to vector<4x256xf32>
    %c0_27 = arith.constant 0 : index
    %c2_28 = arith.constant 2 : index
    %c1_29 = arith.constant 1 : index
    %20 = vector.load %arg8[%c0_27, %c2_28, %c1_29] : memref<4x18x18xf32, #tpu.memory_space<vmem>>, vector<4x16x16xf32>
    %21 = vector.shape_cast %20 : vector<4x16x16xf32> to vector<4x256xf32>
    %c0_30 = arith.constant 0 : index
    %c2_31 = arith.constant 2 : index
    %c2_32 = arith.constant 2 : index
    %22 = vector.load %arg8[%c0_30, %c2_31, %c2_32] : memref<4x18x18xf32, #tpu.memory_space<vmem>>, vector<4x16x16xf32>
    %23 = vector.shape_cast %22 : vector<4x16x16xf32> to vector<4x256xf32>
    %24 = tpu.concatenate %7, %9, %11, %13, %15, %17, %19, %21, %23 in 0 : vector<4x256xf32>, vector<4x256xf32>, vector<4x256xf32>, vector<4x256xf32>, vector<4x256xf32>, vector<4x256xf32>, vector<4x256xf32>, vector<4x256xf32>, vector<4x256xf32> -> vector<36x256xf32>
    %c0_33 = arith.constant 0 : index
    %c0_34 = arith.constant 0 : index
    %25 = vector.load %arg2[%c0_33, %c0_34] : memref<4x36xf32, #tpu.memory_space<vmem>>, vector<4x36xf32>
    %cst_35 = arith.constant dense<0.000000e+00> : vector<4x256xf32>
    %26 = tpu.matmul %25, %24, %cst_35 {dimension_numbers = #tpu.dot_dimension_numbers<[1], [0], [0], [1], [0, 0, 1, 1], [], []>} : vector<4x36xf32>, vector<36x256xf32>, vector<4x256xf32> -> vector<4x256xf32>
    %c0_36 = arith.constant 0 : index
    %c0_37 = arith.constant 0 : index
    %27 = vector.load %arg3[%c0_36, %c0_37] : memref<4x256xf32, #tpu.memory_space<vmem>>, vector<4x256xf32>
    %28 = arith.addf %26, %27 : vector<4x256xf32>
    %cst_38 = arith.constant 0.000000e+00 : f32
    %29 = vector.broadcast %cst_38 : f32 to vector<4x256xf32>
    %30 = arith.maximumf %28, %29 : vector<4x256xf32>
    %31 = vector.shape_cast %30 : vector<4x256xf32> to vector<4x16x16xf32>
    %c0_39 = arith.constant 0 : index
    %c1_40 = arith.constant 1 : index
    %c1_41 = arith.constant 1 : index
    %32 = vector.load %arg8[%c0_39, %c1_40, %c1_41] : memref<4x18x18xf32, #tpu.memory_space<vmem>>, vector<4x16x16xf32>
    tpu.vector_store %arg8[%c0_39, %c1_40, %c1_41], %31 {strides = array<i32>} : memref<4x18x18xf32, #tpu.memory_space<vmem>>, vector<4x16x16xf32>,
    %c0_42 = arith.constant 0 : index
    %c0_43 = arith.constant 0 : index
    %c0_44 = arith.constant 0 : index
    %33 = vector.load %arg8[%c0_42, %c0_43, %c0_44] : memref<4x18x18xf32, #tpu.memory_space<vmem>>, vector<4x16x16xf32>
    %34 = vector.shape_cast %33 : vector<4x16x16xf32> to vector<4x256xf32>
    %c0_45 = arith.constant 0 : index
    %c0_46 = arith.constant 0 : index
    %c1_47 = arith.constant 1 : index
    %35 = vector.load %arg8[%c0_45, %c0_46, %c1_47] : memref<4x18x18xf32, #tpu.memory_space<vmem>>, vector<4x16x16xf32>
    %36 = vector.shape_cast %35 : vector<4x16x16xf32> to vector<4x256xf32>
    %c0_48 = arith.constant 0 : index
    %c0_49 = arith.constant 0 : index
    %c2_50 = arith.constant 2 : index
    %37 = vector.load %arg8[%c0_48, %c0_49, %c2_50] : memref<4x18x18xf32, #tpu.memory_space<vmem>>, vector<4x16x16xf32>
    %38 = vector.shape_cast %37 : vector<4x16x16xf32> to vector<4x256xf32>
    %c0_51 = arith.constant 0 : index
    %c1_52 = arith.constant 1 : index
    %c0_53 = arith.constant 0 : index
    %39 = vector.load %arg8[%c0_51, %c1_52, %c0_53] : memref<4x18x18xf32, #tpu.memory_space<vmem>>, vector<4x16x16xf32>
    %40 = vector.shape_cast %39 : vector<4x16x16xf32> to vector<4x256xf32>
    %c0_54 = arith.constant 0 : index
    %c1_55 = arith.constant 1 : index
    %c1_56 = arith.constant 1 : index
    %41 = vector.load %arg8[%c0_54, %c1_55, %c1_56] : memref<4x18x18xf32, #tpu.memory_space<vmem>>, vector<4x16x16xf32>
    %42 = vector.shape_cast %41 : vector<4x16x16xf32> to vector<4x256xf32>
    %c0_57 = arith.constant 0 : index
    %c1_58 = arith.constant 1 : index
    %c2_59 = arith.constant 2 : index
    %43 = vector.load %arg8[%c0_57, %c1_58, %c2_59] : memref<4x18x18xf32, #tpu.memory_space<vmem>>, vector<4x16x16xf32>
    %44 = vector.shape_cast %43 : vector<4x16x16xf32> to vector<4x256xf32>
    %c0_60 = arith.constant 0 : index
    %c2_61 = arith.constant 2 : index
    %c0_62 = arith.constant 0 : index
    %45 = vector.load %arg8[%c0_60, %c2_61, %c0_62] : memref<4x18x18xf32, #tpu.memory_space<vmem>>, vector<4x16x16xf32>
    %46 = vector.shape_cast %45 : vector<4x16x16xf32> to vector<4x256xf32>
    %c0_63 = arith.constant 0 : index
    %c2_64 = arith.constant 2 : index
    %c1_65 = arith.constant 1 : index
    %47 = vector.load %arg8[%c0_63, %c2_64, %c1_65] : memref<4x18x18xf32, #tpu.memory_space<vmem>>, vector<4x16x16xf32>
    %48 = vector.shape_cast %47 : vector<4x16x16xf32> to vector<4x256xf32>
    %c0_66 = arith.constant 0 : index
    %c2_67 = arith.constant 2 : index
    %c2_68 = arith.constant 2 : index
    %49 = vector.load %arg8[%c0_66, %c2_67, %c2_68] : memref<4x18x18xf32, #tpu.memory_space<vmem>>, vector<4x16x16xf32>
    %50 = vector.shape_cast %49 : vector<4x16x16xf32> to vector<4x256xf32>
    %51 = tpu.concatenate %34, %36, %38, %40, %42, %44, %46, %48, %50 in 0 : vector<4x256xf32>, vector<4x256xf32>, vector<4x256xf32>, vector<4x256xf32>, vector<4x256xf32>, vector<4x256xf32>, vector<4x256xf32>, vector<4x256xf32>, vector<4x256xf32> -> vector<36x256xf32>
    %c0_69 = arith.constant 0 : index
    %c0_70 = arith.constant 0 : index
    %52 = vector.load %arg4[%c0_69, %c0_70] : memref<4x36xf32, #tpu.memory_space<vmem>>, vector<4x36xf32>
    %cst_71 = arith.constant dense<0.000000e+00> : vector<4x256xf32>
    %53 = tpu.matmul %52, %51, %cst_71 {dimension_numbers = #tpu.dot_dimension_numbers<[1], [0], [0], [1], [0, 0, 1, 1], [], []>} : vector<4x36xf32>, vector<36x256xf32>, vector<4x256xf32> -> vector<4x256xf32>
    %c0_72 = arith.constant 0 : index
    %c0_73 = arith.constant 0 : index
    %54 = vector.load %arg5[%c0_72, %c0_73] : memref<4x256xf32, #tpu.memory_space<vmem>>, vector<4x256xf32>
    %55 = arith.addf %53, %54 : vector<4x256xf32>
    %c0_74 = arith.constant 0 : index
    %c0_75 = arith.constant 0 : index
    %56 = memref.load %arg6[%c0_74, %c0_75] : memref<1x1xf32, #tpu.memory_space<smem>>
    %57 = vector.broadcast %56 : f32 to vector<4x256xf32>
    %58 = arith.mulf %57, %55 : vector<4x256xf32>
    %59 = arith.addf %1, %58 : vector<4x256xf32>
    %c0_76 = arith.constant 0 : index
    %c0_77 = arith.constant 0 : index
    %c0_78 = arith.constant 0 : index
    %60 = vector.load %arg7[%c0_76, %c0_77, %c0_78] : memref<1x4x256xf32, #tpu.memory_space<vmem>>, vector<1x4x256xf32>
    %61 = vector.shape_cast %60 : vector<1x4x256xf32> to vector<4x256xf32>
    %62 = vector.shape_cast %59 : vector<4x256xf32> to vector<1x4x256xf32>
    tpu.vector_store %arg7[%c0_76, %c0_77, %c0_78], %62 {strides = array<i32>} : memref<1x4x256xf32, #tpu.memory_space<vmem>>, vector<1x4x256xf32>,
    return
  }
  func.func @transform_0(%arg0: i32) -> (i32, i32, i32) {
    %c0_i32 = arith.constant 0 : i32
    %c0_i32_0 = arith.constant 0 : i32
    %c0_i32_1 = arith.constant 0 : i32
    return %arg0, %c0_i32, %c0_i32_0 : i32, i32, i32
  }
  func.func @transform_1(%arg0: i32) -> (i32, i32) {
    %c0_i32 = arith.constant 0 : i32
    %c0_i32_0 = arith.constant 0 : i32
    %c0_i32_1 = arith.constant 0 : i32
    return %c0_i32, %c0_i32_0 : i32, i32
  }
  func.func @transform_2(%arg0: i32) -> (i32, i32) {
    %c0_i32 = arith.constant 0 : i32
    %c0_i32_0 = arith.constant 0 : i32
    %c0_i32_1 = arith.constant 0 : i32
    return %c0_i32, %c0_i32_0 : i32, i32
  }
  func.func @transform_3(%arg0: i32) -> (i32, i32) {
    %c0_i32 = arith.constant 0 : i32
    %c0_i32_0 = arith.constant 0 : i32
    %c0_i32_1 = arith.constant 0 : i32
    return %c0_i32, %c0_i32_0 : i32, i32
  }
  func.func @transform_4(%arg0: i32) -> (i32, i32) {
    %c0_i32 = arith.constant 0 : i32
    %c0_i32_0 = arith.constant 0 : i32
    %c0_i32_1 = arith.constant 0 : i32
    return %c0_i32, %c0_i32_0 : i32, i32
  }
  func.func @transform_5(%arg0: i32) -> (i32, i32) {
    %c0_i32 = arith.constant 0 : i32
    %c0_i32_0 = arith.constant 0 : i32
    %c0_i32_1 = arith.constant 0 : i32
    return %c0_i32, %c0_i32_0 : i32, i32
  }
  func.func @transform_6(%arg0: i32) -> (i32, i32, i32) {
    %c0_i32 = arith.constant 0 : i32
    %c0_i32_0 = arith.constant 0 : i32
    %c0_i32_1 = arith.constant 0 : i32
    return %arg0, %c0_i32, %c0_i32_0 : i32, i32, i32
  }
}

</mosaic_0001>

<bundles_post_ra>
// kernel: tpu_custom_call.1
= control target key start
LH: loop header
LB: loop body
LE: loop exit
PB: predicated region body
PF: predicated region fallthrough
CT: control target
= control target key end

     0   :  { %s9669_s0 = inlined_call_operand.hbm [shape: f32[2,4,256], index: 0, kind: input, shape index: {}]   ;;  %s9670_s1 = inlined_call_operand.hbm [shape: f32[4,36], index: 1, kind: input, shape index: {}]   ;;  %s9671_s2 = inlined_call_operand.hbm [shape: f32[4,256], index: 2, kind: input, shape index: {}]   ;;  %s9672_s3 = inlined_call_operand.vmem [shape: f32[4,36], index: 3, kind: input, shape index: {}]   ;;  %s9673_s4 = inlined_call_operand.hbm [shape: f32[4,256], index: 4, kind: input, shape index: {}]   ;;  %s9674_s5 = inlined_call_operand.<no memory space> [shape: f32[1,1], index: 5, kind: input, shape index: {}]   ;;  %s9675_s6 = inlined_call_operand.hbm [shape: f32[2,4,256], index: 6, kind: output, shape index: {}]  }
   0x1   :  { %11 = sst [smem:[#allocation3]] %s9674_s5 }
   0x2   :  { %12 = vsyncpa [#allocation5], 0 }
   0x3   :  { %14 = vsyncpa [#allocation5 + $0x1], 0 }
   0x4   :  { %15 = vsyncpa [#allocation8], 0 }
   0x5   :  { %16 = vsyncpa [#allocation11], 0 }
   0x6   :  { %17 = vsyncpa [#allocation6], 0 }
   0x7   :  { %19 = vsyncpa [#allocation6 + $0x1], 0  ;;  %s5853_s23 = smov 0   ;;  %s5855_s24 = smov 0  }
   0x8   :  { %s5857_s25 = smov 0   ;;  %s5859_s26 = smov 0  }
   0x9 LB: > { %s5874_s5 = sadd.s32 4294967295, %s5797_s26   ;;  %s4733_s27 = sadd.s32 4294967294, %s5797_s26   ;;  %s5797_s26 = sphi %s5859_s26, %s10037_s26   ;;  %s5793_s25 = sphi %s5857_s25, %s10036_s25   ;;  %s5789_s24 = sphi %s5855_s24, %s10035_s24   ;;  %s5785_s23 = sphi %s5853_s23, %s10034_s23  }
   0xa   : > { %p45_p0 = scmp.ne.s32.totalorder %s5789_s24, %s5785_s23  ;;  %p46_p1 = scmp.eq.s32.totalorder %s5874_s5, 0 }
   0xb   : > { %p174_p2 = scmp.eq.s32.totalorder %s5874_s5, 1  ;;  %p180_p3 = scmp.eq.s32.totalorder %s4733_s27, 1 }
   0xc   : > { %p5883_p4 = por %p46_p1, %p45_p0  ;;  %p4734_p5 = scmp.ge.s32.totalorder %s5797_s26, 1 }
   0xd   : > { %p5888_p6 = por %p180_p3, %p45_p0  ;;  %p187_p7 = scmp.lt.s32.totalorder %s5797_s26, 3 }
   0xe   : > { %s199_s8 = sshll.u32 %s9670_s1, 4  ;;  %s5799_s10 = smov [#allocation7]   ;;  %s200_s8 = int_to_ptr.hbm [resolvable:$true] %s199_s8 }
   0xf   : > { %p5896_p8 = pnand %p4734_p5, %p187_p7  ;;  %s201_s11 = sshll.u32 %s5799_s10, 4  ;;  %s202_s11 = int_to_ptr.vmem [resolvable:$true] %s201_s11 }
  0x10   : > { %s211_s14 = sshll.u32 %s9671_s2, 4  ;;  %s226_s17 = sshll.u32 %s9673_s4, 4  ;;  %s212_s14 = int_to_ptr.hbm [resolvable:$true] %s211_s14  ;;  %s227_s17 = int_to_ptr.hbm [resolvable:$true] %s226_s17 }
  0x11   : > { %p4783_p10 = pneg %p5896_p8  ;;  %s5800_s18 = smov [#allocation9]  }
  0x12   : > { %s213_s19 = sshll.u32 %s5800_s18, 4  ;;  %s5801_s20 = smov [#allocation10]   ;;  %s214_s19 = int_to_ptr.vmem [resolvable:$true] %s213_s19 }
  0x13   : > { %p4784_p11 = pnand %p4783_p10, %p46_p1  ;;  %s228_s21 = sshll.u32 %s5801_s20, 4  ;;  %s229_s21 = int_to_ptr.vmem [resolvable:$true] %s228_s21 }
  0x14   : > { %s5912_s22 = sadd.s32 1, %s5797_s26   ;;  %s32_s30 = sadd.s32 1, %s5793_s25 }
  0x15   : > { %4786 = dma.hbm_to_vmem [thread:$0]  (!%p4784_p11), %s200_s8, 64, %s202_s11, [#allocation8]  }
  0x16   : > { %4789 = dma.hbm_to_vmem [thread:$0]  (!%p4784_p11), %s212_s14, 128, %s214_s19, [#allocation8]  }
  0x17   : > { %4792 = dma.hbm_to_vmem [thread:$0]  (!%p4784_p11), %s227_s17, 128, %s229_s21, [#allocation11]  }
  0x18   : > { %s29_s27 = ssub.s32 %s5797_s26, %s5912_s22  ;;  %p39_p13 = scmp.ne.s32.totalorder %s5793_s25, %s5789_s24 }
  0x19   : > { %p30_p12 = scmp.eq.s32.totalorder %s29_s27, 0  ;;  %p40_p0 = scmp.eq.s32.totalorder %s5797_s26, 0 }
  0x1a   : > { %p5925_p3 = por %p174_p2, %p39_p13  ;;  %p4804_p5 = scmp.lt.s32.totalorder %s5797_s26, 2 }
  0x1b   : > { %s5921_s7 = scalar_select %p30_p12, %s5793_s25, %s32_s30  }
  0x1c   : > { %s242_s10 = sand.u32 1, %s5793_s25   ;;  %s4765_s11 = sshll.u32 %s5797_s26, 3 }
  0x1d   : > { %p41_p7 = por %p40_p0, %p39_p13  ;;  %s4739_s12 = sshll.u32 %s242_s10, 3 }
  0x1e   : > { %s251_s15 = scalar_lea.hbm %s9669_s0, %s4765_s11  ;;  %s246_s17 = scalar_lea.vmem [#allocation4], %s4739_s12 }
  0x1f   : > { %s253_s16 = sshll.u32 %s251_s15, 4  ;;  %s255_s18 = sshll.u32 %s246_s17, 4  ;;  %s254_s16 = int_to_ptr.hbm [resolvable:$true] %s253_s16  ;;  %s256_s18 = int_to_ptr.vmem [resolvable:$true] %s255_s18 }
  0x20   : > { %p5935_p10 = pnand %p4804_p5, %p41_p7  ;;  %s243_s20 = scalar_lea.sflag [#allocation5], %s242_s10 }
  0x21   : > { %s5693_s21 = sshra.s32 %s254_s16, 4  ;;  %s5700_s12 = scalar_lea.hbm %s9669_s0, 16  ;;  %s5694_s21 = int_to_ptr.hbm [resolvable:$true] %s5693_s21 }
  0x22   : > { %s5695_s27 = scalar_lea.hbm %s5694_s21, 8  ;;  %p5697_p11 = pneg %p5935_p10 }
  0x23   : > { %p5696_p2 = scmp.ne.s32.totalorder %s5694_s21, %s5695_s27  ;;  %p5701_p0 = scmp.lt.s32.totalorder %s5694_s21, %s9669_s0 }
  0x24   : > { %p5702_p5 = scmp.lt.s32.totalorder %s5700_s12, %s5695_s27 }
  0x25   : > { %p5698_p12 = pnand %p5697_p11, %p5696_p2 }
  0x26   : > { %p5703_p7 = por %p5702_p5, %p5701_p0 }
  0x27   : > { %p5699_p13 = pneg %p5698_p12 }
  0x29   : > { %p5704_p9 = pnand %p5703_p7, %p5699_p13 }
  0x2b   : > { %5707 = shalt.err (!%p5704_p9)
}
  0x2c   : > { %4796 = dma.hbm_to_vmem [thread:$0]  (!%p5935_p10), %s254_s16, 128, %s256_s18, %s243_s20  }
  0x2d   : > { %264 = sbr.rel (%p5896_p8) target bundleno = 1792 (0x700), region = 44 }
  0x32   : > { %s5952_s10 = sand.u32 1, %s5789_s24  }
  0x33   : > { %s4743_s15 = sshll.u32 %s5952_s10, 3  ;;  %s267_s17 = scalar_lea.sflag [#allocation5], %s5952_s10 }
  0x34   : > { %s5958_s21 = scalar_lea.vmem [#allocation4], %s4743_s15 }
  0x35   : > { %5768 = dma.done.wait (%p5883_p4), %s267_s17, 128  }
  0x36   : > { %5770 = vsyncadd (%p5883_p4), %s267_s17, 4294967168 }
  0x37   : > { %5772 = dma.done.wait (%p46_p1), [#allocation8], 192  }
  0x38   : > { %5774 = vsyncadd (%p46_p1), [#allocation8], 4294967104 }
  0x39   : > { %5776 = dma.done.wait (%p46_p1), [#allocation11], 128  }
  0x3a   : > { %5778 = vsyncadd (%p46_p1), [#allocation11], 4294967168  ;;  %v315_v0 = vld [vmem:[%s5958_s21] sm:$0xff]  ;;  %s5802_s9 = smov 80   ;;  %s5803_s16 = smov 112   ;;  %vm369_vm0 = vcmask 1047556  }
  0x3b   : > { %341 = vrot.lane.b32.xlu1 %v315_v0, %s5802_s9  ;;  %333 = vrot.lane.b32.xlu0 %v315_v0, %s5803_s16  ;;  %s5804_s28 = smov 48   ;;  %s5805_s18 = smov 96   ;;  %v5809_v1 = vmov 1983009808   ;;  %v5810_v11 = vmov 1934713408  }
  0x3c   : > { %349 = vrot.lane.b32.xlu2 %v315_v0, %s5804_s28  ;;  %s5806_s19 = smov 64   ;;  %s5807_s20 = smov 32   ;;  %v372_v2 = vunpack.c.l.s4 %v5809_v1  ;;  %v386_v12 = vunpack.c.l.s4 %v5810_v11  ;;  %v331_v13 = vrot.slane %v315_v0, 4  ;;  %vm316_vm1 = vcmask 146432  }
  0x3d   : > { %s5808_s27 = smov 16   ;;  %v5811_v53 = vmov 0.0   ;;  %vm319_vm2 = vcmask 140288   ;;  %s5812_s30 = smov 1   ;;  %vm552_vm3 = vcmask 138248   ;;  %vm737_vm4 = vcmask 130048  }
  0x3e   : > { %v5980_v8 = vunpack.c.0.s8 %v372_v2  ;;  %v5986_v17 = vunpack.c.0.s8 %v386_v12  ;;  %318 = vst.msk [vmem:[#allocation2 + $0x8] sm:$0xff] %vm316_vm1, %v5811_v53  ;;  %s5813_s11 = smov 126   ;;  %s5814_s12 = smov 127   ;;  %vm739_vm5 = vcmask 261120   ;;  %vm741_vm6 = vcmask 392192  }
  0x3f   : > { %320 = vst.msk [vmem:[#allocation2 + $0x10] sm:$0x3] %vm319_vm2, %v5811_v53  ;;  %vm743_vm7 = vcmask 523264   ;;  %vm745_vm8 = vcmask 654336   ;;  %vm747_vm9 = vcmask 785408   ;;  %vm749_vm10 = vcmask 916480  }
  0x40   : > { %9768 = vst [vmem:[#allocation17_spill] sm:$0xff] %v5980_v8  ;;  %vm2422_vm11 = vcmask 1043456   ;;  %vm2439_vm12 = vcmask 293888   ;;  %s4606_s17 = sld [smem:[#allocation3]] }
  0x41   : > { %9769 = vst [vmem:[#allocation18_spill] sm:$0xff] %v5986_v17 }
  0x42   : > { %317 = vst.msk [vmem:[#allocation2] sm:$0xff] %vm316_vm1, %v5811_v53 }
  0x43   : > { %337 = vrot.lane.b32.xlu0 %v315_v0, %s5805_s18  ;;  %345 = vrot.lane.b32.xlu1 %v315_v0, %s5806_s19  ;;  %321 = vst.msk [vmem:[#allocation2 + $0x18] sm:$0xff] %vm316_vm1, %v5811_v53 }
  0x44   : > { %353 = vrot.lane.b32.xlu2 %v315_v0, %s5807_s20  ;;  %322 = vst.msk [vmem:[#allocation2 + $0x20] sm:$0xff] %vm316_vm1, %v5811_v53 }
  0x45   : > { %323 = vst.msk [vmem:[#allocation2 + $0x28] sm:$0x3] %vm319_vm2, %v5811_v53 }
  0x46   : > { %324 = vst.msk [vmem:[#allocation2 + $0x30] sm:$0xff] %vm316_vm1, %v5811_v53 }
  0x47   : > { %325 = vst.msk [vmem:[#allocation2 + $0x38] sm:$0xff] %vm316_vm1, %v5811_v53 }
  0x48   : > { %326 = vst.msk [vmem:[#allocation2 + $0x40] sm:$0x3] %vm319_vm2, %v5811_v53 }
  0x49   : > { %327 = vst.msk [vmem:[#allocation2 + $0x48] sm:$0xff] %vm316_vm1, %v5811_v53 }
  0x4a   : > { %328 = vst.msk [vmem:[#allocation2 + $0x50] sm:$0xff] %vm316_vm1, %v5811_v53 }
  0x4b   : > { %357 = vrot.lane.b32.xlu0 %v315_v0, %s5808_s27  ;;  %329 = vst.msk [vmem:[#allocation2 + $0x58] sm:$0x3] %vm319_vm2, %v5811_v53 }
  0x96   : > { %v350_v3 = vpop.permute.xlu2 %349 }
  0x97   : > { %v351_v32 = vrot.slane %v350_v3, 4 }
  0x9e   : > { %v354_v20 = vpop.permute.xlu2 %353 }
  0x9f   : > { %v397_v28 = vrot.slane %v354_v20, 4 }
  0xad   : > { %v342_v4 = vpop.permute.xlu1 %341  ;;  %v334_v5 = vpop.permute.xlu0 %333 }
  0xae   : > { %v375_v6 = vrot.slane %v342_v4, 4  ;;  %v335_v7 = vrot.slane %v334_v5, 4 }
  0xb0   : > { %v432_v9 = vsel %vm369_vm0, %v342_v4, %v335_v7  ;;  %v376_v10 = vsel %vm369_vm0, %v375_v6, %v334_v5 }
  0xb1   : > { %v436_v14 = vperm.slane %v432_v9, %v5980_v8  ;;  %v380_v15 = vperm.slane %v376_v10, %v5980_v8 }
  0xb3   : > { %v437_v21 = vrot.slane %v436_v14, 4  ;;  %v381_v25 = vrot.slane %v380_v15, 4 }
  0xb5   : > { %v338_v16 = vpop.permute.xlu0 %337  ;;  %v346_v23 = vpop.permute.xlu1 %345 }
  0xb6   : > { %v368_v18 = vrot.slane %v338_v16, 4  ;;  %v426_v19 = vsel %vm369_vm0, %v338_v16, %v331_v13  ;;  %v347_v30 = vrot.slane %v346_v23, 4  ;;  %v398_v35 = vsel %vm369_vm0, %v397_v28, %v346_v23  ;;  %v4550_v28 = vld [vmem:[#allocation10] sm:$0xff] }
  0xb7   : > { %v430_v22 = vperm.slane %v426_v19, %v5980_v8  ;;  %v402_v43 = vperm.slane %v398_v35, %v5980_v8 }
  0xb8   : > { %v370_v24 = vsel %vm369_vm0, %v368_v18, %v315_v0  ;;  %v454_v37 = vsel %vm369_vm0, %v354_v20, %v347_v30 }
  0xb9   : > { %v374_v26 = vperm.slane %v370_v24, %v5980_v8  ;;  %v438_v27 = vsel %vm369_vm0, %v437_v21, %v430_v22  ;;  %v458_v46 = vperm.slane %v454_v37, %v5980_v8  ;;  %v439_v49 = vrot.slane %v430_v22, 4  ;;  %v2432_v21 = vld [vmem:[#allocation9] sm:$0xff] }
  0xba   : > { %v444_v29 = vperm.slane %v438_v27, %v5986_v17  ;;  %v411_v54 = vrot.slane %v402_v43, 4 }
  0xbb   : > { %v382_v31 = vsel %vm369_vm0, %v381_v25, %v374_v26  ;;  %v383_v50 = vrot.slane %v374_v26, 4  ;;  %v467_v56 = vrot.slane %v458_v46, 4  ;;  %v440_v58 = vsel %vm369_vm0, %v436_v14, %v439_v49 }
  0xbc   : > { %v388_v33 = vperm.slane %v382_v31, %v5986_v17  ;;  %v449_v34 = vrot.slane %v444_v29, 4  ;;  %501 = vst [vmem:[#allocation1 + $0x10] ss:$2 sm:$0xff] %v444_v29  ;;  %v448_v1 = vperm.slane %v440_v58, %v5986_v17 }
  0xbd   : > { %v358_v36 = vpop.permute.xlu0 %357  ;;  %v384_v61 = vsel %vm369_vm0, %v380_v15, %v383_v50 }
  0xbe   : > { %497 = vst [vmem:[#allocation1] ss:$2 sm:$0xff] %v388_v33  ;;  %v403_v38 = vrot.slane %v358_v36, 4  ;;  %v460_v39 = vsel %vm369_vm0, %v358_v36, %v351_v32  ;;  %v393_v40 = vrot.slane %v388_v33, 4  ;;  %v450_v42 = vsel %vm369_vm0, 0.0, %v449_v34 }
  0xbf   : > { %v464_v41 = vperm.slane %v460_v39, %v5980_v8  ;;  %511 = vst [vmem:[#allocation1 + $0x30] ss:$2 sm:$0xff] %v450_v42  ;;  %v451_v9 = vrot.slane %v448_v1, 4 }
  0xc0   : > { %v404_v44 = vsel %vm369_vm0, %v403_v38, %v350_v3  ;;  %v394_v45 = vsel %vm369_vm0, 0.0, %v393_v40  ;;  %v392_v3 = vperm.slane %v384_v61, %v5986_v17 }
  0xc1   : > { %v408_v47 = vperm.slane %v404_v44, %v5980_v8  ;;  %v465_v48 = vrot.slane %v464_v41, 4  ;;  %507 = vst [vmem:[#allocation1 + $0x20] ss:$2 sm:$0xff] %v394_v45  ;;  %v468_v2 = vsel %vm369_vm0, %v464_v41, %v467_v56  ;;  %v452_v15 = vsel %vm369_vm0, 0.0, %v451_v9 }
  0xc2   : > { %v476_v6 = vperm.slane %v468_v2, %v5986_v17  ;;  %v395_v10 = vrot.slane %v392_v3, 4 }
  0xc3   : > { %v409_v51 = vrot.slane %v408_v47, 4  ;;  %v466_v52 = vsel %vm369_vm0, %v465_v48, %v458_v46  ;;  %v412_v62 = vsel %vm369_vm0, %v408_v47, %v411_v54 }
  0xc4   : > { %v472_v55 = vperm.slane %v466_v52, %v5986_v17  ;;  %v420_v5 = vperm.slane %v412_v62, %v5986_v17  ;;  %v479_v13 = vrot.slane %v476_v6, 4  ;;  %v396_v16 = vsel %vm369_vm0, 0.0, %v395_v10 }
  0xc5   : > { %v410_v57 = vsel %vm369_vm0, %v409_v51, %v402_v43 }
  0xc6   : > { %v416_v59 = vperm.slane %v410_v57, %v5986_v17  ;;  %503 = vst [vmem:[#allocation1 + $0x11] ss:$2 sm:$0xff] %v472_v55  ;;  %v477_v60 = vrot.slane %v472_v55, 4  ;;  %v423_v12 = vrot.slane %v420_v5, 4  ;;  %v480_v20 = vsel %vm369_vm0, 0.0, %v479_v13 }
  0xc8   : > { %499 = vst [vmem:[#allocation1 + $0x1] ss:$2 sm:$0xff] %v416_v59  ;;  %v421_v63 = vrot.slane %v416_v59, 4  ;;  %v478_v0 = vsel %vm369_vm0, 0.0, %v477_v60  ;;  %v424_v19 = vsel %vm369_vm0, 0.0, %v423_v12 }
  0xc9   : > { %513 = vst [vmem:[#allocation1 + $0x31] ss:$2 sm:$0xff] %v478_v0 }
  0xca   : > { %v422_v4 = vsel %vm369_vm0, 0.0, %v421_v63 }
  0xcb   : > { %509 = vst [vmem:[#allocation1 + $0x21] ss:$2 sm:$0xff] %v422_v4 }
  0xcd   : > { %v505_v7 = vld.sshfl [vmem:[#allocation1 + $0x10] sm:$0xff pattern:$0x75316420] }
  0xce   : > { %530 = vrot.lane.b32.xlu2 %v505_v7, %s5812_s30  ;;  %518 = vst [vmem:[#allocation1 + $0x10] ss:$2 sm:$0xff] %v448_v1 }
  0xcf   : > { %519 = vst [vmem:[#allocation1 + $0x11] ss:$2 sm:$0xff] %v476_v6  ;;  %v504_v11 = vld.sshfl [vmem:[#allocation1] sm:$0xff pattern:$0x75316420] }
  0xd0   : > { %528 = vrot.lane.b32.xlu1 %v504_v11, %s5812_s30  ;;  %516 = vst [vmem:[#allocation1] ss:$2 sm:$0xff] %v392_v3  ;;  %v515_v14 = vld.sshfl [vmem:[#allocation1 + $0x30] sm:$0xff pattern:$0x75316420] }
  0xd1   : > { %517 = vst [vmem:[#allocation1 + $0x1] ss:$2 sm:$0xff] %v420_v5 }
  0xd2   : > { %v514_v18 = vld.sshfl [vmem:[#allocation1 + $0x20] sm:$0xff pattern:$0x75316420]  ;;  %524 = vst [vmem:[#allocation1 + $0x30] ss:$2 sm:$0xff] %v452_v15 }
  0xd3   : > { %532 = vrot.lane.b32.xlu0 %v514_v18, %s5812_s30  ;;  %522 = vst [vmem:[#allocation1 + $0x20] ss:$2 sm:$0xff] %v396_v16 }
  0xd4   : > { %523 = vst [vmem:[#allocation1 + $0x21] ss:$2 sm:$0xff] %v424_v19 }
  0xd5   : > { %525 = vst [vmem:[#allocation1 + $0x31] ss:$2 sm:$0xff] %v480_v20 }
  0xd6   : > { %v521_v23 = vld.sshfl [vmem:[#allocation1 + $0x10] sm:$0xff pattern:$0x75316420] }
  0xd8   : > { %v520_v22 = vld.sshfl [vmem:[#allocation1] sm:$0xff pattern:$0x75316420]  ;;  %534 = vrot.lane.b32.xlu1 %v515_v14, %s5812_s30 }
  0xd9   : > { %2434 = vst [vmem:[#allocation1] ss:$2 sm:$0xff] %v2432_v21  ;;  %536 = vrot.lane.b32.xlu2 %v520_v22, %s5812_s30 }
  0xdb   : > { %538 = vrot.lane.b32.xlu0 %v521_v23, %s5812_s30  ;;  %v526_v24 = vld.sshfl [vmem:[#allocation1 + $0x20] sm:$0xff pattern:$0x75316420] }
  0xdc   : > { %v527_v25 = vld.sshfl [vmem:[#allocation1 + $0x30] sm:$0xff pattern:$0x75316420] }
  0xe0   : > { %540 = vrot.lane.b32.xlu1 %v526_v24, %s5812_s30  ;;  %v6056_v26 = vld.sshfl [vmem:[#allocation1] sm:$0xff pattern:$0x75316420]  ;;  %v6058_v27 = vld.sshfl [vmem:[#allocation1 + $0x8] sm:$0xff pattern:$0x75316420] }
  0xe1   : > { %542 = vrot.lane.b32.xlu2 %v527_v25, %s5812_s30  ;;  %9770 = vst [vmem:[#allocation19_spill] sm:$0xff] %v6056_v26 }
  0xe2   : > { %9771 = vst [vmem:[#allocation20_spill] sm:$0xff] %v6058_v27 }
  0xe3   : > { %4552 = vst [vmem:[#allocation1] ss:$2 sm:$0xff] %v4550_v28 }
 0x128   : > { %v531_v29 = vpop.permute.xlu2 %530 }
 0x129   : > { %554 = vst.msk [vmem:[#allocation2 + $0x9] sm:$0xff] %vm552_vm3, %v531_v29 }
 0x130   : > { %v6074_v39 = vld [vmem:[#allocation2 + $0x9] sm:$0xff] }
 0x131   : > { %v6085_v44 = vld [vmem:[#allocation2 + $0xa] sm:$0xff]  ;;  %v1244_v3 = vrot.slane %v6074_v39, 4 }
 0x132   : > { %v1854_v4 = vrot.slane %v6085_v44, 4 }
 0x133   : > { %v537_v30 = vpop.permute.xlu2 %536 }
 0x134   : > { %557 = vst.msk [vmem:[#allocation2 + $0x31] sm:$0xff] %vm552_vm3, %v537_v30 }
 0x13b   : > { %v543_v31 = vpop.permute.xlu2 %542  ;;  %v565_v56 = vld [vmem:[#allocation2 + $0x30] sm:$0xff] }
 0x13c   : > { %560 = vst.msk [vmem:[#allocation2 + $0x51] sm:$0xff] %vm552_vm3, %v543_v31  ;;  %v6128_v59 = vld [vmem:[#allocation2 + $0x31] sm:$0xff]  ;;  %v569_v10 = vrot.slane %v565_v56, 4 }
 0x142   : > { %v529_v32 = vpop.permute.xlu1 %528 }
 0x143   : > { %553 = vst.msk [vmem:[#allocation2 + $0x1] sm:$0xff] %vm552_vm3, %v529_v32  ;;  %v6166_v19 = vld [vmem:[#allocation2 + $0x51] sm:$0xff] }
 0x144   : > { %v6175_v25 = vld [vmem:[#allocation2 + $0x52] sm:$0xff] }
 0x145   : > { %v533_v33 = vpop.permute.xlu0 %532 }
 0x146   : > { %555 = vst.msk [vmem:[#allocation2 + $0x19] sm:$0xff] %vm552_vm3, %v533_v33 }
 0x14a   : > { %v535_v34 = vpop.permute.xlu1 %534  ;;  %v6065_v35 = vld [vmem:[#allocation2] sm:$0xff]  ;;  %v6067_v36 = vld [vmem:[#allocation2 + $0x8] sm:$0xff] }
 0x14b   : > { %v6069_v37 = vld [vmem:[#allocation2 + $0x1] sm:$0xff]  ;;  %556 = vst.msk [vmem:[#allocation2 + $0x21] sm:$0xff] %vm552_vm3, %v535_v34  ;;  %v4862_v38 = vpack.i.bf16 %v6067_v36, %v6065_v35  ;;  %v571_v1 = vrot.slane %v6065_v35, 4  ;;  %v627_v28 = vrot.slane %v6067_v36, 4  ;;  %v570_v29 = vsel %vm369_vm0, %v569_v10, %v6065_v35 }
 0x14c   : > { %v4872_v40 = vpack.i.bf16 %v6074_v39, %v6069_v37  ;;  %v6082_v42 = vld [vmem:[#allocation2 + $0x2] sm:$0xff]  ;;  %v1188_v63 = vrot.slane %v6069_v37, 4 }
 0x14d   : > { %4863 = vrot.lane.b32.xlu0 %v4862_v38, %s5813_s11  ;;  %v539_v41 = vpop.permute.xlu0 %538  ;;  %4858 = vrot.lane.b32.xlu1 %v4862_v38, %s5814_s12  ;;  %v4877_v45 = vpack.i.bf16 %v6085_v44, %v6082_v42  ;;  %v6097_v48 = vld [vmem:[#allocation2 + $0x19] sm:$0xff]  ;;  %v1798_v7 = vrot.slane %v6082_v42, 4  ;;  %v572_v12 = vsel %vm369_vm0, %v565_v56, %v571_v1 }
 0x14e   : > { %558 = vst.msk [vmem:[#allocation2 + $0x39] sm:$0xff] %vm552_vm3, %v539_v41  ;;  %4873 = vrot.lane.b32.xlu2 %v4872_v40, %s5813_s11  ;;  %v6099_v49 = vld [vmem:[#allocation2 + $0x18] sm:$0xff]  ;;  %v1189_v2 = vsel %vm369_vm0, %v6128_v59, %v1188_v63  ;;  %v1200_v13 = vrot.slane %v6097_v48, 4 }
 0x14f   : > { %v6164_v18 = vperm.slane %v1189_v2, %v5980_v8  ;;  %v583_v30 = vrot.slane %v6099_v49, 4 }
 0x151   : > { %v1224_v41 = vrot.slane %v6164_v18, 4 }
 0x152   : > { %v541_v43 = vpop.permute.xlu1 %540  ;;  %v6093_v46 = vld [vmem:[#allocation2 + $0x21] sm:$0xff] }
 0x153   : > { %559 = vst.msk [vmem:[#allocation2 + $0x49] sm:$0xff] %vm552_vm3, %v541_v43  ;;  %v6095_v47 = vld [vmem:[#allocation2 + $0x20] sm:$0xff]  ;;  %v4897_v50 = vpack.i.bf16 %v6093_v46, %v6097_v48  ;;  %v1256_v23 = vrot.slane %v6093_v46, 4 }
 0x154   : > { %v4887_v51 = vpack.i.bf16 %v6095_v47, %v6099_v49  ;;  %v6109_v52 = vld [vmem:[#allocation2 + $0x1a] sm:$0xff]  ;;  %v6111_v53 = vld [vmem:[#allocation2 + $0x22] sm:$0xff]  ;;  %v639_v43 = vrot.slane %v6095_v47, 4 }
 0x155   : > { %4868 = vrot.lane.b32.xlu0 %v4872_v40, %s5814_s12  ;;  %2192 = vrot.lane.b32.xlu1 %v6082_v42, %s5813_s11  ;;  %v4902_v54 = vpack.i.bf16 %v6111_v53, %v6109_v52  ;;  %v6118_v55 = vld [vmem:[#allocation2 + $0x38] sm:$0xff]  ;;  %v1866_v9 = vrot.slane %v6111_v53, 4  ;;  %v1810_v16 = vrot.slane %v6109_v52, 4  ;;  %v580_v40 = vperm.slane %v572_v12, %v5980_v8 }
 0x156   : > { %4878 = vrot.lane.b32.xlu2 %v4877_v45, %s5814_s12  ;;  %v4912_v57 = vpack.i.bf16 %v6118_v55, %v565_v56  ;;  %v6126_v58 = vld [vmem:[#allocation2 + $0x39] sm:$0xff]  ;;  %v6203_v45 = vperm.slane %v570_v29, %v5980_v8 }
 0x157   : > { %v4922_v60 = vpack.i.bf16 %v6126_v58, %v6128_v59  ;;  %v6135_v61 = vld [vmem:[#allocation2 + $0x3a] sm:$0xff]  ;;  %v6137_v62 = vld [vmem:[#allocation2 + $0x32] sm:$0xff]  ;;  %v1245_v22 = vsel %vm369_vm0, %v6126_v58, %v1244_v3  ;;  %v1867_v32 = vsel %vm369_vm0, %v6175_v25, %v1866_v9 }
 0x158   : > { %v4927_v0 = vpack.i.bf16 %v6135_v61, %v6137_v62  ;;  %v1855_v14 = vsel %vm369_vm0, %v6135_v61, %v1854_v4  ;;  %v1799_v21 = vsel %vm369_vm0, %v6137_v62, %v1798_v7  ;;  %v6197_v38 = vperm.slane %v1245_v22, %v5980_v8 }
 0x159   : > { %v6190_v34 = vperm.slane %v1855_v14, %v5980_v8  ;;  %v6194_v35 = vperm.slane %v1799_v21, %v5980_v8  ;;  %v628_v7 = vsel %vm369_vm0, %v6118_v55, %v627_v28  ;;  %v1242_v21 = vrot.slane %v6126_v58, 4 }
 0x15a   : > { %v567_v5 = vld [vmem:[#allocation2 + $0x48] sm:$0xff]  ;;  %v568_v6 = vld [vmem:[#allocation2 + $0x50] sm:$0xff]  ;;  %v1280_v4 = vrot.slane %v6197_v38, 4  ;;  %v607_v58 = vrot.slane %v580_v40, 4 }
 0x15b   : > { %v6154_v11 = vld [vmem:[#allocation2 + $0x49] sm:$0xff]  ;;  %v4937_v20 = vpack.i.bf16 %v568_v6, %v567_v5  ;;  %v584_v63 = vsel %vm369_vm0, %v567_v5, %v583_v30  ;;  %v637_v1 = vrot.slane %v568_v6, 4  ;;  %v1834_v2 = vrot.slane %v6194_v35, 4 }
 0x15c   : > { %v6160_v15 = vld [vmem:[#allocation2 + $0x4a] sm:$0xff]  ;;  %v4947_v24 = vpack.i.bf16 %v6166_v19, %v6154_v11  ;;  %v1201_v33 = vsel %vm369_vm0, %v6154_v11, %v1200_v13  ;;  %v1890_v3 = vrot.slane %v6190_v34, 4  ;;  %v592_v13 = vperm.slane %v584_v63, %v5980_v8 }
 0x15d   : > { %4898 = vrot.lane.b32.xlu0 %v4897_v50, %s5813_s11  ;;  %4888 = vrot.lane.b32.xlu1 %v4887_v51, %s5813_s11  ;;  %v1811_v31 = vsel %vm369_vm0, %v6160_v15, %v1810_v16  ;;  %v6213_v56 = vperm.slane %v1201_v33, %v5980_v8  ;;  %v4952_v9 = vpack.i.bf16 %v6175_v25, %v6160_v15 }
 0x15e   : > { %2194 = vrot.lane.b32.xlu2 %v6085_v44, %s5813_s11  ;;  %v636_v16 = vperm.slane %v628_v7, %v5980_v8  ;;  %v605_v28 = vrot.slane %v592_v13, 4 }
 0x15f   : > { %v1225_v12 = vsel %vm369_vm0, %v6213_v56, %v1224_v41 }
 0x160   : > { %v663_v41 = vrot.slane %v636_v16, 4 }
 0x165   : > { %4903 = vrot.lane.b32.xlu0 %v4902_v54, %s5814_s12  ;;  %4893 = vrot.lane.b32.xlu1 %v4897_v50, %s5814_s12  ;;  %v625_v50 = vrot.slane %v6118_v55, 4  ;;  %v6210_v54 = vperm.slane %v1867_v32, %v5980_v8  ;;  %v1186_v55 = vrot.slane %v6128_v59, 4  ;;  %v1198_v32 = vrot.slane %v6154_v11, 4 }
 0x166   : > { %4883 = vrot.lane.b32.xlu2 %v4887_v51, %s5814_s12  ;;  %v6207_v51 = vperm.slane %v1811_v31, %v5980_v8 }
 0x167   : > { %v1891_v59 = vsel %vm369_vm0, %v6210_v54, %v1890_v3  ;;  %v1199_v7 = vsel %vm369_vm0, %v1198_v32, %v6097_v48 }
 0x168   : > { %v6270_v33 = vperm.slane %v1891_v59, %v5986_v17 }
 0x16d   : > { %2196 = vrot.lane.b32.xlu0 %v6109_v52, %s5813_s11  ;;  %2198 = vrot.lane.b32.xlu1 %v6111_v53, %s5813_s11 }
 0x16e   : > { %4913 = vrot.lane.b32.xlu2 %v4912_v57, %s5813_s11 }
 0x175   : > { %4908 = vrot.lane.b32.xlu0 %v4912_v57, %s5814_s12  ;;  %4923 = vrot.lane.b32.xlu1 %v4922_v60, %s5813_s11  ;;  %v1257_v57 = vsel %vm369_vm0, %v6166_v19, %v1256_v23 }
 0x176   : > { %4918 = vrot.lane.b32.xlu2 %v4922_v60, %s5814_s12  ;;  %v581_v60 = vrot.slane %v567_v5, 4  ;;  %v6227_v10 = vperm.slane %v1257_v57, %v5980_v8  ;;  %v626_v5 = vsel %vm369_vm0, %v625_v50, %v6067_v36  ;;  %v1187_v57 = vsel %vm369_vm0, %v1186_v55, %v6069_v37 }
 0x177   : > { %v6253_v23 = vperm.slane %v626_v5, %v5980_v8  ;;  %v1852_v55 = vrot.slane %v6135_v61, 4 }
 0x178   : > { %v582_v36 = vsel %vm369_vm0, %v581_v60, %v6099_v49  ;;  %v1281_v22 = vsel %vm369_vm0, %v6227_v10, %v1280_v4  ;;  %v1243_v60 = vsel %vm369_vm0, %v1242_v21, %v6074_v39  ;;  %v6296_v4 = vperm.slane %v1187_v57, %v5980_v8 }
 0x179   : > { %v6263_v30 = vperm.slane %v582_v36, %v5980_v8  ;;  %v651_v50 = vrot.slane %v6253_v23, 4  ;;  %v6309_v5 = vperm.slane %v1243_v60, %v5980_v8  ;;  %v1832_v36 = vrot.slane %v6207_v51, 4 }
 0x17a   : > { %v1212_v21 = vrot.slane %v6296_v4, 4  ;;  %v1278_v59 = vrot.slane %v6227_v10, 4 }
 0x17c   : > { %v1279_v32 = vsel %vm369_vm0, %v1278_v59, %v6197_v38 }
 0x17d   : > { %2202 = vrot.lane.b32.xlu0 %v6135_v61, %s5813_s11  ;;  %4928 = vrot.lane.b32.xlu1 %v4927_v0, %s5814_s12  ;;  %v640_v0 = vsel %vm369_vm0, %v568_v6, %v639_v43  ;;  %v1835_v6 = vsel %vm369_vm0, %v6207_v51, %v1834_v2  ;;  %v595_v43 = vrot.slane %v6203_v45, 4  ;;  %v606_v2 = vsel %vm369_vm0, %v605_v28, %v580_v40 }
 0x17e   : > { %2200 = vrot.lane.b32.xlu2 %v6137_v62, %s5813_s11  ;;  %v648_v14 = vperm.slane %v640_v0, %v5980_v8  ;;  %v6257_v49 = vperm.slane %v1835_v6, %v5986_v17  ;;  %v608_v0 = vsel %vm369_vm0, %v592_v13, %v607_v58  ;;  %v1808_v58 = vrot.slane %v6160_v15, 4 }
 0x17f   : > { %v596_v37 = vsel %vm369_vm0, %v6263_v30, %v595_v43  ;;  %v6303_v40 = vperm.slane %v608_v0, %v5986_v17  ;;  %v1853_v28 = vsel %vm369_vm0, %v1852_v55, %v6085_v44  ;;  %v1906_v55 = vrot.slane %v6270_v33, 4 }
 0x180   : > { %v661_v29 = vrot.slane %v648_v14, 4  ;;  %v4967_v11 = vpack.i.bf16 %v6270_v33, %v6257_v49  ;;  %v6320_v13 = vperm.slane %v596_v37, %v5986_v17  ;;  %v1809_v44 = vsel %vm369_vm0, %v1808_v58, %v6109_v52 }
 0x181   : > { %v6377_v38 = vperm.slane %v1853_v28, %v5980_v8  ;;  %v1815_v60 = vperm.slane %v1809_v44, %v5980_v8  ;;  %v623_v37 = vrot.slane %v6303_v40, 4  ;;  %v1907_v59 = vsel %vm369_vm0, 0.0, %v1906_v55 }
 0x182   : > { %v662_v3 = vsel %vm369_vm0, %v661_v29, %v636_v16  ;;  %v6327_v16 = vperm.slane %v1199_v7, %v5980_v8  ;;  %v1850_v7 = vrot.slane %v6257_v49, 4 }
 0x183   : > { %v6317_v48 = vperm.slane %v662_v3, %v5986_v17  ;;  %v624_v49 = vsel %vm369_vm0, 0.0, %v623_v37 }
 0x184   : > { %v1213_v10 = vsel %vm369_vm0, %v6327_v16, %v1212_v21 }
 0x185   : > { %4938 = vrot.lane.b32.xlu0 %v4937_v20, %s5813_s11  ;;  %4933 = vrot.lane.b32.xlu1 %v4937_v20, %s5814_s12  ;;  %v638_v20 = vsel %vm369_vm0, %v637_v1, %v6095_v47  ;;  %v6260_v47 = vperm.slane %v1225_v12, %v5986_v17  ;;  %v664_v1 = vsel %vm369_vm0, %v648_v14, %v663_v41 }
 0x186   : > { %4948 = vrot.lane.b32.xlu2 %v4947_v24, %s5813_s11  ;;  %v6266_v31 = vperm.slane %v638_v20, %v5980_v8  ;;  %v6314_v12 = vperm.slane %v606_v2, %v5986_v17  ;;  %v1222_v20 = vrot.slane %v6213_v56, 4  ;;  %v6368_v41 = vperm.slane %v1213_v10, %v5986_v17 }
 0x187   : > { %v1878_v2 = vrot.slane %v6377_v38, 4 }
 0x188   : > { %v652_v39 = vsel %vm369_vm0, %v6266_v31, %v651_v50  ;;  %v4977_v51 = vpack.i.bf16 %v6317_v48, %v6314_v12  ;;  %v1223_v29 = vsel %vm369_vm0, %v1222_v20, %v6164_v18  ;;  %v1864_v50 = vrot.slane %v6175_v25, 4 }
 0x189   : > { %v6323_v14 = vperm.slane %v652_v39, %v5986_v17  ;;  %v1229_v57 = vperm.slane %v1223_v29, %v5986_v17  ;;  %v1851_v20 = vsel %vm369_vm0, 0.0, %v1850_v7  ;;  %v1210_v7 = vrot.slane %v6327_v16, 4 }
 0x18b   : > { %v1238_v33 = vrot.slane %v1229_v57, 4 }
 0x18d   : > { %4943 = vrot.lane.b32.xlu0 %v4947_v24, %s5814_s12  ;;  %2204 = vrot.lane.b32.xlu1 %v6160_v15, %s5813_s11  ;;  %v1254_v24 = vrot.slane %v6166_v19, 4  ;;  %v6273_v19 = vperm.slane %v1281_v22, %v5986_v17  ;;  %v1268_v22 = vrot.slane %v6309_v5, 4  ;;  %v1239_v28 = vsel %vm369_vm0, 0.0, %v1238_v33 }
 0x18e   : > { %4953 = vrot.lane.b32.xlu2 %v4952_v9, %s5814_s12  ;;  %v6306_v9 = vperm.slane %v664_v1, %v5986_v17 }
 0x18f   : > { %v4962_v63 = vpack.i.bf16 %v6273_v19, %v6260_v47  ;;  %v1255_v6 = vsel %vm369_vm0, %v1254_v24, %v6093_v46  ;;  %v1796_v46 = vrot.slane %v6137_v62, 4  ;;  %v1888_v24 = vrot.slane %v6210_v54, 4 }
 0x190   : > { %v4957_v61 = vpack.i.bf16 %v6306_v9, %v6303_v40  ;;  %v4972_v62 = vpack.i.bf16 %v6323_v14, %v6320_v13  ;;  %v6344_v56 = vperm.slane %v1255_v6, %v5980_v8  ;;  %v1833_v54 = vsel %vm369_vm0, %v1832_v36, %v6194_v35 }
 0x191   : > { %v1797_v15 = vsel %vm369_vm0, %v1796_v46, %v6082_v42  ;;  %v1889_v42 = vsel %vm369_vm0, %v1888_v24, %v6190_v34  ;;  %v6371_v43 = vperm.slane %v1833_v54, %v5986_v17  ;;  %v679_v39 = vrot.slane %v6306_v9, 4 }
 0x192   : > { %v1269_v35 = vsel %vm369_vm0, %v6344_v56, %v1268_v22  ;;  %v6374_v18 = vperm.slane %v1797_v15, %v5980_v8  ;;  %v6385_v52 = vperm.slane %v1889_v42, %v5986_v17  ;;  %v5012_v24 = vpack.i.bf16 %v1907_v59, %v1851_v20 }
 0x193   : > { %v6382_v34 = vperm.slane %v1269_v35, %v5986_v17  ;;  %v680_v9 = vsel %vm369_vm0, 0.0, %v679_v39  ;;  %v1296_v54 = vrot.slane %v6273_v19, 4  ;;  %v1820_v35 = vrot.slane %v1815_v60, 4 }
 0x194   : > { %v1822_v1 = vrot.slane %v6374_v18, 4  ;;  %v5002_v22 = vpack.i.bf16 %v680_v9, %v624_v49  ;;  %v1848_v16 = vrot.slane %v6371_v43, 4  ;;  %v1904_v33 = vrot.slane %v6385_v52, 4 }
 0x195   : > { %4968 = vrot.lane.b32.xlu0 %v4967_v11, %s5805_s18  ;;  %4963 = vrot.lane.b32.xlu1 %v4962_v63, %s5805_s18  ;;  %v1285_v11 = vperm.slane %v1279_v32, %v5986_v17  ;;  %v1865_v63 = vsel %vm369_vm0, %v1864_v50, %v6111_v53  ;;  %v4982_v0 = vpack.i.bf16 %v6382_v34, %v6368_v41  ;;  %v649_v32 = vrot.slane %v6266_v31, 4 }
 0x196   : > { %2206 = vrot.lane.b32.xlu2 %v6175_v25, %s5813_s11  ;;  %v4997_v25 = vpack.i.bf16 %v6385_v52, %v6371_v43  ;;  %v1823_v53 = vsel %vm369_vm0, %v1815_v60, %v1822_v1  ;;  %v1871_v6 = vperm.slane %v1865_v63, %v5980_v8  ;;  %v1297_v44 = vsel %vm369_vm0, 0.0, %v1296_v54 }
 0x197   : > { %v4987_v3 = vpack.i.bf16 %v1285_v11, %v1229_v57  ;;  %v1831_v40 = vperm.slane %v1823_v53, %v5986_v17  ;;  %v1294_v10 = vrot.slane %v1285_v11, 4  ;;  %v1821_v31 = vsel %vm369_vm0, %v1820_v35, %v6374_v18 }
 0x198   : > { %v1879_v36 = vsel %vm369_vm0, %v1871_v6, %v1878_v2  ;;  %v1876_v11 = vrot.slane %v1871_v6, 4  ;;  %v650_v1 = vsel %vm369_vm0, %v649_v32, %v6253_v23  ;;  %v6452_v37 = vperm.slane %v1821_v31, %v5986_v17 }
 0x199   : > { %v1887_v21 = vperm.slane %v1879_v36, %v5986_v17  ;;  %v1295_v42 = vsel %vm369_vm0, 0.0, %v1294_v10  ;;  %v1846_v57 = vrot.slane %v1831_v40, 4  ;;  %v6458_v23 = vperm.slane %v650_v1, %v5986_v17 }
 0x19a   : > { %v5032_v19 = vpack.i.bf16 %v1295_v42, %v1239_v28  ;;  %9772 = vst [vmem:[#allocation21_spill] sm:$0xff] %v6452_v37  ;;  %v1844_v49 = vrot.slane %v6452_v37, 4  ;;  %v1905_v52 = vsel %vm369_vm0, 0.0, %v1904_v33 }
 0x19b   : > { %v4992_v58 = vpack.i.bf16 %v1887_v21, %v1831_v40  ;;  %v1847_v2 = vsel %vm369_vm0, 0.0, %v1846_v57  ;;  %9774 = vst [vmem:[#allocation23_spill] sm:$0xff] %v6458_v23  ;;  %v673_v20 = vrot.slane %v6458_v23, 4 }
 0x19d   : > { %4978 = vrot.lane.b32.xlu0 %v4977_v51, %s5806_s19  ;;  %4973 = vrot.lane.b32.xlu1 %v4972_v62, %s5807_s20  ;;  %v677_v51 = vrot.slane %v6317_v48, 4  ;;  %v1240_v62 = vrot.slane %v6260_v47, 4  ;;  %v593_v48 = vrot.slane %v6263_v30, 4  ;;  %v675_v30 = vrot.slane %v6323_v14, 4 }
 0x19e   : > { %4958 = vrot.lane.b32.xlu2 %v4957_v61, %s5805_s18  ;;  %v621_v61 = vrot.slane %v6314_v12, 4  ;;  %v674_v43 = vsel %vm369_vm0, 0.0, %v673_v20 }
 0x19f   : > { %v678_v12 = vsel %vm369_vm0, 0.0, %v677_v51  ;;  %v1241_v47 = vsel %vm369_vm0, 0.0, %v1240_v62  ;;  %v594_v60 = vsel %vm369_vm0, %v593_v48, %v6203_v45  ;;  %v676_v39 = vsel %vm369_vm0, 0.0, %v675_v30 }
 0x1a0   : > { %v622_v29 = vsel %vm369_vm0, 0.0, %v621_v61  ;;  %v5007_v63 = vpack.i.bf16 %v1297_v44, %v1241_v47  ;;  %v6455_v45 = vperm.slane %v594_v60, %v5986_v17  ;;  %v1845_v61 = vsel %vm369_vm0, 0.0, %v1844_v49 }
 0x1a1   : > { %v5022_v50 = vpack.i.bf16 %v678_v12, %v622_v29  ;;  %v1849_v62 = vsel %vm369_vm0, 0.0, %v1848_v16 }
 0x1a2   : > { %9773 = vst [vmem:[#allocation22_spill] sm:$0xff] %v6455_v45  ;;  %v617_v9 = vrot.slane %v6455_v45, 4  ;;  %v5042_v48 = vpack.i.bf16 %v1905_v52, %v1849_v62 }
 0x1a4   : > { %v618_v51 = vsel %vm369_vm0, 0.0, %v617_v9 }
 0x1a5   : > { %4983 = vrot.lane.b32.xlu0 %v4982_v0, %s5807_s20  ;;  %4998 = vrot.lane.b32.xlu1 %v4997_v25, %s5806_s19  ;;  %v1236_v0 = vrot.slane %v6368_v41, 4  ;;  %v619_v25 = vrot.slane %v6320_v13, 4  ;;  %v1902_v41 = vrot.slane %v1887_v21, 4  ;;  %v1292_v13 = vrot.slane %v6382_v34, 4 }
 0x1a6   : > { %4988 = vrot.lane.b32.xlu2 %v4987_v3, %s5806_s19  ;;  %v1877_v3 = vsel %vm369_vm0, %v1876_v11, %v6377_v38  ;;  %v1266_v21 = vrot.slane %v6344_v56, 4  ;;  %v5047_v29 = vpack.i.bf16 %v674_v43, %v618_v51 }
 0x1a7   : > { %v1237_v18 = vsel %vm369_vm0, 0.0, %v1236_v0  ;;  %v620_v34 = vsel %vm369_vm0, 0.0, %v619_v25  ;;  %v1903_v38 = vsel %vm369_vm0, 0.0, %v1902_v41  ;;  %v1293_v53 = vsel %vm369_vm0, 0.0, %v1292_v13 }
 0x1a8   : > { %v6407_v46 = vpop.permute.xlu2 %4873  ;;  %v6466_v6 = vperm.slane %v1877_v3, %v5986_v17  ;;  %v5037_v55 = vpack.i.bf16 %v1903_v38, %v1847_v2  ;;  %v5027_v36 = vpack.i.bf16 %v1293_v53, %v1237_v18  ;;  %v5017_v40 = vpack.i.bf16 %v676_v39, %v620_v34 }
 0x1a9   : > { %v1267_v56 = vsel %vm369_vm0, %v1266_v21, %v6309_v5  ;;  %v9680_v60 = vunpack.i.h.bf16 %v6407_v46  ;;  %v9681_v41 = vunpack.i.l.bf16 %v6407_v46 }
 0x1aa   : > { %9775 = vst [vmem:[#allocation24_spill] sm:$0xff] %v6466_v6  ;;  %v1900_v59 = vrot.slane %v6466_v6, 4  ;;  %v6498_v12 = vperm.slane %v1267_v56, %v5986_v17 }
 0x1ab   : > { %v1664_v38 = vrot.slane %v9680_v60, 4 }
 0x1ac   : > { %v1901_v54 = vsel %vm369_vm0, 0.0, %v1900_v59  ;;  %9777 = vst [vmem:[#allocation26_spill] sm:$0xff] %v6498_v12  ;;  %v1290_v47 = vrot.slane %v6498_v12, 4 }
 0x1ad   : > { %5003 = vrot.lane.b32.xlu0 %v5002_v22, %s5803_s16  ;;  %5013 = vrot.lane.b32.xlu1 %v5012_v24, %s5803_s16  ;;  %v1211_v22 = vsel %vm369_vm0, %v1210_v7, %v6296_v4  ;;  %v5057_v28 = vpack.i.bf16 %v1901_v54, %v1845_v61 }
 0x1ae   : > { %4993 = vrot.lane.b32.xlu2 %v4992_v58, %s5807_s20  ;;  %v6491_v10 = vperm.slane %v1211_v22, %v5986_v17  ;;  %v1291_v44 = vsel %vm369_vm0, 0.0, %v1290_v47 }
 0x1b0   : > { %v6422_v15 = vpop.permute.xlu2 %4878  ;;  %9776 = vst [vmem:[#allocation25_spill] sm:$0xff] %v6491_v10  ;;  %v1234_v5 = vrot.slane %v6491_v10, 4 }
 0x1b1   : > { %v9676_v13 = vunpack.i.h.bf16 %v6422_v15  ;;  %v9677_v2 = vunpack.i.l.bf16 %v6422_v15 }
 0x1b2   : > { %v1235_v42 = vsel %vm369_vm0, 0.0, %v1234_v5 }
 0x1b3   : > { %v6547_v20 = vrot.slane %v9677_v2, 4 }
 0x1b5   : > { %5033 = vrot.lane.b32.xlu0 %v5032_v19, %s5802_s9  ;;  %5023 = vrot.lane.b32.xlu1 %v5022_v50, %s5802_s9  ;;  %v5052_v50 = vpack.i.bf16 %v1291_v44, %v1235_v42 }
 0x1b6   : > { %5008 = vrot.lane.b32.xlu2 %v5007_v63, %s5803_s16 }
 0x1b8   : > { %v6448_v14 = vpop.permute.xlu2 %2194 }
 0x1bd   : > { %5038 = vrot.lane.b32.xlu0 %v5037_v55, %s5804_s28  ;;  %5028 = vrot.lane.b32.xlu1 %v5027_v36, %s5804_s28  ;;  %v1608_v36 = vrot.slane %v9681_v41, 4 }
 0x1be   : > { %5018 = vrot.lane.b32.xlu2 %v5017_v40, %s5804_s28  ;;  %v6541_v40 = vrot.slane %v9676_v13, 4 }
 0x1bf   : > { %v6479_v24 = vpop.permute.xlu0 %4863  ;;  %v6481_v58 = vpop.permute.xlu1 %4858 }
 0x1c0   : > { %v6493_v4 = vpop.permute.xlu2 %4883  ;;  %v4866_v3 = vunpack.i.h.bf16 %v6479_v24  ;;  %v4865_v34 = vunpack.i.l.bf16 %v6479_v24  ;;  %v9682_v39 = vunpack.i.h.bf16 %v6481_v58  ;;  %v9687_v7 = vunpack.i.l.bf16 %v6481_v58 }
 0x1c1   : > { %v9678_v53 = vunpack.i.h.bf16 %v6493_v4  ;;  %v9679_v49 = vunpack.i.l.bf16 %v6493_v4 }
 0x1c2   : > { %v1054_v16 = vrot.slane %v4866_v3, 4  ;;  %v998_v33 = vrot.slane %v4865_v34, 4  ;;  %v6556_v61 = vrot.slane %v9682_v39, 4  ;;  %v6560_v51 = vrot.slane %v9687_v7, 4 }
 0x1c3   : > { %v6564_v56 = vrot.slane %v9678_v53, 4  ;;  %v6570_v52 = vrot.slane %v9679_v49, 4 }
 0x1c5   : > { %5058 = vrot.lane.b32.xlu1 %v5057_v28, %s5808_s27  ;;  %5048 = vrot.lane.b32.xlu0 %v5047_v29, %s5808_s27 }
 0x1c6   : > { %5043 = vrot.lane.b32.xlu2 %v5042_v48, %s5802_s9 }
 0x1c7   : > { %v6504_v32 = vpop.permute.xlu0 %4868  ;;  %v6506_v35 = vpop.permute.xlu1 %2192 }
 0x1c8   : > { %9778 = vst [vmem:[#allocation27_spill] sm:$0xff] %v6506_v35  ;;  %v4914_v19 = vpop.permute.xlu2 %4913  ;;  %v4871_v9 = vunpack.i.h.bf16 %v6504_v32  ;;  %v4870_v21 = vunpack.i.l.bf16 %v6504_v32  ;;  %v2218_v48 = vrot.slane %v6506_v35, 4 }
 0x1c9   : > { %v4916_v18 = vunpack.i.h.bf16 %v4914_v19  ;;  %v4915_v55 = vunpack.i.l.bf16 %v4914_v19 }
 0x1ca   : > { %v1458_v29 = vrot.slane %v4871_v9, 4  ;;  %v1402_v32 = vrot.slane %v4870_v21, 4 }
 0x1cb   : > { %v1052_v59 = vrot.slane %v4916_v18, 4  ;;  %v1055_v62 = vsel %vm369_vm0, %v4916_v18, %v1054_v16  ;;  %v996_v54 = vrot.slane %v4915_v55, 4  ;;  %v999_v5 = vsel %vm369_vm0, %v4915_v55, %v998_v33 }
 0x1cc   : > { %v6587_v33 = vperm.slane %v999_v5, %v5980_v8 }
 0x1cd   : > { %v1053_v47 = vsel %vm369_vm0, %v1052_v59, %v4866_v3  ;;  %v997_v55 = vsel %vm369_vm0, %v996_v54, %v4865_v34 }
 0x1ce   : > { %5053 = vrot.lane.b32.xlu2 %v5052_v50, %s5808_s27  ;;  %v6579_v50 = vperm.slane %v1055_v62, %v5980_v8  ;;  %v6592_v59 = vperm.slane %v1053_v47, %v5980_v8 }
 0x1cf   : > { %v6512_v57 = vpop.permute.xlu0 %4898  ;;  %v6514_v11 = vpop.permute.xlu1 %4888 }
 0x1d0   : > { %v4919_v63 = vpop.permute.xlu2 %4918  ;;  %v9688_v18 = vunpack.i.l.bf16 %v6512_v57  ;;  %9780 = vst [vmem:[#allocation29_spill] sm:$0xff] %v6592_v59  ;;  %v9683_v62 = vunpack.i.h.bf16 %v6514_v11  ;;  %v9685_v2 = vunpack.i.l.bf16 %v6514_v11 }
 0x1d1   : > { %v4921_v43 = vunpack.i.h.bf16 %v4919_v63  ;;  %v4920_v42 = vunpack.i.l.bf16 %v4919_v63  ;;  %v9689_v63 = vunpack.i.h.bf16 %v6512_v57 }
 0x1d2   : > { %v1620_v47 = vrot.slane %v9688_v18, 4  ;;  %v6624_v5 = vrot.slane %v9683_v62, 4 }
 0x1d3   : > { %v1456_v16 = vrot.slane %v4921_v43, 4  ;;  %v1459_v3 = vsel %vm369_vm0, %v4921_v43, %v1458_v29  ;;  %v1400_v49 = vrot.slane %v4920_v42, 4 }
 0x1d5   : > { %v1457_v60 = vsel %vm369_vm0, %v1456_v16, %v4871_v9 }
 0x1d7   : > { %v6516_v0 = vpop.permute.xlu0 %4903  ;;  %v6518_v25 = vpop.permute.xlu1 %4893 }
 0x1d8   : > { %v6525_v1 = vpop.permute.xlu2 %2200 }
 0x1df   : > { %v6520_v30 = vpop.permute.xlu0 %2196  ;;  %v6522_v31 = vpop.permute.xlu1 %2198 }
 0x1e0   : > { %9779 = vst [vmem:[#allocation28_spill] sm:$0xff] %v6520_v30  ;;  %v6575_v44 = vpop.permute.xlu2 %4948 }
 0x1e1   : > { %v4950_v53 = vunpack.i.l.bf16 %v6575_v44  ;;  %v4951_v41 = vunpack.i.h.bf16 %v6575_v44  ;;  %v1401_v44 = vsel %vm369_vm0, %v1400_v49, %v4870_v21 }
 0x1e2   : > { %v6654_v21 = vperm.slane %v1401_v44, %v5980_v8 }
 0x1e3   : > { %v1621_v9 = vsel %vm369_vm0, %v4950_v53, %v1620_v47  ;;  %v9692_v47 = vunpack.i.l.bf16 %v6516_v0  ;;  %v1674_v18 = vrot.slane %v4951_v41, 4  ;;  %v1618_v26 = vrot.slane %v4950_v53, 4 }
 0x1e4   : > { %9783 = vst [vmem:[#allocation32_spill] sm:$0xff] %v6654_v21 }
 0x1e7   : > { %v6550_v22 = vpop.permute.xlu0 %4908  ;;  %v6552_v24 = vpop.permute.xlu1 %4923 }
 0x1e8   : > { %v9684_v28 = vunpack.i.l.bf16 %v6552_v24  ;;  %v9686_v19 = vunpack.i.h.bf16 %v6552_v24  ;;  %v4910_v44 = vunpack.i.l.bf16 %v6550_v22 }
 0x1ea   : > { %v1609_v13 = vsel %vm369_vm0, %v9684_v28, %v1608_v36  ;;  %v1403_v36 = vsel %vm369_vm0, %v4920_v42, %v1402_v32  ;;  %v1665_v54 = vsel %vm369_vm0, %v9686_v19, %v1664_v38  ;;  %v6613_v32 = vperm.slane %v1459_v3, %v5980_v8 }
 0x1eb   : > { %v6599_v34 = vperm.slane %v1609_v13, %v5980_v8  ;;  %v6616_v13 = vperm.slane %v997_v55, %v5980_v8  ;;  %v1676_v38 = vrot.slane %v9689_v63, 4  ;;  %v6627_v39 = vperm.slane %v1403_v36, %v5980_v8  ;;  %v6661_v63 = vpop.permute.xlu2 %4953 }
 0x1ec   : > { %v6631_v16 = vperm.slane %v1665_v54, %v5980_v8  ;;  %v6635_v55 = vrot.slane %v9685_v2, 4  ;;  %v6638_v3 = vperm.slane %v1457_v60, %v5980_v8  ;;  %v9690_v36 = vunpack.i.h.bf16 %v6516_v0 }
 0x1ed   : > { %9781 = vst [vmem:[#allocation30_spill] sm:$0xff] %v6616_v13  ;;  %v1644_v42 = vrot.slane %v6599_v34, 4  ;;  %v2219_v28 = vsel %vm369_vm0, %v6525_v1, %v2218_v48  ;;  %v1677_v2 = vsel %vm369_vm0, %v4951_v41, %v1676_v38  ;;  %v6650_v60 = vperm.slane %v1621_v9, %v5980_v8 }
 0x1ee   : > { %9782 = vst [vmem:[#allocation31_spill] sm:$0xff] %v6638_v3  ;;  %v1700_v19 = vrot.slane %v6631_v16, 4  ;;  %v2080_v62 = vrot.slane %v9690_v36, 4  ;;  %v6671_v49 = vperm.slane %v2219_v28, %v5980_v8  ;;  %v6674_v7 = vperm.slane %v1677_v2, %v5980_v8 }
 0x1ef   : > { %v6604_v43 = vpop.permute.xlu0 %2202  ;;  %v6606_v29 = vpop.permute.xlu1 %4928  ;;  %v1645_v38 = vsel %vm369_vm0, %v6650_v60, %v1644_v42  ;;  %v2024_v42 = vrot.slane %v9692_v47, 4  ;;  %v4911_v2 = vunpack.i.h.bf16 %v6550_v22  ;;  %v9786_v41 = vunpack.i.h.bf16 %v6518_v25 }
 0x1f0   : > { %v9693_v54 = vunpack.i.l.bf16 %v6606_v29  ;;  %v9784_v36 = vunpack.i.h.bf16 %v6606_v29  ;;  %v6692_v23 = vperm.slane %v1645_v38, %v5986_v17  ;;  %v9789_v22 = vunpack.i.l.bf16 %v6518_v25 }
 0x1f1   : > { %v1470_v47 = vrot.slane %v9786_v41, 4  ;;  %v9791_v41 = vunpack.i.h.bf16 %v6512_v57  ;;  %v790_v6 = vrot.slane %v4910_v44, 4  ;;  %v849_v53 = vsel %vm369_vm0, %v4911_v2, %v6556_v61 }
 0x1f2   : > { %v2013_v48 = vsel %vm369_vm0, %v9693_v54, %v6547_v20  ;;  %v2069_v28 = vsel %vm369_vm0, %v9784_v36, %v6541_v40  ;;  %9785 = vst [vmem:[#allocation33_spill] sm:$0xff] %v6692_v23  ;;  %v1701_v20 = vsel %vm369_vm0, %v6674_v7, %v1700_v19  ;;  %v1414_v36 = vrot.slane %v9789_v22, 4 }
 0x1f3   : > { %v6700_v45 = vperm.slane %v2013_v48, %v5980_v8  ;;  %v6703_v40 = vperm.slane %v1701_v20, %v5986_v17  ;;  %v6709_v37 = vperm.slane %v2069_v28, %v5980_v8  ;;  %v2230_v19 = vrot.slane %v6520_v30, 4 }
 0x1f4   : > { %v6715_v54 = vsel %vm369_vm0, %v1674_v18, %v9791_v41  ;;  %v793_v48 = vsel %vm369_vm0, %v4910_v44, %v6560_v51  ;;  %v846_v22 = vrot.slane %v4911_v2, 4  ;;  %v9792_v28 = vunpack.i.l.bf16 %v6661_v63 }
 0x1f5   : > { %9787 = vst [vmem:[#allocation34_spill] sm:$0xff] %v6700_v45  ;;  %v5077_v20 = vpack.i.bf16 %v6703_v40, %v6692_v23  ;;  %v9793_v12 = vunpack.i.h.bf16 %v6661_v63  ;;  %v2048_v41 = vrot.slane %v6700_v45, 4  ;;  %v9794_v44 = vunpack.i.l.bf16 %v6512_v57 }
 0x1f6   : > { %9788 = vst [vmem:[#allocation35_spill] sm:$0xff] %v6703_v40  ;;  %v2025_v38 = vsel %vm369_vm0, %v9792_v28, %v2024_v42  ;;  %v6739_v2 = vperm.slane %v793_v48, %v5980_v8  ;;  %v2104_v42 = vrot.slane %v6709_v37, 4 }
 0x1f7   : > { %v6665_v9 = vpop.permute.xlu0 %4938  ;;  %v6687_v27 = vpop.permute.xlu1 %4933  ;;  %9790 = vst [vmem:[#allocation36_spill] sm:$0xff] %v6709_v37  ;;  %v2081_v18 = vsel %vm369_vm0, %v9793_v12, %v2080_v62  ;;  %5078 = vrot.lane.b32.xlu2 %v5077_v20, %s5805_s18  ;;  %v6736_v61 = vsel %vm369_vm0, %v1618_v26, %v9794_v44  ;;  %v6744_v62 = vperm.slane %v849_v53, %v5980_v8  ;;  %v9795_v26 = vunpack.i.l.bf16 %v6481_v58 }
 0x1f8   : > { %v4941_v51 = vunpack.i.h.bf16 %v6665_v9  ;;  %v4940_v10 = vunpack.i.l.bf16 %v6665_v9  ;;  %v6747_v20 = vperm.slane %v2025_v38, %v5980_v8  ;;  %v4936_v9 = vunpack.i.h.bf16 %v6687_v27 }
 0x1f9   : > { %v4935_v57 = vunpack.i.l.bf16 %v6687_v27  ;;  %v791_v48 = vsel %vm369_vm0, %v790_v6, %v9795_v26  ;;  %v9796_v44 = vunpack.i.h.bf16 %v6552_v24  ;;  %v9797_v12 = vunpack.i.l.bf16 %v6552_v24 }
 0x1fa   : > { %v6761_v23 = vperm.slane %v2081_v18, %v5980_v8  ;;  %v9798_v38 = vunpack.i.h.bf16 %v6481_v58  ;;  %v1067_v27 = vsel %vm369_vm0, %v4941_v51, %v6624_v5  ;;  %v1011_v35 = vsel %vm369_vm0, %v4940_v10, %v6635_v55 }
 0x1fb   : > { %v1662_v40 = vrot.slane %v9796_v44, 4  ;;  %v1606_v53 = vrot.slane %v9797_v12, 4  ;;  %v2049_v6 = vsel %vm369_vm0, %v6747_v20, %v2048_v41  ;;  %v6782_v5 = vperm.slane %v791_v48, %v5980_v8 }
 0x1fc   : > { %v847_v30 = vsel %vm369_vm0, %v846_v22, %v9798_v38  ;;  %v6775_v24 = vperm.slane %v2049_v6, %v5986_v17  ;;  %v2105_v18 = vsel %vm369_vm0, %v6761_v23, %v2104_v42  ;;  %v805_v55 = vsel %vm369_vm0, %v4935_v57, %v6570_v52 }
 0x1fd   : > { %v861_v41 = vsel %vm369_vm0, %v4936_v9, %v6564_v56  ;;  %v6789_v12 = vperm.slane %v2105_v18, %v5986_v17  ;;  %v1064_v44 = vrot.slane %v4941_v51, 4  ;;  %v1075_v38 = vperm.slane %v1067_v27, %v5980_v8 }
 0x1fe   : > { %9800 = vst [vmem:[#allocation38_spill] sm:$0xff] %v6775_v24  ;;  %v1019_v42 = vperm.slane %v1011_v35, %v5980_v8  ;;  %v828_v48 = vrot.slane %v6739_v2, 4  ;;  %v6797_v22 = vperm.slane %v847_v30, %v5980_v8  ;;  %v884_v52 = vrot.slane %v6744_v62, 4 }
 0x1ff   : > { %v6751_v28 = vpop.permute.xlu0 %4943  ;;  %v6772_v26 = vpop.permute.xlu1 %2204  ;;  %9801 = vst [vmem:[#allocation39_spill] sm:$0xff] %v6789_v12  ;;  %v5082_v56 = vpack.i.bf16 %v6789_v12, %v6775_v24  ;;  %v813_v18 = vperm.slane %v805_v55, %v5980_v8  ;;  %v869_v51 = vperm.slane %v861_v41, %v5980_v8  ;;  %v9803_v30 = vunpack.i.l.bf16 %v6407_v46 }
 0x200   : > { %9799 = vst [vmem:[#allocation37_spill] sm:$0xff] %v6772_v26  ;;  %v9707_v58 = vunpack.i.h.bf16 %v6751_v28  ;;  %v2231_v6 = vsel %vm369_vm0, %v6772_v26, %v2230_v19  ;;  %v9802_v19 = vunpack.i.l.bf16 %v6751_v28  ;;  %v9804_v37 = vunpack.i.h.bf16 %v6407_v46 }
 0x201   : > { %v1607_v26 = vsel %vm369_vm0, %v1606_v53, %v9803_v30  ;;  %v1008_v24 = vrot.slane %v4940_v10, 4  ;;  %5083 = vrot.lane.b32.xlu2 %v5082_v56, %s5805_s18  ;;  %v6818_v55 = vperm.slane %v2231_v6, %v5980_v8  ;;  %v9806_v46 = vrot.slane %v6587_v33, 4 }
 0x202   : > { %v1471_v35 = vsel %vm369_vm0, %v9707_v58, %v1470_v47  ;;  %v1415_v27 = vsel %vm369_vm0, %v9802_v19, %v1414_v36  ;;  %v1663_v12 = vsel %vm369_vm0, %v1662_v40, %v9804_v37  ;;  %v9805_v47 = vunpack.i.h.bf16 %v6514_v11 }
 0x203   : > { %v1088_v58 = vrot.slane %v1075_v38, 4  ;;  %v1032_v36 = vrot.slane %v1019_v42, 4  ;;  %v802_v19 = vrot.slane %v4935_v57, 4  ;;  %v1479_v45 = vperm.slane %v1471_v35, %v5980_v8 }
 0x204   : > { %v1065_v41 = vsel %vm369_vm0, %v1064_v44, %v9805_v47  ;;  %v1423_v53 = vperm.slane %v1415_v27, %v5980_v8  ;;  %v1035_v37 = vsel %vm369_vm0, %v1019_v42, %v9806_v46  ;;  %v9807_v10 = vrot.slane %v6579_v50, 4 }
 0x205   : > { %v6832_v6 = vperm.slane %v1035_v37, %v5986_v17  ;;  %v829_v57 = vsel %vm369_vm0, %v813_v18, %v828_v48  ;;  %v885_v56 = vsel %vm369_vm0, %v869_v51, %v884_v52  ;;  %v858_v35 = vrot.slane %v4936_v9, 4 }
 0x206   : > { %v1091_v40 = vsel %vm369_vm0, %v1075_v38, %v9807_v10  ;;  %v6840_v27 = vperm.slane %v829_v57, %v5986_v17  ;;  %v6843_v42 = vperm.slane %v885_v56, %v5986_v17  ;;  %v9808_v30 = vrot.slane %v6671_v49, 4 }
 0x207   : > { %v6835_v44 = vperm.slane %v1091_v40, %v5986_v17  ;;  %v826_v47 = vrot.slane %v813_v18, 4  ;;  %v882_v46 = vrot.slane %v869_v51, 4  ;;  %v6855_v9 = vperm.slane %v1065_v41, %v5980_v8 }
 0x208   : > { %v2255_v38 = vsel %vm369_vm0, %v6818_v55, %v9808_v30  ;;  %v9809_v52 = vunpack.i.l.bf16 %v6514_v11  ;;  %v9810_v40 = vunpack.i.l.bf16 %v6493_v4  ;;  %v5062_v18 = vpack.i.bf16 %v6843_v42, %v6840_v27 }
 0x209   : > { %v5067_v37 = vpack.i.bf16 %v6835_v44, %v6832_v6  ;;  %v6852_v48 = vperm.slane %v2255_v38, %v5986_v17  ;;  %v9811_v51 = vrot.slane %v6627_v39, 4  ;;  %v9812_v41 = vrot.slane %v6613_v32, 4 }
 0x20a   : > { %v1009_v10 = vsel %vm369_vm0, %v1008_v24, %v9809_v52  ;;  %v803_v57 = vsel %vm369_vm0, %v802_v19, %v9810_v40  ;;  %v1033_v11 = vsel %vm369_vm0, %v1032_v36, %v6587_v33  ;;  %v1089_v24 = vsel %vm369_vm0, %v1088_v58, %v6579_v50  ;;  %v6876_v19 = vpop.permute.xlu2 %2206  ;;  %5063 = vrot.lane.b32.xlu1 %v5062_v18, %s5805_s18 }
 0x20b   : > { %5068 = vrot.lane.b32.xlu0 %v5067_v37, %s5805_s18  ;;  %v1439_v56 = vsel %vm369_vm0, %v1423_v53, %v9811_v51  ;;  %v1495_v30 = vsel %vm369_vm0, %v1479_v45, %v9812_v41  ;;  %v9813_v38 = vunpack.i.h.bf16 %v6493_v4  ;;  %2349 = vrot.lane.b32.xlu2 %v6852_v48, %s5805_s18  ;;  %v6892_v50 = vperm.slane %v803_v57, %v5980_v8 }
 0x20c   : > { %v6885_v52 = vperm.slane %v1439_v56, %v5986_v17  ;;  %v6888_v40 = vperm.slane %v1495_v30, %v5986_v17  ;;  %v1436_v58 = vrot.slane %v1423_v53, 4  ;;  %v827_v4 = vsel %vm369_vm0, %v826_v47, %v6739_v2 }
 0x20d   : > { %v859_v37 = vsel %vm369_vm0, %v858_v35, %v9813_v38  ;;  %v883_v36 = vsel %vm369_vm0, %v882_v46, %v6744_v62  ;;  %v6899_v35 = vperm.slane %v1033_v11, %v5986_v17  ;;  %v6902_v18 = vperm.slane %v1089_v24, %v5986_v17 }
 0x20e   : > { %v6905_v51 = vperm.slane %v827_v4, %v5986_v17  ;;  %v6908_v56 = vperm.slane %v883_v36, %v5986_v17  ;;  %v6911_v53 = vperm.slane %v1009_v10, %v5980_v8  ;;  %v6914_v2 = vperm.slane %v859_v37, %v5980_v8 }
 0x20f   : > { %v1492_v47 = vrot.slane %v1479_v45, 4  ;;  %v5072_v62 = vpack.i.bf16 %v6888_v40, %v6885_v52  ;;  %v6919_v46 = vperm.slane %v1607_v26, %v5980_v8  ;;  %v9814_v57 = vunpack.i.h.bf16 %v6751_v28 }
 0x210   : > { %v9815_v30 = vunpack.i.l.bf16 %v6751_v28  ;;  %v816_v24 = vrot.slane %v6782_v5, 4  ;;  %v6927_v10 = vperm.slane %v1663_v12, %v5980_v8  ;;  %v9816_v38 = vunpack.i.h.bf16 %v6606_v29 }
 0x211   : > { %v1468_v41 = vrot.slane %v9814_v57, 4  ;;  %v9817_v37 = vunpack.i.l.bf16 %v6606_v29  ;;  %v872_v26 = vrot.slane %v6797_v22, 4  ;;  %v5102_v36 = vpack.i.bf16 %v6902_v18, %v6899_v35 }
 0x212   : > { %v1412_v11 = vrot.slane %v9815_v30, 4  ;;  %v2066_v45 = vrot.slane %v9816_v38, 4  ;;  %v5092_v28 = vpack.i.bf16 %v6908_v56, %v6905_v51  ;;  %v1437_v57 = vsel %vm369_vm0, %v1436_v58, %v6627_v39 }
 0x213   : > { %v2010_v4 = vrot.slane %v9817_v37, 4  ;;  %v817_v12 = vsel %vm369_vm0, %v6892_v50, %v816_v24  ;;  %5073 = vrot.lane.b32.xlu0 %v5072_v62, %s5805_s18  ;;  %v1493_v29 = vsel %vm369_vm0, %v1492_v47, %v6613_v32  ;;  %v873_v30 = vsel %vm369_vm0, %v6914_v2, %v872_v26  ;;  %5103 = vrot.lane.b32.xlu1 %v5102_v36, %s5806_s19 }
 0x214   : > { %v9818_v38 = vrot.slane %v6616_v13, 4  ;;  %v9819_v33 = vrot.slane %v6592_v59, 4  ;;  %v6957_v58 = vperm.slane %v6715_v54, %v5980_v8  ;;  %v1698_v62 = vrot.slane %v6674_v7, 4  ;;  %5093 = vrot.lane.b32.xlu2 %v5092_v28, %s5806_s19 }
 0x215   : > { %v9820_v32 = vunpack.i.h.bf16 %v6518_v25  ;;  %v9821_v24 = vunpack.i.l.bf16 %v6518_v25  ;;  %v9823_v54 = vunpack.i.h.bf16 %v6422_v15  ;;  %v6975_v59 = vperm.slane %v817_v12, %v5986_v17  ;;  %v6980_v25 = vpop.permute.xlu2 %4958 }
 0x216   : > { %v1023_v37 = vsel %vm369_vm0, %v6911_v53, %v9818_v38  ;;  %v1079_v39 = vsel %vm369_vm0, %v6855_v9, %v9819_v33  ;;  %v9822_v33 = vunpack.i.l.bf16 %v6422_v15  ;;  %9824 = vst [vmem:[#allocation40_spill] sm:$0xff] %v6980_v25  ;;  %v6986_v36 = vperm.slane %v1493_v29, %v5986_v17 }
 0x217   : > { %v1469_v47 = vsel %vm369_vm0, %v1468_v41, %v9820_v32  ;;  %v1413_v26 = vsel %vm369_vm0, %v1412_v11, %v9821_v24  ;;  %v2067_v7 = vsel %vm369_vm0, %v2066_v45, %v9823_v54  ;;  %v6978_v41 = vperm.slane %v873_v30, %v5986_v17 }
 0x218   : > { %v2011_v38 = vsel %vm369_vm0, %v2010_v4, %v9822_v33  ;;  %v6983_v11 = vperm.slane %v1437_v57, %v5986_v17  ;;  %v6989_v4 = vperm.slane %v1023_v37, %v5986_v17  ;;  %v6992_v15 = vperm.slane %v1079_v39, %v5986_v17 }
 0x219   : > { %v6995_v45 = vperm.slane %v1469_v47, %v5980_v8  ;;  %v6998_v28 = vperm.slane %v1413_v26, %v5980_v8  ;;  %v1632_v12 = vrot.slane %v6919_v46, 4  ;;  %v1688_v57 = vrot.slane %v6927_v10, 4 }
 0x21a   : > { %v7004_v29 = vperm.slane %v6736_v61, %v5980_v8  ;;  %v1642_v30 = vrot.slane %v6650_v60, 4  ;;  %v9827_v37 = vunpack.i.h.bf16 %v6661_v63  ;;  %v2272_v32 = vrot.slane %v6604_v43, 4 }
 0x21b   : > { %9825 = vst [vmem:[#allocation41_spill] sm:$0xff] %v6995_v45  ;;  %v9828_v47 = vunpack.i.l.bf16 %v6661_v63  ;;  %v7013_v26 = vperm.slane %v2011_v38, %v5980_v8  ;;  %v7016_v33 = vperm.slane %v2067_v7, %v5980_v8  ;;  %v5087_v61 = vpack.i.bf16 %v6978_v41, %v6975_v59 }
 0x21c   : > { %9826 = vst [vmem:[#allocation42_spill] sm:$0xff] %v6998_v28  ;;  %v2078_v39 = vrot.slane %v9827_v37, 4  ;;  %v5112_v60 = vpack.i.bf16 %v6986_v36, %v6983_v11  ;;  %v5097_v54 = vpack.i.bf16 %v6992_v15, %v6989_v4  ;;  %v1643_v37 = vsel %vm369_vm0, %v1642_v30, %v6599_v34 }
 0x21d   : > { %v2022_v24 = vrot.slane %v9828_v47, 4  ;;  %v1699_v63 = vsel %vm369_vm0, %v1698_v62, %v6631_v16  ;;  %5088 = vrot.lane.b32.xlu0 %v5087_v61, %s5807_s20  ;;  %v1633_v38 = vsel %vm369_vm0, %v7004_v29, %v1632_v12  ;;  %v1689_v7 = vsel %vm369_vm0, %v6957_v58, %v1688_v57 }
 0x21e   : > { %v9829_v47 = vrot.slane %v6654_v21, 4  ;;  %v9830_v13 = vrot.slane %v6638_v3, 4  ;;  %v9831_v16 = vunpack.i.h.bf16 %v6516_v0  ;;  %v2273_v12 = vsel %vm369_vm0, %v2272_v32, %v6448_v14  ;;  %5113 = vrot.lane.b32.xlu1 %v5112_v60, %s5806_s19  ;;  %5098 = vrot.lane.b32.xlu2 %v5097_v54, %s5807_s20 }
 0x21f   : > { %v9832_v57 = vunpack.i.l.bf16 %v6516_v0  ;;  %v2284_v61 = vrot.slane %v6876_v19, 4  ;;  %v7062_v32 = vperm.slane %v1689_v7, %v5986_v17  ;;  %v2036_v54 = vrot.slane %v7013_v26, 4 }
 0x220   : > { %v1427_v25 = vsel %vm369_vm0, %v6998_v28, %v9829_v47  ;;  %v1483_v34 = vsel %vm369_vm0, %v6995_v45, %v9830_v13  ;;  %v2079_v62 = vsel %vm369_vm0, %v2078_v39, %v9831_v16  ;;  %v7053_v47 = vperm.slane %v1643_v37, %v5986_v17  ;;  %v7078_v16 = vpop.permute.xlu2 %4988  ;;  %v9836_v28 = vld [vmem:[#allocation37_spill] sm:$0xff] }
 0x221   : > { %v2023_v30 = vsel %vm369_vm0, %v2022_v24, %v9832_v57  ;;  %v7056_v13 = vperm.slane %v1699_v63, %v5986_v17  ;;  %v7059_v39 = vperm.slane %v1633_v38, %v5986_v17  ;;  %v7065_v60 = vperm.slane %v1427_v25, %v5986_v17  ;;  %9833 = vst [vmem:[#allocation43_spill] sm:$0xff] %v7078_v16 }
 0x222   : > { %v7068_v0 = vperm.slane %v1483_v34, %v5986_v17  ;;  %v7071_v24 = vperm.slane %v2273_v12, %v5980_v8  ;;  %v2092_v37 = vrot.slane %v7016_v33, 4  ;;  %v2216_v63 = vrot.slane %v6525_v1, 4 }
 0x223   : > { %v2102_v38 = vrot.slane %v6761_v23, 4  ;;  %v2046_v7 = vrot.slane %v6747_v20, 4  ;;  %v7081_v25 = vperm.slane %v2079_v62, %v5980_v8  ;;  %v7084_v34 = vperm.slane %v2023_v30, %v5980_v8  ;;  %v9834_v20 = vld [vmem:[#allocation34_spill] sm:$0xff]  ;;  %v9835_v62 = vld [vmem:[#allocation36_spill] sm:$0xff] }
 0x224   : > { %v2285_v12 = vsel %vm369_vm0, %v2284_v61, %v6522_v31  ;;  %v5122_v57 = vpack.i.bf16 %v7056_v13, %v7053_v47  ;;  %v5117_v1 = vpack.i.bf16 %v7062_v32, %v7059_v39  ;;  %v5107_v23 = vpack.i.bf16 %v7068_v0, %v7065_v60 }
 0x225   : > { %v2047_v16 = vsel %vm369_vm0, %v2046_v7, %v9834_v20  ;;  %v2103_v3 = vsel %vm369_vm0, %v2102_v38, %v9835_v62  ;;  %v2037_v30 = vsel %vm369_vm0, %v7084_v34, %v2036_v54  ;;  %v2093_v61 = vsel %vm369_vm0, %v7081_v25, %v2092_v37  ;;  %v9837_v54 = vld [vmem:[#allocation27_spill] sm:$0xff] }
 0x226   : > { %5123 = vrot.lane.b32.xlu0 %v5122_v57, %s5806_s19  ;;  %v2298_v21 = vrot.slane %v7071_v24, 4  ;;  %v2228_v45 = vrot.slane %v9836_v28, 4  ;;  %5118 = vrot.lane.b32.xlu1 %v5117_v1, %s5807_s20  ;;  %v7108_v7 = vperm.slane %v2285_v12, %v5980_v8  ;;  %v7111_v38 = vperm.slane %v2047_v16, %v5986_v17  ;;  %v9838_v12 = vld [vmem:[#allocation28_spill] sm:$0xff] }
 0x227   : > { %5108 = vrot.lane.b32.xlu2 %v5107_v23, %s5807_s20  ;;  %v7114_v57 = vperm.slane %v2103_v3, %v5986_v17  ;;  %v2217_v37 = vsel %vm369_vm0, %v2216_v63, %v9837_v54  ;;  %v7119_v20 = vperm.slane %v2037_v30, %v5986_v17  ;;  %v7122_v28 = vperm.slane %v2093_v61, %v5986_v17 }
 0x228   : > { %v2299_v1 = vsel %vm369_vm0, %v7108_v7, %v2298_v21  ;;  %v2229_v23 = vsel %vm369_vm0, %v2228_v45, %v9838_v12  ;;  %v7129_v16 = vperm.slane %v2217_v37, %v5980_v8  ;;  %v2286_v63 = vrot.slane %v6522_v31, 4  ;;  %v7135_v30 = vpop.permute.xlu2 %4993 }
 0x229   : > { %v5132_v3 = vpack.i.bf16 %v7114_v57, %v7111_v38  ;;  %v2252_v62 = vrot.slane %v6818_v55, 4  ;;  %9839 = vst [vmem:[#allocation34_spill] sm:$0xff] %v7135_v30  ;;  %v5127_v61 = vpack.i.bf16 %v7122_v28, %v7119_v20  ;;  %v7140_v21 = vperm.slane %v2299_v1, %v5986_v17 }
 0x22a   : > { %v7143_v45 = vperm.slane %v2229_v23, %v5980_v8  ;;  %v844_v54 = vrot.slane %v6840_v27, 4  ;;  %v900_v37 = vrot.slane %v6843_v42, 4  ;;  %v2287_v31 = vsel %vm369_vm0, %v6876_v19, %v2286_v63 }
 0x22b   : > { %v2242_v55 = vrot.slane %v7129_v16, 4  ;;  %v2274_v1 = vrot.slane %v6448_v14, 4  ;;  %v2253_v12 = vsel %vm369_vm0, %v2252_v62, %v6671_v49  ;;  %v7158_v23 = vperm.slane %v2287_v31, %v5980_v8  ;;  %v9841_v62 = vld [vmem:[#allocation33_spill] sm:$0xff]  ;;  %v9842_v31 = vld [vmem:[#allocation35_spill] sm:$0xff] }
 0x22c   : > { %v845_v42 = vsel %vm369_vm0, 0.0, %v844_v54  ;;  %v901_v19 = vsel %vm369_vm0, 0.0, %v900_v37  ;;  %v7167_v63 = vperm.slane %v2253_v12, %v5986_v17  ;;  %v1716_v30 = vrot.slane %v9842_v31, 4  ;;  %v7195_v31 = vpop.permute.xlu0 %4968 }
 0x22d   : > { %9840 = vst [vmem:[#allocation36_spill] sm:$0xff] %v7158_v23  ;;  %v2243_v27 = vsel %vm369_vm0, %v7143_v45, %v2242_v55  ;;  %v5137_v49 = vpack.i.bf16 %v901_v19, %v845_v42  ;;  %v2308_v55 = vrot.slane %v7158_v23, 4  ;;  %v1048_v54 = vrot.slane %v6899_v35, 4 }
 0x22e   : > { %5133 = vrot.lane.b32.xlu0 %v5132_v3, %s5806_s19  ;;  %5128 = vrot.lane.b32.xlu1 %v5127_v61, %s5807_s20  ;;  %v2275_v3 = vsel %vm369_vm0, %v6604_v43, %v2274_v1  ;;  %v7170_v14 = vperm.slane %v2243_v27, %v5986_v17  ;;  %v1660_v61 = vrot.slane %v9841_v62, 4  ;;  %v1104_v43 = vrot.slane %v6902_v18, 4 }
 0x22f   : > { %2361 = vrot.lane.b32.xlu2 %v7140_v21, %s5807_s20  ;;  %v7185_v1 = vperm.slane %v2275_v3, %v5980_v8  ;;  %v1717_v27 = vsel %vm369_vm0, 0.0, %v1716_v30  ;;  %v1049_v35 = vsel %vm369_vm0, 0.0, %v1048_v54  ;;  %v814_v19 = vrot.slane %v6892_v50, 4  ;;  %v7197_v3 = vpop.permute.xlu1 %4963  ;;  %v9844_v8 = vld [vmem:[#allocation38_spill] sm:$0xff] }
 0x230   : > { %v7179_v37 = vpop.permute.xlu2 %5008  ;;  %v1661_v12 = vsel %vm369_vm0, 0.0, %v1660_v61  ;;  %v1105_v18 = vsel %vm369_vm0, 0.0, %v1104_v43  ;;  %v870_v62 = vrot.slane %v6914_v2, 4  ;;  %v1050_v54 = vrot.slane %v6832_v6, 4 }
 0x231   : > { %9843 = vst [vmem:[#allocation37_spill] sm:$0xff] %v7179_v37  ;;  %v2309_v42 = vsel %vm369_vm0, %v2308_v55, %v7185_v1  ;;  %v5177_v30 = vpack.i.bf16 %v1105_v18, %v1049_v35  ;;  %v2064_v37 = vrot.slane %v9844_v8, 4  ;;  %v9845_v55 = vld [vmem:[#allocation39_spill] sm:$0xff]  ;;  %v1106_v50 = vrot.slane %v6835_v44, 4 }
 0x232   : > { %v7200_v61 = vperm.slane %v2309_v42, %v5986_v17  ;;  %v2120_v23 = vrot.slane %v9845_v55, 4  ;;  %v1452_v2 = vrot.slane %v6983_v11, 4  ;;  %v1508_v43 = vrot.slane %v6986_v36, 4 }
 0x233   : > { %v7214_v8 = vsel %vm369_vm0, %v814_v19, %v6782_v5  ;;  %v1630_v6 = vrot.slane %v7004_v29, 4  ;;  %v2065_v11 = vsel %vm369_vm0, 0.0, %v2064_v37  ;;  %v1107_v42 = vsel %vm369_vm0, 0.0, %v1106_v50 }
 0x234   : > { %v2121_v36 = vsel %vm369_vm0, 0.0, %v2120_v23  ;;  %v1453_v35 = vsel %vm369_vm0, 0.0, %v1452_v2  ;;  %v1509_v5 = vsel %vm369_vm0, 0.0, %v1508_v43  ;;  %v1686_v18 = vrot.slane %v6957_v58, 4  ;;  %v7242_v58 = vpop.permute.xlu0 %4978 }
 0x235   : > { %v5157_v19 = vpack.i.bf16 %v2121_v36, %v2065_v11  ;;  %v1454_v29 = vrot.slane %v6885_v52, 4  ;;  %v7234_v37 = vsel %vm369_vm0, %v1630_v6, %v6919_v46  ;;  %v2296_v55 = vrot.slane %v7108_v7, 4 }
 0x236   : > { %2341 = vrot.lane.b32.xlu0 %v7167_v63, %s5806_s19  ;;  %2333 = vrot.lane.b32.xlu1 %v7170_v14, %s5807_s20  ;;  %v1656_v52 = vrot.slane %v7059_v39, 4  ;;  %v2240_v7 = vrot.slane %v7143_v45, 4  ;;  %v842_v36 = vrot.slane %v6905_v51, 4 }
 0x237   : > { %5138 = vrot.lane.b32.xlu2 %v5137_v49, %s5803_s16  ;;  %v5152_v49 = vpack.i.bf16 %v1717_v27, %v1661_v12  ;;  %v7218_v12 = vsel %vm369_vm0, %v870_v62, %v6797_v22  ;;  %v1051_v27 = vsel %vm369_vm0, 0.0, %v1050_v54  ;;  %v2034_v22 = vrot.slane %v7084_v34, 4  ;;  %v7247_v46 = vpop.permute.xlu1 %4973 }
 0x238   : > { %v7221_v44 = vpop.permute.xlu2 %5018  ;;  %v5142_v23 = vpack.i.bf16 %v1107_v42, %v1051_v27  ;;  %v5187_v62 = vpack.i.bf16 %v1509_v5, %v1453_v35  ;;  %v1712_v34 = vrot.slane %v7062_v32, 4  ;;  %v2270_v54 = vrot.slane %v6852_v48, 4 }
 0x239   : > { %v1455_v39 = vsel %vm369_vm0, 0.0, %v1454_v29  ;;  %v1657_v50 = vsel %vm369_vm0, 0.0, %v1656_v52  ;;  %v7275_v45 = vsel %vm369_vm0, %v2240_v7, %v7129_v16  ;;  %v898_v27 = vrot.slane %v6908_v56, 4 }
 0x23a   : > { %v1713_v2 = vsel %vm369_vm0, 0.0, %v1712_v34  ;;  %v2271_v48 = vsel %vm369_vm0, 0.0, %v2270_v54  ;;  %v2060_v42 = vrot.slane %v7119_v20, 4  ;;  %v2116_v35 = vrot.slane %v7122_v28, 4 }
 0x23b   : > { %v5192_v11 = vpack.i.bf16 %v1713_v2, %v1657_v50  ;;  %v843_v51 = vsel %vm369_vm0, 0.0, %v842_v36  ;;  %v899_v56 = vsel %vm369_vm0, 0.0, %v898_v27  ;;  %v1450_v2 = vrot.slane %v7065_v60, 4 }
 0x23c   : > { %v7286_v16 = vpop.permute.xlu0 %4983  ;;  %v2061_v20 = vsel %vm369_vm0, 0.0, %v2060_v42  ;;  %v2117_v28 = vsel %vm369_vm0, 0.0, %v2116_v35 }
 0x23d   : > { %v5202_v29 = vpack.i.bf16 %v2117_v28, %v2061_v20  ;;  %v1451_v36 = vsel %vm369_vm0, 0.0, %v1450_v2  ;;  %v9847_v20 = vld [vmem:[#allocation30_spill] sm:$0xff]  ;;  %v9848_v28 = vld [vmem:[#allocation29_spill] sm:$0xff] }
 0x23e   : > { %5153 = vrot.lane.b32.xlu0 %v5152_v49, %s5803_s16  ;;  %2369 = vrot.lane.b32.xlu1 %v7200_v61, %s5806_s19  ;;  %v1510_v49 = vrot.slane %v6888_v40, 4  ;;  %v7253_v40 = vsel %vm369_vm0, %v2034_v22, %v7013_v26  ;;  %v7268_v26 = vsel %vm369_vm0, %v2296_v55, %v7071_v24  ;;  %v896_v24 = vrot.slane %v6978_v41, 4 }
 0x23f   : > { %5178 = vrot.lane.b32.xlu2 %v5177_v30, %s5802_s9  ;;  %v7239_v30 = vsel %vm369_vm0, %v1686_v18, %v6927_v10  ;;  %v2090_v10 = vrot.slane %v7081_v25, 4  ;;  %v7288_v5 = vpop.permute.xlu1 %4998  ;;  %v5167_v18 = vpack.i.bf16 %v899_v56, %v843_v51  ;;  %v1714_v55 = vrot.slane %v7056_v13, 4 }
 0x240   : > { %v1511_v32 = vsel %vm369_vm0, 0.0, %v1510_v49  ;;  %v7270_v25 = vpop.permute.xlu2 %5043  ;;  %v897_v41 = vsel %vm369_vm0, 0.0, %v896_v24  ;;  %v1658_v49 = vrot.slane %v7053_v47, 4  ;;  %v7314_v47 = vperm.slane %v7214_v8, %v5986_v17 }
 0x241   : > { %v7264_v43 = vsel %vm369_vm0, %v2090_v10, %v7016_v33  ;;  %v5147_v6 = vpack.i.bf16 %v1511_v32, %v1455_v39  ;;  %v840_v33 = vrot.slane %v6975_v59, 4  ;;  %v2266_v10 = vrot.slane %v7170_v14, 4 }
 0x242   : > { %v7318_v13 = vperm.slane %v7218_v12, %v5986_v17  ;;  %v2062_v8 = vrot.slane %v7111_v38, 4  ;;  %v838_v12 = vrot.slane %v7314_v47, 4  ;;  %v1020_v24 = vrot.slane %v6911_v53, 4 }
 0x243   : > { %v841_v59 = vsel %vm369_vm0, 0.0, %v840_v33  ;;  %v2267_v50 = vsel %vm369_vm0, 0.0, %v2266_v10  ;;  %v1076_v33 = vrot.slane %v6855_v9, 4 }
 0x244   : > { %v7308_v7 = vpop.permute.xlu0 %5003  ;;  %v839_v38 = vsel %vm369_vm0, 0.0, %v838_v12  ;;  %v1021_v9 = vsel %vm369_vm0, %v1020_v24, %v9847_v20 }
 0x245   : > { %9846 = vst [vmem:[#allocation27_spill] sm:$0xff] %v7308_v7  ;;  %v1077_v53 = vsel %vm369_vm0, %v1076_v33, %v9848_v28  ;;  %v9875_v7 = vld [vmem:[#allocation34_spill] sm:$0xff] }
 0x246   : > { %5158 = vrot.lane.b32.xlu0 %v5157_v19, %s5803_s16  ;;  %5143 = vrot.lane.b32.xlu1 %v5142_v23, %s5803_s16  ;;  %v5162_v19 = vpack.i.bf16 %v897_v41, %v841_v59  ;;  %v1046_v23 = vrot.slane %v6989_v4, 4  ;;  %v1659_v4 = vsel %vm369_vm0, 0.0, %v1658_v49  ;;  %v7367_v49 = vperm.slane %v1021_v9, %v5986_v17 }
 0x247   : > { %5188 = vrot.lane.b32.xlu2 %v5187_v62, %s5802_s9  ;;  %v1102_v62 = vrot.slane %v6992_v15, 4  ;;  %v1715_v15 = vsel %vm369_vm0, 0.0, %v1714_v55  ;;  %v7320_v54 = vpop.permute.xlu1 %5013  ;;  %v7370_v55 = vperm.slane %v1077_v53, %v5986_v17 }
 0x248   : > { %v7296_v22 = vpop.permute.xlu2 %5053  ;;  %v1047_v52 = vsel %vm369_vm0, 0.0, %v1046_v23  ;;  %v5197_v14 = vpack.i.bf16 %v1715_v15, %v1659_v4  ;;  %v2268_v23 = vrot.slane %v7167_v63, 4  ;;  %9851 = vst [vmem:[#allocation35_spill] sm:$0xff] %v7367_v49 }
 0x249   : > { %v1103_v34 = vsel %vm369_vm0, 0.0, %v1102_v62  ;;  %v2324_v62 = vrot.slane %v7200_v61, 4  ;;  %9852 = vst [vmem:[#allocation38_spill] sm:$0xff] %v7370_v55 }
 0x24a   : > { %v5172_v39 = vpack.i.bf16 %v1103_v34, %v1047_v52  ;;  %v9853_v52 = vld [vmem:[#allocation41_spill] sm:$0xff]  ;;  %v9854_v34 = vld [vmem:[#allocation42_spill] sm:$0xff]  ;;  %v2269_v63 = vsel %vm369_vm0, 0.0, %v2268_v23 }
 0x24b   : > { %v1424_v10 = vrot.slane %v9854_v34, 4  ;;  %v2325_v61 = vsel %vm369_vm0, 0.0, %v2324_v62  ;;  %v7430_v34 = vperm.slane %v7275_v45, %v5986_v17 }
 0x24c   : > { %v7342_v42 = vpop.permute.xlu0 %5033 }
 0x24e   : > { %2353 = vrot.lane.b32.xlu0 %v2271_v48, %s5803_s16  ;;  %5148 = vrot.lane.b32.xlu1 %v5147_v6, %s5803_s16  ;;  %v1506_v48 = vrot.slane %v7068_v0, 4  ;;  %v2118_v6 = vrot.slane %v7114_v57, 4  ;;  %v2063_v0 = vsel %vm369_vm0, 0.0, %v2062_v8 }
 0x24f   : > { %5193 = vrot.lane.b32.xlu2 %v5192_v11, %s5804_s28  ;;  %v894_v11 = vrot.slane %v7318_v13, 4  ;;  %v7344_v51 = vpop.permute.xlu1 %5023 }
 0x250   : > { %v1507_v60 = vsel %vm369_vm0, 0.0, %v1506_v48  ;;  %v2119_v27 = vsel %vm369_vm0, 0.0, %v2118_v6  ;;  %v9856_v48 = vld [vmem:[#allocation32_spill] sm:$0xff]  ;;  %v9857_v6 = vld [vmem:[#allocation31_spill] sm:$0xff] }
 0x251   : > { %v7322_v32 = vpop.permute.xlu2 %5078  ;;  %v895_v57 = vsel %vm369_vm0, 0.0, %v894_v11  ;;  %v5182_v35 = vpack.i.bf16 %v1507_v60, %v1451_v36  ;;  %v5207_v56 = vpack.i.bf16 %v2119_v27, %v2063_v0  ;;  %v1425_v8 = vsel %vm369_vm0, %v1424_v10, %v9856_v48  ;;  %9862 = vst [vmem:[#allocation32_spill] sm:$0xff] %v7430_v34 }
 0x252   : > { %v5212_v59 = vpack.i.bf16 %v895_v57, %v839_v38  ;;  %v7398_v60 = vperm.slane %v7253_v40, %v5986_v17  ;;  %v7402_v0 = vperm.slane %v7264_v43, %v5986_v17  ;;  %v7407_v57 = vperm.slane %v1425_v8, %v5986_v17 }
 0x253   : > { %v7435_v10 = vperm.slane %v7268_v26, %v5986_v17 }
 0x254   : > { %v7377_v15 = vpop.permute.xlu0 %5038  ;;  %9858 = vst [vmem:[#allocation30_spill] sm:$0xff] %v7398_v60  ;;  %v2114_v40 = vrot.slane %v7402_v0, 4  ;;  %v1448_v43 = vrot.slane %v7407_v57, 4 }
 0x255   : > { %9859 = vst [vmem:[#allocation29_spill] sm:$0xff] %v7402_v0  ;;  %v9878_v0 = vld [vmem:[#allocation21_spill] sm:$0xff] }
 0x256   : > { %5168 = vrot.lane.b32.xlu0 %v5167_v18, %s5802_s9  ;;  %5163 = vrot.lane.b32.xlu1 %v5162_v19, %s5804_s28  ;;  %v2322_v18 = vrot.slane %v7140_v21, 4  ;;  %v7358_v19 = vperm.slane %v7234_v37, %v5986_v17  ;;  %v1480_v21 = vrot.slane %v9853_v52, 4  ;;  %9860 = vst [vmem:[#allocation41_spill] sm:$0xff] %v7407_v57  ;;  %v1449_v23 = vsel %vm369_vm0, 0.0, %v1448_v43 }
 0x257   : > { %5203 = vrot.lane.b32.xlu2 %v5202_v29, %s5804_s28  ;;  %v7362_v29 = vperm.slane %v7239_v30, %v5986_v17  ;;  %9863 = vst [vmem:[#allocation31_spill] sm:$0xff] %v7435_v10  ;;  %v4996_v57 = vunpack.i.h.bf16 %v9875_v7 }
 0x258   : > { %9849 = vst [vmem:[#allocation28_spill] sm:$0xff] %v7358_v19  ;;  %v2323_v37 = vsel %vm369_vm0, 0.0, %v2322_v18  ;;  %v1654_v4 = vrot.slane %v7358_v19, 4  ;;  %v1481_v12 = vsel %vm369_vm0, %v1480_v21, %v9857_v6  ;;  %v2115_v18 = vsel %vm369_vm0, 0.0, %v2114_v40 }
 0x259   : > { %9850 = vst [vmem:[#allocation33_spill] sm:$0xff] %v7362_v29  ;;  %v1710_v30 = vrot.slane %v7362_v29, 4  ;;  %v7410_v33 = vperm.slane %v1481_v12, %v5986_v17 }
 0x25a   : > { %v1655_v11 = vsel %vm369_vm0, 0.0, %v1654_v4 }
 0x25b   : > { %v7347_v41 = vpop.permute.xlu2 %5083  ;;  %v1711_v36 = vsel %vm369_vm0, 0.0, %v1710_v30  ;;  %9861 = vst [vmem:[#allocation42_spill] sm:$0xff] %v7410_v33 }
 0x25c   : > { %v5227_v24 = vpack.i.bf16 %v1711_v36, %v1655_v11  ;;  %v7418_v20 = vpop.permute.xlu0 %5048 }
 0x25d   : > { %v5051_v29 = vunpack.i.h.bf16 %v7418_v20 }
 0x25e   : > { %5173 = vrot.lane.b32.xlu0 %v5172_v39, %s5804_s28  ;;  %5198 = vrot.lane.b32.xlu1 %v5197_v14, %s5802_s9  ;;  %v1044_v39 = vrot.slane %v7367_v49, 4  ;;  %v1100_v14 = vrot.slane %v7370_v55, 4  ;;  %v4995_v49 = vunpack.i.l.bf16 %v9875_v7  ;;  %v9879_v7 = vld [vmem:[#allocation22_spill] sm:$0xff] }
 0x25f   : > { %2337 = vrot.lane.b32.xlu2 %v2267_v50, %s5804_s28  ;;  %v7384_v50 = vpop.permute.xlu1 %5028 }
 0x260   : > { %v1045_v27 = vsel %vm369_vm0, 0.0, %v1044_v39  ;;  %v1101_v38 = vsel %vm369_vm0, 0.0, %v1100_v14  ;;  %v9864_v39 = vld [vmem:[#allocation36_spill] sm:$0xff] }
 0x265   : > { %v7386_v2 = vpop.permute.xlu2 %2349 }
 0x266   : > { %5183 = vrot.lane.b32.xlu0 %v5182_v35, %s5804_s28  ;;  %5208 = vrot.lane.b32.xlu1 %v5207_v56, %s5802_s9  ;;  %9855 = vst [vmem:[#allocation39_spill] sm:$0xff] %v7386_v2  ;;  %v5217_v35 = vpack.i.bf16 %v1101_v38, %v1045_v27  ;;  %v2058_v56 = vrot.slane %v7398_v60, 4  ;;  %v9872_v2 = vld [vmem:[#allocation43_spill] sm:$0xff]  ;;  %v5031_v60 = vunpack.i.h.bf16 %v7384_v50 }
 0x267   : > { %5213 = vrot.lane.b32.xlu2 %v5212_v59, %s5808_s27  ;;  %v1504_v59 = vrot.slane %v7410_v33, 4  ;;  %v7420_v9 = vpop.permute.xlu1 %5058  ;;  %v9876_v33 = vld [vmem:[#allocation26_spill] sm:$0xff] }
 0x268   : > { %v2059_v53 = vsel %vm369_vm0, 0.0, %v2058_v56 }
 0x269   : > { %v1505_v62 = vsel %vm369_vm0, 0.0, %v1504_v59  ;;  %v5232_v52 = vpack.i.bf16 %v2115_v18, %v2059_v53 }
 0x26a   : > { %v5222_v21 = vpack.i.bf16 %v1505_v62, %v1449_v23 }
 0x26e   : > { %2365 = vrot.lane.b32.xlu0 %v2323_v37, %s5804_s28  ;;  %2345 = vrot.lane.b32.xlu1 %v2269_v63, %s5802_s9  ;;  %v7422_v28 = vpop.permute.xlu2 %5093  ;;  %v2310_v37 = vrot.slane %v7185_v1, 4  ;;  %v2264_v63 = vrot.slane %v7430_v34, 4 }
 0x26f   : > { %2373 = vrot.lane.b32.xlu2 %v2325_v61, %s5802_s9  ;;  %v2320_v61 = vrot.slane %v7435_v10, 4  ;;  %v9874_v10 = vld [vmem:[#allocation25_spill] sm:$0xff] }
 0x270   : > { %v2311_v14 = vsel %vm369_vm0, %v9864_v39, %v2310_v37  ;;  %v2265_v26 = vsel %vm369_vm0, 0.0, %v2264_v63 }
 0x271   : > { %v2321_v48 = vsel %vm369_vm0, 0.0, %v2320_v61  ;;  %v2319_v1 = vperm.slane %v2311_v14, %v5986_v17  ;;  %v5060_v17 = vunpack.i.l.bf16 %v7420_v9 }
 0x273   : > { %v2326_v12 = vrot.slane %v2319_v1, 4  ;;  %v1964_v55 = vsel %vm737_vm4, %v9878_v0, %v5060_v17  ;;  %v4975_v0 = vunpack.i.l.bf16 %v7247_v46 }
 0x275   : > { %v2327_v36 = vsel %vm369_vm0, 0.0, %v2326_v12  ;;  %v5056_v12 = vunpack.i.h.bf16 %v7296_v22 }
 0x276   : > { %5228 = vrot.lane.b32.xlu0 %v5227_v24, %s5808_s27  ;;  %5218 = vrot.lane.b32.xlu1 %v5217_v35, %s5808_s27 }
 0x278   : > { %v7445_v45 = vpop.permute.xlu2 %5098 }
 0x27c   : > { %v7441_v30 = vpop.permute.xlu1 %5063 }
 0x27d   : > { %v7439_v4 = vpop.permute.xlu0 %5068 }
 0x27e   : > { %5233 = vrot.lane.b32.xlu0 %v5232_v52, %s5808_s27  ;;  %5223 = vrot.lane.b32.xlu1 %v5222_v21, %s5808_s27 }
 0x281   : > { %v7458_v11 = vpop.permute.xlu2 %5108 }
 0x285   : > { %v7454_v8 = vpop.permute.xlu0 %5073  ;;  %v7456_v6 = vpop.permute.xlu1 %5103 }
 0x286   : > { %2329 = vrot.lane.b32.xlu0 %v2265_v26, %s5808_s27  ;;  %2357 = vrot.lane.b32.xlu1 %v2321_v48, %s5808_s27  ;;  %v5055_v26 = vunpack.i.l.bf16 %v7296_v22  ;;  %v9871_v48 = vld [vmem:[#allocation40_spill] sm:$0xff]  ;;  %v5030_v22 = vunpack.i.l.bf16 %v7384_v50 }
 0x289   : > { %v7467_v24 = vpop.permute.xlu2 %2361 }
 0x28a   : > { %9865 = vst [vmem:[#allocation36_spill] sm:$0xff] %v7467_v24 }
 0x28e   : > { %2377 = vrot.lane.b32.xlu0 %v2319_v1, %s5805_s18  ;;  %2381 = vrot.lane.b32.xlu1 %v2327_v36, %s5803_s16  ;;  %v5061_v36 = vunpack.i.h.bf16 %v7420_v9  ;;  %v1354_v1 = vsel %vm737_vm4, %v9874_v10, %v5055_v26  ;;  %v9877_v10 = vld [vmem:[#allocation24_spill] sm:$0xff] }
 0x28f   : > { %v7463_v27 = vpop.permute.xlu0 %5088 }
 0x290   : > { %v7465_v38 = vpop.permute.xlu1 %5113  ;;  %v1971_v26 = vsel %vm737_vm4, %v9877_v10, %v5061_v36  ;;  %v1965_v36 = vsel %vm739_vm5, %v1964_v55, %v4995_v49  ;;  %v5036_v10 = vunpack.i.h.bf16 %v7342_v42 }
 0x291   : > { %v7475_v43 = vpop.permute.xlu2 %5138  ;;  %v1972_v17 = vsel %vm739_vm5, %v1971_v26, %v4996_v57  ;;  %v5035_v57 = vunpack.i.l.bf16 %v7342_v42  ;;  %v5045_v42 = vunpack.i.l.bf16 %v7270_v25 }
 0x298   : > { %v7469_v35 = vpop.permute.xlu0 %5123  ;;  %v7471_v56 = vpop.permute.xlu1 %5118 }
 0x299   : > { %v7483_v23 = vpop.permute.xlu2 %5178 }
 0x2a0   : > { %v7473_v40 = vpop.permute.xlu0 %5133  ;;  %v7477_v59 = vpop.permute.xlu1 %5128 }
 0x2a1   : > { %v7489_v21 = vpop.permute.xlu2 %5188 }
 0x2a8   : > { %v7479_v53 = vpop.permute.xlu0 %2341  ;;  %v7481_v18 = vpop.permute.xlu1 %2333 }
 0x2a9   : > { %9866 = vst [vmem:[#allocation44_spill] sm:$0xff] %v7479_v53  ;;  %v7495_v61 = vpop.permute.xlu2 %5193  ;;  %v4990_v53 = vunpack.i.l.bf16 %v9872_v2 }
 0x2aa   : > { %9867 = vst [vmem:[#allocation45_spill] sm:$0xff] %v7481_v18  ;;  %v1361_v18 = vsel %vm737_vm4, %v9876_v33, %v5056_v12  ;;  %v4965_v33 = vunpack.i.l.bf16 %v7197_v3 }
 0x2b0   : > { %v7485_v62 = vpop.permute.xlu0 %5153  ;;  %v7487_v52 = vpop.permute.xlu1 %2369 }
 0x2b1   : > { %9868 = vst [vmem:[#allocation46_spill] sm:$0xff] %v7487_v52  ;;  %v4991_v52 = vunpack.i.h.bf16 %v9872_v2  ;;  %v7516_v34 = vpop.permute.xlu2 %5203  ;;  %v4985_v2 = vunpack.i.l.bf16 %v7286_v16 }
 0x2b3   : > { %v1355_v19 = vsel %vm739_vm5, %v1354_v1, %v4985_v2  ;;  %v5040_v1 = vunpack.i.l.bf16 %v7377_v15  ;;  %v4976_v2 = vunpack.i.h.bf16 %v7247_v46  ;;  %v5001_v46 = vunpack.i.h.bf16 %v7288_v5 }
 0x2b4   : > { %v1356_v50 = vsel %vm741_vm6, %v1355_v19, %v5030_v22  ;;  %v5020_v22 = vunpack.i.l.bf16 %v7221_v44 }
 0x2b5   : > { %v1357_v19 = vsel %vm743_vm7, %v1356_v50, %v4990_v53  ;;  %v5000_v53 = vunpack.i.l.bf16 %v7288_v5 }
 0x2b8   : > { %v7491_v37 = vpop.permute.xlu0 %5158  ;;  %v7493_v63 = vpop.permute.xlu1 %5143 }
 0x2b9   : > { %v7564_v50 = vpop.permute.xlu2 %2337 }
 0x2c0   : > { %v7497_v39 = vpop.permute.xlu0 %2353  ;;  %v7499_v14 = vpop.permute.xlu1 %5148 }
 0x2c1   : > { %9869 = vst [vmem:[#allocation47_spill] sm:$0xff] %v7497_v39  ;;  %v5050_v39 = vunpack.i.l.bf16 %v7418_v20  ;;  %v5041_v20 = vunpack.i.h.bf16 %v7377_v15  ;;  %v1966_v15 = vsel %vm741_vm6, %v1965_v36, %v5040_v1  ;;  %v5021_v36 = vunpack.i.h.bf16 %v7221_v44 }
 0x2c2   : > { %9870 = vst [vmem:[#allocation48_spill] sm:$0xff] %v7499_v14  ;;  %v4966_v14 = vunpack.i.h.bf16 %v7197_v3 }
 0x2c8   : > { %v7510_v24 = vpop.permute.xlu0 %5168  ;;  %v7518_v9 = vpop.permute.xlu1 %5163 }
 0x2c9   : > { %9873 = vst [vmem:[#allocation40_spill] sm:$0xff] %v7510_v24  ;;  %v4986_v24 = vunpack.i.h.bf16 %v7286_v16  ;;  %v738_v16 = vsel %vm737_vm4, %v9879_v7, %v5050_v39 }
 0x2cb   : > { %v1362_v12 = vsel %vm739_vm5, %v1361_v18, %v4986_v24  ;;  %v9880_v24 = vld [vmem:[#allocation23_spill] sm:$0xff]  ;;  %v740_v18 = vsel %vm739_vm5, %v738_v16, %v4975_v0  ;;  %v4980_v16 = vunpack.i.l.bf16 %v7242_v58 }
 0x2cc   : > { %v1363_v3 = vsel %vm741_vm6, %v1362_v12, %v5031_v60  ;;  %v751_v49 = vsel %vm737_vm4, %v9880_v24, %v5051_v29  ;;  %v1973_v60 = vsel %vm741_vm6, %v1972_v17, %v5041_v20  ;;  %v1358_v12 = vsel %vm745_vm8, %v1357_v19, %v5035_v57 }
 0x2cd   : > { %v1364_v29 = vsel %vm743_vm7, %v1363_v3, %v4991_v52  ;;  %v752_v26 = vsel %vm739_vm5, %v751_v49, %v4976_v2  ;;  %v1967_v17 = vsel %vm743_vm7, %v1966_v15, %v5000_v53  ;;  %v1974_v7 = vsel %vm743_vm7, %v1973_v60, %v5001_v46  ;;  %v9881_v3 = vld [vmem:[#allocation37_spill] sm:$0xff] }
 0x2ce   : > { %v742_v5 = vsel %vm741_vm6, %v740_v18, %v5020_v22  ;;  %v5046_v52 = vunpack.i.h.bf16 %v7270_v25  ;;  %v1365_v0 = vsel %vm745_vm8, %v1364_v29, %v5036_v10  ;;  %v4981_v20 = vunpack.i.h.bf16 %v7242_v58 }
 0x2cf   : > { %v1359_v1 = vsel %vm747_vm9, %v1358_v12, %v4965_v33  ;;  %v753_v44 = vsel %vm741_vm6, %v752_v26, %v5021_v36  ;;  %v5010_v2 = vunpack.i.l.bf16 %v9881_v3  ;;  %v1968_v19 = vsel %vm745_vm8, %v1967_v17, %v5045_v42  ;;  %v9889_v42 = vld [vmem:[#allocation35_spill] sm:$0xff] }
 0x2d0   : > { %v7550_v55 = vpop.permute.xlu0 %5173  ;;  %v7554_v39 = vpop.permute.xlu1 %5198  ;;  %v1975_v24 = vsel %vm745_vm8, %v1974_v7, %v5046_v52  ;;  %v744_v49 = vsel %vm743_vm7, %v742_v5, %v4980_v16  ;;  %v5011_v57 = vunpack.i.h.bf16 %v9881_v3  ;;  %v5016_v25 = vunpack.i.h.bf16 %v7320_v54 }
 0x2d1   : > { %v5025_v18 = vunpack.i.l.bf16 %v7344_v51  ;;  %v1366_v33 = vsel %vm747_vm9, %v1365_v0, %v4966_v14  ;;  %v5015_v15 = vunpack.i.l.bf16 %v7320_v54  ;;  %v5026_v60 = vunpack.i.h.bf16 %v7344_v51  ;;  %v5214_v0 = vpop.permute.xlu2 %5213 }
 0x2d2   : > { %v7593_v53 = vsel %vm749_vm10, %v1359_v1, %v5010_v2  ;;  %v754_v22 = vsel %vm743_vm7, %v753_v44, %v4981_v20  ;;  %v9882_v10 = vunpack.i.l.bf16 %v7195_v31  ;;  %v9883_v12 = vunpack.i.h.bf16 %v7195_v31 }
 0x2d3   : > { %v746_v54 = vsel %vm745_vm8, %v744_v49, %v5025_v18  ;;  %v7608_v7 = vsel %vm749_vm10, %v1366_v33, %v5011_v57  ;;  %v5096_v5 = vunpack.i.h.bf16 %v7422_v28  ;;  %v5095_v16 = vunpack.i.l.bf16 %v7422_v28 }
 0x2d4   : > { %v1969_v26 = vsel %vm747_vm9, %v1968_v19, %v9882_v10  ;;  %v1976_v14 = vsel %vm747_vm9, %v1975_v24, %v9883_v12  ;;  %v7614_v31 = vsel %vm745_vm8, %v754_v22, %v5026_v60  ;;  %v9884_v44 = vunpack.i.l.bf16 %v9871_v48 }
 0x2d5   : > { %v7618_v20 = vsel %vm749_vm10, %v1969_v26, %v5015_v15  ;;  %v7621_v1 = vsel %vm749_vm10, %v1976_v14, %v5016_v25  ;;  %v5100_v2 = vunpack.i.l.bf16 %v7445_v45  ;;  %v5065_v57 = vunpack.i.l.bf16 %v7441_v30 }
 0x2d6   : > { %v7626_v3 = vsel %vm747_vm9, %v746_v54, %v9884_v44  ;;  %v5215_v10 = vunpack.i.l.bf16 %v5214_v0  ;;  %v5091_v54 = vunpack.i.h.bf16 %v7463_v27  ;;  %v5090_v44 = vunpack.i.l.bf16 %v7463_v27 }
 0x2d7   : > { %v5216_v24 = vunpack.i.h.bf16 %v5214_v0  ;;  %v5125_v29 = vunpack.i.l.bf16 %v7469_v35  ;;  %v5121_v15 = vunpack.i.h.bf16 %v7471_v56  ;;  %v5120_v60 = vunpack.i.l.bf16 %v7471_v56  ;;  %v9885_v0 = vld [vmem:[#allocation48_spill] sm:$0xff] }
 0x2d8   : > { %v7585_v58 = vpop.permute.xlu0 %5183  ;;  %v7590_v46 = vpop.permute.xlu1 %5208  ;;  %v958_v19 = vsel %vm737_vm4, %v7314_v47, %v5215_v10  ;;  %v5165_v33 = vunpack.i.l.bf16 %v7518_v9  ;;  %v5196_v36 = vunpack.i.h.bf16 %v7495_v61  ;;  %v5166_v14 = vunpack.i.h.bf16 %v7518_v9 }
 0x2d9   : > { %v965_v12 = vsel %vm737_vm4, %v7318_v13, %v5216_v24  ;;  %v5195_v47 = vunpack.i.l.bf16 %v7495_v61  ;;  %v959_v51 = vsel %vm739_vm5, %v958_v19, %v5090_v44  ;;  %v5206_v25 = vunpack.i.h.bf16 %v7516_v34  ;;  %v9887_v13 = vld [vmem:[#allocation28_spill] sm:$0xff] }
 0x2da   : > { %v5205_v17 = vunpack.i.l.bf16 %v7516_v34  ;;  %v960_v18 = vsel %vm741_vm6, %v959_v51, %v5165_v33  ;;  %v966_v9 = vsel %vm739_vm5, %v965_v12, %v5091_v54  ;;  %v9886_v33 = vld [vmem:[#allocation33_spill] sm:$0xff]  ;;  %v9888_v54 = vld [vmem:[#allocation40_spill] sm:$0xff] }
 0x2db   : > { %v967_v44 = vsel %vm741_vm6, %v966_v9, %v5166_v14  ;;  %v961_v34 = vsel %vm743_vm7, %v960_v18, %v5095_v16  ;;  %v5170_v27 = vunpack.i.l.bf16 %v9888_v54  ;;  %v5171_v9 = vunpack.i.h.bf16 %v9888_v54 }
 0x2dc   : > { %v968_v16 = vsel %vm743_vm7, %v967_v44, %v5096_v5 }
 0x2e0   : > { %v7639_v26 = vpop.permute.xlu0 %2365  ;;  %v7645_v52 = vpop.permute.xlu1 %2345 }
 0x2e8   : > { %v5229_v22 = vpop.permute.xlu0 %5228  ;;  %v5219_v61 = vpop.permute.xlu1 %5218 }
 0x2e9   : > { %v5231_v24 = vunpack.i.h.bf16 %v5229_v22  ;;  %v5230_v10 = vunpack.i.l.bf16 %v5229_v22  ;;  %v5220_v49 = vunpack.i.l.bf16 %v5219_v61  ;;  %v5221_v51 = vunpack.i.h.bf16 %v5219_v61 }
 0x2ea   : > { %v5150_v22 = vunpack.i.l.bf16 %v9885_v0 }
 0x2eb   : > { %v1781_v56 = vsel %vm737_vm4, %v9886_v33, %v5231_v24  ;;  %v1774_v12 = vsel %vm737_vm4, %v9887_v13, %v5230_v10  ;;  %v1164_v19 = vsel %vm737_vm4, %v9889_v42, %v5220_v49  ;;  %v5176_v10 = vunpack.i.h.bf16 %v7550_v55  ;;  %v9890_v33 = vld [vmem:[#allocation38_spill] sm:$0xff] }
 0x2ec   : > { %v1775_v14 = vsel %vm739_vm5, %v1774_v12, %v5120_v60  ;;  %v1782_v18 = vsel %vm739_vm5, %v1781_v56, %v5121_v15  ;;  %v5175_v13 = vunpack.i.l.bf16 %v7550_v55  ;;  %v5201_v24 = vunpack.i.h.bf16 %v7554_v39 }
 0x2ed   : > { %v1776_v61 = vsel %vm741_vm6, %v1775_v14, %v5195_v47  ;;  %v962_v42 = vsel %vm745_vm8, %v961_v34, %v5170_v27  ;;  %v5200_v49 = vunpack.i.l.bf16 %v7554_v39  ;;  %v5186_v60 = vunpack.i.h.bf16 %v7585_v58  ;;  %v9892_v14 = vld [vmem:[#allocation29_spill] sm:$0xff] }
 0x2ee   : > { %v1171_v28 = vsel %vm737_vm4, %v9890_v33, %v5221_v51  ;;  %v1165_v5 = vsel %vm739_vm5, %v1164_v19, %v5100_v2  ;;  %v5185_v15 = vunpack.i.l.bf16 %v7585_v58  ;;  %v5211_v56 = vunpack.i.h.bf16 %v7590_v46 }
 0x2ef   : > { %v1783_v55 = vsel %vm741_vm6, %v1782_v18, %v5196_v36  ;;  %v1777_v27 = vsel %vm743_vm7, %v1776_v61, %v5125_v29  ;;  %v5210_v39 = vunpack.i.l.bf16 %v7590_v46  ;;  %v963_v51 = vsel %vm747_vm9, %v962_v42, %v5065_v57  ;;  %v9893_v18 = vld [vmem:[#allocation30_spill] sm:$0xff] }
 0x2f0   : > { %v5234_v47 = vpop.permute.xlu0 %5233  ;;  %v5224_v44 = vpop.permute.xlu1 %5223  ;;  %v9891_v2 = vunpack.i.h.bf16 %v7445_v45  ;;  %v1166_v19 = vsel %vm741_vm6, %v1165_v5, %v5175_v13  ;;  %v1778_v61 = vsel %vm745_vm8, %v1777_v27, %v5200_v49  ;;  %v9894_v33 = vunpack.i.h.bf16 %v7469_v35  ;;  %v9895_v42 = vld [vmem:[#allocation42_spill] sm:$0xff] }
 0x2f1   : > { %v5236_v34 = vunpack.i.h.bf16 %v5234_v47  ;;  %v5235_v12 = vunpack.i.l.bf16 %v5234_v47  ;;  %v5226_v54 = vunpack.i.h.bf16 %v5224_v44  ;;  %v5225_v36 = vunpack.i.l.bf16 %v5224_v44 }
 0x2f2   : > { %v1172_v58 = vsel %vm739_vm5, %v1171_v28, %v9891_v2  ;;  %v1784_v57 = vsel %vm743_vm7, %v1783_v55, %v9894_v33  ;;  %v9896_v28 = vld [vmem:[#allocation41_spill] sm:$0xff]  ;;  %v9897_v5 = vunpack.i.h.bf16 %v7477_v59  ;;  %v9898_v44 = vunpack.i.l.bf16 %v7477_v59 }
 0x2f3   : > { %v2185_v29 = vsel %vm737_vm4, %v9892_v14, %v5236_v34  ;;  %v2178_v46 = vsel %vm737_vm4, %v9893_v18, %v5235_v12  ;;  %v1575_v45 = vsel %vm737_vm4, %v9895_v42, %v5226_v54  ;;  %v1568_v13 = vsel %vm737_vm4, %v9896_v28, %v5225_v36 }
 0x2f4   : > { %v2186_v47 = vsel %vm739_vm5, %v2185_v29, %v9897_v5  ;;  %v2179_v34 = vsel %vm739_vm5, %v2178_v46, %v9898_v44  ;;  %v9899_v49 = vunpack.i.h.bf16 %v7458_v11  ;;  %v9900_v55 = vunpack.i.l.bf16 %v7458_v11  ;;  %v9906_v5 = vld [vmem:[#allocation32_spill] sm:$0xff] }
 0x2f5   : > { %v2187_v12 = vsel %vm741_vm6, %v2186_v47, %v5206_v25  ;;  %v2180_v2 = vsel %vm741_vm6, %v2179_v34, %v5205_v17  ;;  %v9901_v59 = vunpack.i.l.bf16 %v7473_v40  ;;  %v9902_v29 = vunpack.i.h.bf16 %v7473_v40  ;;  %v9910_v34 = vld [vmem:[#allocation31_spill] sm:$0xff] }
 0x2f6   : > { %v1576_v35 = vsel %vm739_vm5, %v1575_v45, %v9899_v49  ;;  %v1569_v27 = vsel %vm739_vm5, %v1568_v13, %v9900_v55  ;;  %v9903_v46 = vunpack.i.l.bf16 %v7465_v38  ;;  %v9904_v42 = vunpack.i.l.bf16 %v7347_v41 }
 0x2f7   : > { %v1577_v54 = vsel %vm741_vm6, %v1576_v35, %v5186_v60  ;;  %v1570_v36 = vsel %vm741_vm6, %v1569_v27, %v5185_v15  ;;  %v2181_v14 = vsel %vm743_vm7, %v2180_v2, %v9901_v59  ;;  %v2188_v18 = vsel %vm743_vm7, %v2187_v12, %v9902_v29  ;;  %v9914_v12 = vld [vmem:[#allocation36_spill] sm:$0xff] }
 0x2f8   : > { %v2182_v11 = vsel %vm745_vm8, %v2181_v14, %v5210_v39  ;;  %v1571_v25 = vsel %vm743_vm7, %v1570_v36, %v9903_v46  ;;  %v2189_v17 = vsel %vm745_vm8, %v2188_v18, %v5211_v56  ;;  %v969_v60 = vsel %vm745_vm8, %v968_v16, %v5171_v9  ;;  %v2330_v33 = vpop.permute.xlu0 %2329  ;;  %v2358_v13 = vpop.permute.xlu1 %2357 }
 0x2f9   : > { %v1173_v15 = vsel %vm741_vm6, %v1172_v58, %v5176_v10  ;;  %v2183_v40 = vsel %vm747_vm9, %v2182_v11, %v9904_v42  ;;  %v9905_v45 = vunpack.i.l.bf16 %v7456_v6  ;;  %v1785_v39 = vsel %vm745_vm8, %v1784_v57, %v5201_v24  ;;  %v9911_v24 = vld [vmem:[#allocation45_spill] sm:$0xff]  ;;  %v9922_v42 = vld [vmem:[#allocation39_spill] sm:$0xff] }
 0x2fa   : > { %v2384_v47 = vsel %vm737_vm4, %v9906_v5, %v2330_v33  ;;  %v9907_v56 = vunpack.i.l.bf16 %v7489_v21  ;;  %v9908_v16 = vunpack.i.l.bf16 %v7322_v32  ;;  %v9909_v58 = vunpack.i.h.bf16 %v7465_v38 }
 0x2fb   : > { %v1167_v28 = vsel %vm743_vm7, %v1166_v19, %v9905_v45  ;;  %v2391_v19 = vsel %vm737_vm4, %v9910_v34, %v2358_v13  ;;  %v2385_v57 = vsel %vm739_vm5, %v2384_v47, %v9911_v24  ;;  %v9912_v49 = vunpack.i.l.bf16 %v7491_v37  ;;  %v2374_v47 = vpop.permute.xlu2 %2373 }
 0x2fc   : > { %v1572_v9 = vsel %vm745_vm8, %v1571_v25, %v9907_v56  ;;  %v1779_v10 = vsel %vm747_vm9, %v1778_v61, %v9908_v16  ;;  %v1578_v44 = vsel %vm743_vm7, %v1577_v54, %v9909_v58  ;;  %v9913_v55 = vunpack.i.h.bf16 %v7347_v41  ;;  %v9917_v41 = vld [vmem:[#allocation44_spill] sm:$0xff]  ;;  %v9926_v56 = vld [vmem:[#allocation47_spill] sm:$0xff] }
 0x2fd   : > { %v2184_v35 = vsel %vm749_vm10, %v2183_v40, %v9912_v49  ;;  %v2392_v61 = vsel %vm739_vm5, %v2391_v19, %v9914_v12  ;;  %v2386_v38 = vsel %vm741_vm6, %v2385_v57, %v7564_v50  ;;  %v9915_v2 = vunpack.i.l.bf16 %v7483_v23 }
 0x2fe   : > { %v2190_v27 = vsel %vm747_vm9, %v2189_v17, %v9913_v55  ;;  %v9916_v36 = vunpack.i.h.bf16 %v7456_v6  ;;  %v2393_v14 = vsel %vm741_vm6, %v2392_v61, %v7639_v26  ;;  %v2387_v29 = vsel %vm743_vm7, %v2386_v38, %v9917_v41  ;;  %v9920_v6 = vld [vmem:[#allocation46_spill] sm:$0xff] }
 0x2ff   : > { %v1168_v54 = vsel %vm745_vm8, %v1167_v28, %v9915_v2  ;;  %v9918_v18 = vunpack.i.l.bf16 %v7454_v8  ;;  %v9919_v50 = vunpack.i.h.bf16 %v7489_v21  ;;  %v2388_v25 = vsel %vm745_vm8, %v2387_v29, %v7645_v52 }
 0x300   : > { %v1174_v59 = vsel %vm743_vm7, %v1173_v15, %v9916_v36  ;;  %v2394_v17 = vsel %vm743_vm7, %v2393_v14, %v9920_v6  ;;  %v2418_v15 = vrot.slane %v2184_v35, 4  ;;  %v9921_v26 = vunpack.i.h.bf16 %v7491_v37  ;;  %v2382_v57 = vpop.permute.xlu1 %2381 }
 0x301   : > { %v1573_v11 = vsel %vm747_vm9, %v1572_v9, %v9918_v18  ;;  %v1579_v46 = vsel %vm745_vm8, %v1578_v44, %v9919_v50  ;;  %v2389_v40 = vsel %vm747_vm9, %v2388_v25, %v9922_v42  ;;  %v9923_v45 = vunpack.i.l.bf16 %v7485_v62  ;;  %v2378_v44 = vpop.permute.xlu0 %2377  ;;  %v2431_v25 = vld [vmem:[#allocation7] sm:$0xf] }
 0x302   : > { %v2191_v33 = vsel %vm749_vm10, %v2190_v27, %v9921_v26  ;;  %v9924_v28 = vunpack.i.h.bf16 %v7322_v32  ;;  %v9925_v52 = vunpack.i.l.bf16 %v7475_v43  ;;  %v2390_v37 = vsel %vm749_vm10, %v2389_v40, %v9926_v56  ;;  %v9940_v40 = vld [vmem:[#allocation20_spill] sm:$0xff] }
 0x303   : > { %v1780_v21 = vsel %vm749_vm10, %v1779_v10, %v9923_v45  ;;  %v9927_v9 = vunpack.i.l.bf16 %v7439_v4  ;;  %v9928_v58 = vunpack.i.h.bf16 %v7483_v23  ;;  %v9929_v32 = vunpack.i.h.bf16 %v7441_v30  ;;  %4752 = vmatpush.msk.msra.mxu0 %vm2422_vm11, %v2390_v37 }
 0x304   : > { %v1786_v13 = vsel %vm747_vm9, %v1785_v39, %v9924_v28  ;;  %v964_v5 = vsel %vm749_vm10, %v963_v51, %v9925_v52  ;;  %v2395_v51 = vsel %vm745_vm8, %v2394_v17, %v2374_v47  ;;  %v1574_v34 = vsel %vm749_vm10, %v1573_v11, %v5150_v22 }
 0x305   : > { %v1169_v16 = vsel %vm747_vm9, %v1168_v54, %v9927_v9  ;;  %v1175_v10 = vsel %vm745_vm8, %v1174_v59, %v9928_v58  ;;  %v970_v39 = vsel %vm747_vm9, %v969_v60, %v9929_v32  ;;  %v2419_v19 = vrot.slane %v2191_v33, 4  ;;  %v9941_v58 = vld [vmem:[#allocation17_spill] sm:$0xff] }
 0x306   : > { %v9930_v24 = vunpack.i.h.bf16 %v7454_v8  ;;  %v2396_v49 = vsel %vm747_vm9, %v2395_v51, %v2378_v44  ;;  %v2429_v30 = vsel %vm2422_vm11, %v7618_v20, %v2418_v15  ;;  %v2412_v60 = vrot.slane %v1780_v21, 4  ;;  %v9939_v15 = vld [vmem:[#allocation19_spill] sm:$0xff] }
 0x307   : > { %v9931_v35 = vunpack.i.h.bf16 %v7485_v62  ;;  %v5146_v27 = vunpack.i.h.bf16 %v7493_v63  ;;  %2461 = vmatpush.msra.mxu0 %v2429_v30  ;;  %v2397_v22 = vsel %vm749_vm10, %v2396_v49, %v2382_v57  ;;  %v9932_v8 = vunpack.i.l.bf16 %v7493_v63  ;;  %v9936_v63 = vld [vmem:[#allocation27_spill] sm:$0xff]  ;;  %v9942_v30 = vld [vmem:[#allocation18_spill] sm:$0xff] }
 0x308   : > { %v1580_v23 = vsel %vm747_vm9, %v1579_v46, %v9930_v24  ;;  %v9933_v61 = vunpack.i.h.bf16 %v7439_v4  ;;  %4754 = vmatpush.msk.msra.mxu1 %vm2422_vm11, %v2397_v22  ;;  %v2427_v20 = vsel %vm2422_vm11, %v1574_v34, %v2412_v60  ;;  %v9934_v62 = vunpack.i.h.bf16 %v9885_v0 }
 0x309   : > { %v1787_v55 = vsel %vm749_vm10, %v1786_v13, %v9931_v35  ;;  %v1170_v12 = vsel %vm749_vm10, %v1169_v16, %v9932_v8  ;;  %v2400_v54 = vrot.slane %v964_v5, 4  ;;  %v9935_v36 = vunpack.i.h.bf16 %v7475_v43  ;;  %2462 = vmatpush.msra.mxu0 %v2427_v20 }
 0x30a   : > { %v1176_v38 = vsel %vm747_vm9, %v1175_v10, %v9933_v61  ;;  %v1581_v2 = vsel %vm749_vm10, %v1580_v23, %v9934_v62  ;;  %v5005_v14 = vunpack.i.l.bf16 %v9936_v63  ;;  %v2430_v4 = vsel %vm2422_vm11, %v7621_v1, %v2419_v19 }
 0x30b   : > { %v971_v59 = vsel %vm749_vm10, %v970_v39, %v9935_v36  ;;  %v2413_v41 = vrot.slane %v1787_v55, 4  ;;  %2481 = vmatpush.msra.mxu1 %v2430_v4  ;;  %v9937_v29 = vrot.slane %v7593_v53, 4  ;;  %v1177_v0 = vsel %vm749_vm10, %v1176_v38, %v5146_v27 }
 0x30c   : > { %v2407_v11 = vrot.slane %v7608_v7, 4  ;;  %v9938_v43 = vunpack.i.h.bf16 %v9871_v48  ;;  %v750_v1 = vsel %vm749_vm10, %v7626_v3, %v5005_v14  ;;  %v2401_v53 = vrot.slane %v971_v59, 4 }
 0x30d   : > { %v2425_v18 = vsel %vm2422_vm11, %v1170_v12, %v9937_v29  ;;  %v2428_v46 = vsel %vm2422_vm11, %v1581_v2, %v2413_v41  ;;  %v5006_v6 = vunpack.i.h.bf16 %v9936_v63  ;;  %v2423_v17 = vsel %vm2422_vm11, %v750_v1, %v2400_v54 }
 0x30e   : > { %v756_v50 = vsel %vm747_vm9, %v7614_v31, %v9938_v43  ;;  %2463 = vmatpush.msra.mxu0 %v2425_v18  ;;  %2482 = vmatpush.msra.mxu1 %v2428_v46  ;;  %v2426_v48 = vsel %vm2422_vm11, %v1177_v0, %v2407_v11 }
 0x30f   : > { %v757_v7 = vsel %vm749_vm10, %v756_v50, %v5006_v6 }
 0x310   : > { %2464 = vmatpush.msra.mxu0 %v2423_v17  ;;  %2483 = vmatpush.msra.mxu1 %v2426_v48  ;;  %v2424_v31 = vsel %vm2422_vm11, %v757_v7, %v2401_v53 }
 0x311   : > { %4753 = vmatmul.msk.f32.vlgmr.msra.gmra.mxu0 %vm2439_vm12, %v2431_v25 }
 0x312   : > { %2484 = vmatpush.msra.mxu1 %v2424_v31 }
 0x313   : > { %4755 = vmatmul.msk.f32.vlgmr.msra.gmra.mxu1 %vm2439_vm12, %v2431_v25 }
 0x38e   : > { %v2466_v3 = vpop.f32.mrf.mxu0 }
 0x38f   : > { %v2467_v26 = vadd.f32 %v2466_v3, %v9939_v15 }
 0x390   : > { %v2486_v42 = vpop.f32.mrf.mxu1 }
 0x391   : > { %v2489_v33 = vmax.f32 %v2467_v26, 0.0  ;;  %v2487_v45 = vadd.f32 %v2486_v42, %v9940_v40 }
 0x393   : > { %2498 = vrot.lane.b32.xlu1 %v2489_v33, %s5802_s9  ;;  %2495 = vrot.lane.b32.xlu0 %v2489_v33, %s5805_s18  ;;  %v2490_v21 = vmax.f32 %v2487_v45, 0.0 }
 0x394   : > { %2492 = vrot.lane.b32.xlu2 %v2489_v33, %s5803_s16 }
 0x39b   : > { %2507 = vrot.lane.b32.xlu1 %v2489_v33, %s5807_s20  ;;  %2504 = vrot.lane.b32.xlu0 %v2489_v33, %s5804_s28 }
 0x39c   : > { %2501 = vrot.lane.b32.xlu2 %v2489_v33, %s5806_s19 }
 0x3a3   : > { %2517 = vrot.lane.b32.xlu1 %v2490_v21, %s5805_s18  ;;  %2514 = vrot.lane.b32.xlu0 %v2490_v21, %s5803_s16 }
 0x3a4   : > { %2510 = vrot.lane.b32.xlu2 %v2489_v33, %s5808_s27 }
 0x3ab   : > { %2526 = vrot.lane.b32.xlu1 %v2490_v21, %s5804_s28  ;;  %2523 = vrot.lane.b32.xlu0 %v2490_v21, %s5806_s19 }
 0x3ac   : > { %2520 = vrot.lane.b32.xlu2 %v2490_v21, %s5802_s9 }
 0x3b3   : > { %2532 = vrot.lane.b32.xlu0 %v2490_v21, %s5808_s27 }
 0x3b4   : > { %2529 = vrot.lane.b32.xlu2 %v2490_v21, %s5807_s20 }
 0x3ee   : > { %v2493_v28 = vpop.permute.xlu2 %2492 }
 0x3f6   : > { %v2502_v13 = vpop.permute.xlu2 %2501 }
 0x3fe   : > { %v2511_v16 = vpop.permute.xlu2 %2510 }
 0x3ff   : > { %v2553_v51 = vrot.slane %v2511_v16, 4 }
 0x405   : > { %v2499_v52 = vpop.permute.xlu1 %2498  ;;  %v2496_v5 = vpop.permute.xlu0 %2495 }
 0x406   : > { %v2541_v47 = vrot.slane %v2499_v52, 4  ;;  %v2535_v56 = vrot.slane %v2496_v5, 4  ;;  %v2521_v27 = vpop.permute.xlu2 %2520 }
 0x407   : > { %v2597_v54 = vrot.slane %v2521_v27, 4 }
 0x408   : > { %v2542_v37 = vsel %vm369_vm0, %v2541_v47, %v2493_v28  ;;  %v2536_v9 = vsel %vm369_vm0, %v2535_v56, %v2489_v33 }
 0x409   : > { %v2546_v10 = vperm.slane %v2542_v37, %v9941_v58  ;;  %v2540_v39 = vperm.slane %v2536_v9, %v9941_v58 }
 0x40b   : > { %v2559_v32 = vrot.slane %v2546_v10, 4  ;;  %v2561_v7 = vrot.slane %v2540_v39, 4 }
 0x40d   : > { %v2508_v44 = vpop.permute.xlu1 %2507  ;;  %v2505_v34 = vpop.permute.xlu0 %2504  ;;  %v2560_v19 = vsel %vm369_vm0, %v2559_v32, %v2540_v39  ;;  %v2562_v52 = vsel %vm369_vm0, %v2546_v10, %v2561_v7 }
 0x40e   : > { %v2547_v24 = vrot.slane %v2508_v44, 4  ;;  %v2554_v23 = vsel %vm369_vm0, %v2553_v51, %v2505_v34  ;;  %v2566_v60 = vperm.slane %v2560_v19, %v9942_v30  ;;  %v2530_v63 = vpop.permute.xlu2 %2529  ;;  %v2570_v16 = vperm.slane %v2562_v52, %v9942_v30 }
 0x40f   : > { %v2558_v57 = vperm.slane %v2554_v23, %v9941_v58  ;;  %v2603_v41 = vrot.slane %v2530_v63, 4 }
 0x410   : > { %v2548_v49 = vsel %vm369_vm0, %v2547_v24, %v2502_v13  ;;  %v2585_v12 = vrot.slane %v2566_v60, 4  ;;  %v2589_v10 = vrot.slane %v2570_v16, 4 }
 0x411   : > { %v2552_v35 = vperm.slane %v2548_v49, %v9941_v58  ;;  %v2571_v55 = vrot.slane %v2558_v57, 4 }
 0x413   : > { %v2572_v22 = vsel %vm369_vm0, %v2571_v55, %v2552_v35  ;;  %v2573_v3 = vrot.slane %v2552_v35, 4 }
 0x414   : > { %v2578_v8 = vperm.slane %v2572_v22, %v9942_v30 }
 0x415   : > { %v2515_v61 = vpop.permute.xlu0 %2514  ;;  %v2518_v2 = vpop.permute.xlu1 %2517  ;;  %v2574_v5 = vsel %vm369_vm0, %v2558_v57, %v2573_v3 }
 0x416   : > { %v2586_v38 = vsel %vm369_vm0, %v2578_v8, %v2585_v12  ;;  %v2583_v20 = vrot.slane %v2578_v8, 4  ;;  %v2591_v36 = vrot.slane %v2518_v2, 4  ;;  %v2598_v59 = vsel %vm369_vm0, %v2597_v54, %v2515_v61 }
 0x417   : > { %2659 = vrot.lane.b32.xlu0 %v2586_v38, %s5812_s30  ;;  %v2602_v4 = vperm.slane %v2598_v59, %v9941_v58  ;;  %v2582_v32 = vperm.slane %v2574_v5, %v9942_v30 }
 0x418   : > { %v2584_v62 = vsel %vm369_vm0, %v2583_v20, %v2566_v60  ;;  %v2592_v29 = vsel %vm369_vm0, %v2591_v36, %v2490_v21 }
 0x419   : > { %2655 = vrot.lane.b32.xlu1 %v2584_v62, %s5812_s30  ;;  %v2596_v0 = vperm.slane %v2592_v29, %v9941_v58  ;;  %v2615_v11 = vrot.slane %v2602_v4, 4  ;;  %v2587_v39 = vrot.slane %v2582_v32, 4  ;;  %v2590_v51 = vsel %vm369_vm0, %v2582_v32, %v2589_v10 }
 0x41b   : > { %v2617_v1 = vrot.slane %v2596_v0, 4  ;;  %v2616_v53 = vsel %vm369_vm0, %v2615_v11, %v2596_v0  ;;  %v2588_v44 = vsel %vm369_vm0, %v2587_v39, %v2570_v16 }
 0x41c   : > { %v2622_v31 = vperm.slane %v2616_v53, %v9942_v30 }
 0x41d   : > { %v2524_v14 = vpop.permute.xlu0 %2523  ;;  %v2527_v25 = vpop.permute.xlu1 %2526  ;;  %v2618_v26 = vsel %vm369_vm0, %v2602_v4, %v2617_v1 }
 0x41e   : > { %v2604_v18 = vsel %vm369_vm0, %v2603_v41, %v2524_v14  ;;  %v2626_v45 = vperm.slane %v2618_v26, %v9942_v30  ;;  %v2641_v13 = vrot.slane %v2622_v31, 4 }
 0x41f   : > { %v2608_v43 = vperm.slane %v2604_v18, %v9941_v58 }
 0x420   : > { %v2645_v34 = vrot.slane %v2626_v45, 4 }
 0x421   : > { %v2629_v17 = vrot.slane %v2608_v43, 4 }
 0x425   : > { %v2533_v50 = vpop.permute.xlu0 %2532 }
 0x426   : > { %v2609_v46 = vrot.slane %v2533_v50, 4 }
 0x428   : > { %v2610_v6 = vsel %vm369_vm0, %v2609_v46, %v2527_v25 }
 0x429   : > { %v2614_v48 = vperm.slane %v2610_v6, %v9941_v58 }
 0x42b   : > { %v2627_v15 = vrot.slane %v2614_v48, 4  ;;  %v2630_v33 = vsel %vm369_vm0, %v2614_v48, %v2629_v17 }
 0x42c   : > { %v2638_v42 = vperm.slane %v2630_v33, %v9942_v30 }
 0x42d   : > { %v2628_v40 = vsel %vm369_vm0, %v2627_v15, %v2608_v43 }
 0x42e   : > { %v2643_v21 = vrot.slane %v2638_v42, 4  ;;  %v2634_v28 = vperm.slane %v2628_v40, %v9942_v30  ;;  %v2646_v19 = vsel %vm369_vm0, %v2638_v42, %v2645_v34 }
 0x430   : > { %v2644_v47 = vsel %vm369_vm0, %v2643_v21, %v2626_v45  ;;  %v2642_v56 = vsel %vm369_vm0, %v2634_v28, %v2641_v13  ;;  %v2639_v37 = vrot.slane %v2634_v28, 4 }
 0x431   : > { %2665 = vrot.lane.b32.xlu0 %v2644_v47, %s5812_s30  ;;  %2661 = vrot.lane.b32.xlu1 %v2642_v56, %s5812_s30 }
 0x432   : > { %v2640_v9 = vsel %vm369_vm0, %v2639_v37, %v2622_v31 }
 0x433   : > { %2657 = vrot.lane.b32.xlu2 %v2640_v9, %s5812_s30 }
 0x439   : > { %2667 = vrot.lane.b32.xlu1 %v2590_v51, %s5812_s30 }
 0x43b   : > { %2663 = vrot.lane.b32.xlu2 %v2588_v44, %s5812_s30 }
 0x443   : > { %2669 = vrot.lane.b32.xlu2 %v2646_v19, %s5812_s30 }
 0x489   : > { %v2660_v24 = vpop.permute.xlu0 %2659 }
 0x48a   : > { %2681 = vst.msk [vmem:[#allocation2 + $0x19] sm:$0xff] %vm552_vm3, %v2660_v24 }
 0x48b   : > { %v2656_v23 = vpop.permute.xlu1 %2655 }
 0x48c   : > { %2679 = vst.msk [vmem:[#allocation2 + $0x1] sm:$0xff] %vm552_vm3, %v2656_v23 }
 0x48d   : > { %v2658_v57 = vpop.permute.xlu2 %2657 }
 0x48e   : > { %2680 = vst.msk [vmem:[#allocation2 + $0x9] sm:$0xff] %vm552_vm3, %v2658_v57 }
 0x491   : > { %v7983_v36 = vld [vmem:[#allocation2 + $0x18] sm:$0xff] }
 0x492   : > { %v8049_v45 = vld [vmem:[#allocation2 + $0x19] sm:$0xff]  ;;  %v2709_v9 = vrot.slane %v7983_v36, 4 }
 0x493   : > { %v7959_v60 = vld [vmem:[#allocation2] sm:$0xff] }
 0x494   : > { %v2697_v27 = vrot.slane %v7959_v60, 4  ;;  %v8047_v40 = vld [vmem:[#allocation2 + $0x1] sm:$0xff] }
 0x495   : > { %v2664_v49 = vpop.permute.xlu2 %2663  ;;  %v7961_v35 = vld [vmem:[#allocation2 + $0x8] sm:$0xff] }
 0x496   : > { %2683 = vst.msk [vmem:[#allocation2 + $0x31] sm:$0xff] %vm552_vm3, %v2664_v49  ;;  %v5237_v55 = vpack.i.bf16 %v7961_v35, %v7959_v60  ;;  %v2753_v20 = vrot.slane %v7961_v35, 4  ;;  %v8021_v6 = vld [vmem:[#allocation2 + $0x2] sm:$0xff] }
 0x497   : > { %v8043_v33 = vld [vmem:[#allocation2 + $0x9] sm:$0xff] }
 0x498   : > { %5238 = vrot.lane.b32.xlu1 %v5237_v55, %s5814_s12  ;;  %v5277_v21 = vpack.i.bf16 %v8043_v33, %v8047_v40 }
 0x49d   : > { %v2670_v22 = vpop.permute.xlu2 %2669  ;;  %v7968_v8 = vld [vmem:[#allocation2 + $0x30] sm:$0xff] }
 0x49e   : > { %2686 = vst.msk [vmem:[#allocation2 + $0x51] sm:$0xff] %vm552_vm3, %v2670_v22  ;;  %v7973_v12 = vsel %vm369_vm0, %v7968_v8, %v2697_v27  ;;  %v8029_v7 = vld [vmem:[#allocation2 + $0x31] sm:$0xff]  ;;  %v2695_v16 = vrot.slane %v7968_v8, 4 }
 0x49f   : > { %v2706_v44 = vperm.slane %v7973_v12, %v9941_v58 }
 0x4a0   : > { %v2696_v34 = vsel %vm369_vm0, %v2695_v16, %v7959_v60 }
 0x4a1   : > { %v2733_v22 = vrot.slane %v2706_v44, 4 }
 0x4a3   : > { %v2666_v61 = vpop.permute.xlu0 %2665  ;;  %v2662_v38 = vpop.permute.xlu1 %2661 }
 0x4a4   : > { %2684 = vst.msk [vmem:[#allocation2 + $0x39] sm:$0xff] %vm552_vm3, %v2666_v61 }
 0x4a5   : > { %2682 = vst.msk [vmem:[#allocation2 + $0x21] sm:$0xff] %vm552_vm3, %v2662_v38  ;;  %v7978_v62 = vld [vmem:[#allocation2 + $0x52] sm:$0xff] }
 0x4a6   : > { %v3983_v29 = vrot.slane %v7978_v62, 4  ;;  %v8062_v5 = vld [vmem:[#allocation2 + $0x51] sm:$0xff] }
 0x4ab   : > { %v2668_v2 = vpop.permute.xlu1 %2667  ;;  %v7980_v54 = vld [vmem:[#allocation2 + $0x38] sm:$0xff] }
 0x4ac   : > { %2685 = vst.msk [vmem:[#allocation2 + $0x49] sm:$0xff] %vm552_vm3, %v2668_v2  ;;  %v7985_v59 = vld [vmem:[#allocation2 + $0x20] sm:$0xff]  ;;  %v2754_v63 = vsel %vm369_vm0, %v7980_v54, %v2753_v20  ;;  %v5247_v14 = vpack.i.bf16 %v7980_v54, %v7968_v8  ;;  %v8016_v1 = vld [vmem:[#allocation2 + $0x32] sm:$0xff]  ;;  %v2751_v51 = vrot.slane %v7980_v54, 4  ;;  %v8095_v8 = vperm.slane %v2696_v34, %v9941_v58 }
 0x4ad   : > { %v7991_v4 = vld [vmem:[#allocation2 + $0x22] sm:$0xff]  ;;  %v5242_v41 = vpack.i.bf16 %v7985_v59, %v7983_v36  ;;  %v3915_v25 = vrot.slane %v8016_v1, 4  ;;  %v8023_v17 = vld [vmem:[#allocation2 + $0x39] sm:$0xff]  ;;  %v2765_v10 = vrot.slane %v7985_v59, 4  ;;  %v2762_v24 = vperm.slane %v2754_v63, %v9941_v58 }
 0x4ae   : > { %5248 = vrot.lane.b32.xlu0 %v5247_v14, %s5814_s12  ;;  %v3985_v18 = vrot.slane %v7991_v4, 4  ;;  %v8001_v0 = vsel %vm369_vm0, %v3983_v29, %v7991_v4  ;;  %v5287_v3 = vpack.i.bf16 %v8023_v17, %v8029_v7  ;;  %v8037_v15 = vld [vmem:[#allocation2 + $0x1a] sm:$0xff]  ;;  %v5297_v13 = vpack.i.bf16 %v7991_v4, %v7978_v62  ;;  %v8123_v29 = vld [vmem:[#allocation2 + $0xa] sm:$0xff] }
 0x4af   : > { %5243 = vrot.lane.b32.xlu2 %v5242_v41, %s5814_s12  ;;  %v8027_v48 = vsel %vm369_vm0, %v3915_v25, %v8021_v6  ;;  %v8045_v42 = vld [vmem:[#allocation2 + $0x21] sm:$0xff]  ;;  %v2789_v12 = vrot.slane %v2762_v24, 4  ;;  %v2721_v54 = vrot.slane %v8095_v8, 4  ;;  %v5322_v25 = vpack.i.bf16 %v8021_v6, %v8016_v1 }
 0x4b0   : > { %v8005_v11 = vsel %vm369_vm0, %v7978_v62, %v3985_v18  ;;  %v5282_v28 = vpack.i.bf16 %v8045_v42, %v8049_v45  ;;  %v8064_v47 = vld [vmem:[#allocation2 + $0x3a] sm:$0xff]  ;;  %v5302_v37 = vpack.i.bf16 %v8045_v42, %v8062_v5  ;;  %v3319_v34 = vrot.slane %v8049_v45, 4 }
 0x4b3   : > { %v8007_v43 = vld [vmem:[#allocation2 + $0x48] sm:$0xff]  ;;  %v8009_v50 = vld [vmem:[#allocation2 + $0x50] sm:$0xff] }
 0x4b4   : > { %v5252_v46 = vpack.i.bf16 %v8009_v50, %v8007_v43  ;;  %v8019_v53 = vld [vmem:[#allocation2 + $0x4a] sm:$0xff]  ;;  %v2710_v39 = vsel %vm369_vm0, %v8007_v43, %v2709_v9  ;;  %v2766_v19 = vsel %vm369_vm0, %v8009_v50, %v2765_v10  ;;  %v2707_v57 = vrot.slane %v8007_v43, 4 }
 0x4b5   : > { %v3927_v31 = vrot.slane %v8019_v53, 4  ;;  %v8060_v52 = vld [vmem:[#allocation2 + $0x49] sm:$0xff]  ;;  %v5307_v32 = vpack.i.bf16 %v8019_v53, %v8064_v47  ;;  %v2718_v23 = vperm.slane %v2710_v39, %v9941_v58  ;;  %v2763_v49 = vrot.slane %v8009_v50, 4 }
 0x4b6   : > { %5258 = vrot.lane.b32.xlu0 %v5237_v55, %s5813_s11  ;;  %5253 = vrot.lane.b32.xlu1 %v5252_v46, %s5814_s12  ;;  %v5292_v56 = vpack.i.bf16 %v8062_v5, %v8060_v52  ;;  %v2752_v55 = vsel %vm369_vm0, %v2751_v51, %v7961_v35  ;;  %v2774_v27 = vperm.slane %v2766_v19, %v9941_v58  ;;  %v3375_v19 = vrot.slane %v8045_v42, 4 }
 0x4b7   : > { %5268 = vrot.lane.b32.xlu2 %v5247_v14, %s5813_s11  ;;  %v8041_v26 = vsel %vm369_vm0, %v3927_v31, %v8037_v15  ;;  %v2734_v60 = vsel %vm369_vm0, %v2718_v23, %v2733_v22  ;;  %v2708_v61 = vsel %vm369_vm0, %v2707_v57, %v7983_v36  ;;  %v2758_v38 = vperm.slane %v2752_v55, %v9941_v58 }
 0x4b8   : > { %v8105_v35 = vperm.slane %v2734_v60, %v9942_v30  ;;  %v2764_v20 = vsel %vm369_vm0, %v2763_v49, %v7985_v59  ;;  %v8114_v2 = vperm.slane %v2708_v61, %v9941_v58  ;;  %v5317_v50 = vpack.i.bf16 %v8037_v15, %v8123_v29 }
 0x4b9   : > { %v2770_v63 = vperm.slane %v2764_v20, %v9941_v58  ;;  %v5312_v16 = vpack.i.bf16 %v8060_v52, %v8023_v17  ;;  %v3307_v22 = vrot.slane %v8047_v40, 4  ;;  %v3363_v60 = vrot.slane %v8043_v33, 4 }
 0x4ba   : > { %v2722_v36 = vsel %vm369_vm0, %v8114_v2, %v2721_v54  ;;  %v3320_v61 = vsel %vm369_vm0, %v8060_v52, %v3319_v34  ;;  %v5327_v34 = vpack.i.bf16 %v8049_v45, %v8043_v33 }
 0x4bb   : > { %v8128_v18 = vperm.slane %v2722_v36, %v9942_v30  ;;  %v2775_v10 = vrot.slane %v2770_v63, 4  ;;  %v3308_v36 = vsel %vm369_vm0, %v8029_v7, %v3307_v22 }
 0x4bd   : > { %v2745_v39 = vrot.slane %v8128_v18, 4  ;;  %v8192_v54 = vsel %vm369_vm0, %v2775_v10, %v2758_v38  ;;  %v3317_v10 = vrot.slane %v8060_v52, 4  ;;  %v3934_v52 = vperm.slane %v8041_v26, %v9941_v58 }
 0x4be   : > { %5273 = vrot.lane.b32.xlu0 %v5252_v46, %s5813_s11  ;;  %5263 = vrot.lane.b32.xlu1 %v5242_v41, %s5813_s11  ;;  %v2777_v41 = vrot.slane %v2758_v38, 4 }
 0x4bf   : > { %5288 = vrot.lane.b32.xlu2 %v5287_v3, %s5814_s12  ;;  %v2731_v3 = vrot.slane %v2718_v23, 4  ;;  %v8171_v23 = vsel %vm369_vm0, 0.0, %v2745_v39  ;;  %v3373_v39 = vrot.slane %v8062_v5, 4 }
 0x4c0   : > { %v2778_v43 = vsel %vm369_vm0, %v2770_v63, %v2777_v41  ;;  %v3990_v63 = vperm.slane %v8001_v0, %v9941_v58  ;;  %v3376_v41 = vsel %vm369_vm0, %v8062_v5, %v3375_v19 }
 0x4c1   : > { %v8134_v46 = vperm.slane %v2778_v43, %v9942_v30 }
 0x4c3   : > { %v5337_v31 = vpack.i.bf16 %v8134_v46, %v8128_v18  ;;  %v2801_v51 = vrot.slane %v8134_v46, 4  ;;  %v3929_v46 = vrot.slane %v8037_v15, 4 }
 0x4c5   : > { %v8174_v57 = vsel %vm369_vm0, 0.0, %v2801_v51 }
 0x4c6   : > { %5278 = vrot.lane.b32.xlu0 %v5277_v21, %s5814_s12  ;;  %5283 = vrot.lane.b32.xlu1 %v5282_v28, %s5814_s12  ;;  %v2787_v21 = vrot.slane %v2774_v27, 4  ;;  %v3971_v28 = vrot.slane %v8064_v47, 4 }
 0x4c7   : > { %5298 = vrot.lane.b32.xlu2 %v5297_v13, %s5814_s12  ;;  %v2732_v13 = vsel %vm369_vm0, %v2731_v3, %v2706_v44  ;;  %v3305_v44 = vrot.slane %v8029_v7, 4 }
 0x4c8   : > { %v3972_v9 = vsel %vm369_vm0, %v3971_v28, %v8123_v29  ;;  %v2749_v28 = vrot.slane %v8105_v35, 4 }
 0x4c9   : > { %v3306_v3 = vsel %vm369_vm0, %v3305_v44, %v8047_v40 }
 0x4ca   : > { %v3312_v26 = vperm.slane %v3306_v3, %v9941_v58 }
 0x4ce   : > { %5293 = vrot.lane.b32.xlu0 %v5292_v56, %s5814_s12  ;;  %5303 = vrot.lane.b32.xlu1 %v5302_v37, %s5813_s11  ;;  %v2788_v56 = vsel %vm369_vm0, %v2787_v21, %v2762_v24  ;;  %v8148_v37 = vperm.slane %v2732_v13, %v9942_v30  ;;  %v3978_v24 = vperm.slane %v3972_v9, %v9941_v58  ;;  %v3995_v9 = vrot.slane %v3990_v63, 4 }
 0x4cf   : > { %5308 = vrot.lane.b32.xlu2 %v5307_v32, %s5814_s12  ;;  %v3328_v21 = vperm.slane %v3320_v61, %v9941_v58  ;;  %v3384_v13 = vperm.slane %v3376_v41, %v9941_v58 }
 0x4d0   : > { %v2747_v49 = vrot.slane %v8148_v37, 4  ;;  %v3997_v38 = vrot.slane %v3978_v24, 4 }
 0x4d1   : > { %v3341_v19 = vrot.slane %v3328_v21, 4 }
 0x4d2   : > { %v8186_v20 = vsel %vm369_vm0, 0.0, %v2747_v49  ;;  %v8234_v44 = vsel %vm369_vm0, %v3990_v63, %v3997_v38  ;;  %v3939_v63 = vrot.slane %v3934_v52, 4 }
 0x4d6   : > { %4325 = vrot.lane.b32.xlu0 %v7978_v62, %s5813_s11  ;;  %4321 = vrot.lane.b32.xlu1 %v8064_v47, %s5813_s11  ;;  %v2790_v62 = vsel %vm369_vm0, %v2774_v27, %v2789_v12  ;;  %v3361_v27 = vrot.slane %v8023_v17, 4  ;;  %v5372_v12 = vpack.i.bf16 %v8174_v57, %v8171_v23 }
 0x4d7   : > { %4323 = vrot.lane.b32.xlu2 %v8019_v53, %s5813_s11  ;;  %v8119_v14 = vperm.slane %v2790_v62, %v9942_v30 }
 0x4d8   : > { %v3362_v0 = vsel %vm369_vm0, %v3361_v27, %v8043_v33  ;;  %v3318_v33 = vsel %vm369_vm0, %v3317_v10, %v8049_v45  ;;  %v3374_v45 = vsel %vm369_vm0, %v3373_v39, %v8045_v42 }
 0x4d9   : > { %v5347_v59 = vpack.i.bf16 %v8119_v14, %v8105_v35  ;;  %v3368_v3 = vperm.slane %v3362_v0, %v9941_v58  ;;  %v3324_v42 = vperm.slane %v3318_v33, %v9941_v58  ;;  %v2719_v35 = vrot.slane %v8114_v2, 4 }
 0x4de   : > { %4317 = vrot.lane.b32.xlu0 %v7991_v4, %s5813_s11  ;;  %5318 = vrot.lane.b32.xlu1 %v5317_v50, %s5814_s12  ;;  %v8151_v4 = vperm.slane %v2788_v56, %v9942_v30  ;;  %v5332_v50 = vpack.i.bf16 %v8047_v40, %v8029_v7  ;;  %v3922_v56 = vperm.slane %v8027_v48, %v9941_v58  ;;  %v2805_v7 = vrot.slane %v8119_v14, 4 }
 0x4df   : > { %5323 = vrot.lane.b32.xlu2 %v5322_v25, %s5814_s12  ;;  %v3364_v25 = vsel %vm369_vm0, %v8023_v17, %v3363_v60  ;;  %v3316_v17 = vperm.slane %v3308_v36, %v9941_v58  ;;  %v3994_v40 = vperm.slane %v8005_v11, %v9941_v58  ;;  %v8226_v48 = vsel %vm369_vm0, 0.0, %v2749_v28 }
 0x4e0   : > { %v5342_v32 = vpack.i.bf16 %v8151_v4, %v8148_v37  ;;  %v2803_v55 = vrot.slane %v8151_v4, 4  ;;  %v8231_v51 = vsel %vm369_vm0, 0.0, %v2805_v7  ;;  %v3973_v11 = vrot.slane %v8123_v29, 4 }
 0x4e1   : > { %v5382_v49 = vpack.i.bf16 %v8231_v51, %v8226_v48  ;;  %v3343_v27 = vrot.slane %v3316_v17, 4  ;;  %v3941_v5 = vrot.slane %v3922_v56, 4  ;;  %v4007_v61 = vrot.slane %v3994_v40, 4 }
 0x4e2   : > { %v8189_v62 = vsel %vm369_vm0, 0.0, %v2803_v55  ;;  %v3397_v55 = vrot.slane %v3384_v13, 4  ;;  %v3974_v60 = vsel %vm369_vm0, %v8064_v47, %v3973_v11  ;;  %v3387_v7 = vrot.slane %v3368_v3, 4 }
 0x4e3   : > { %v5377_v43 = vpack.i.bf16 %v8189_v62, %v8186_v20  ;;  %v8251_v41 = vsel %vm369_vm0, %v3934_v52, %v3941_v5  ;;  %v3982_v36 = vperm.slane %v3974_v60, %v9941_v58  ;;  %v3344_v47 = vsel %vm369_vm0, %v3328_v21, %v3343_v27 }
 0x4e4   : > { %v3352_v28 = vperm.slane %v3344_v47, %v9942_v30  ;;  %v8320_v4 = vperm.slane %v8192_v54, %v9942_v30 }
 0x4e5   : > { %v8266_v38 = vsel %vm369_vm0, %v4007_v61, %v3982_v36 }
 0x4e6   : > { %5313 = vrot.lane.b32.xlu0 %v5312_v16, %s5813_s11  ;;  %4315 = vrot.lane.b32.xlu1 %v8037_v15, %s5813_s11  ;;  %v3372_v16 = vperm.slane %v3364_v25, %v9941_v58  ;;  %v3342_v25 = vsel %vm369_vm0, %v3341_v19, %v3316_v17  ;;  %v3930_v15 = vsel %vm369_vm0, %v8019_v53, %v3929_v46  ;;  %v3329_v17 = vrot.slane %v3324_v42, 4 }
 0x4e7   : > { %4319 = vrot.lane.b32.xlu2 %v8016_v1, %s5813_s11  ;;  %v3938_v39 = vperm.slane %v3930_v15, %v9941_v58  ;;  %v2720_v53 = vsel %vm369_vm0, %v2719_v35, %v8095_v8  ;;  %v2799_v33 = vrot.slane %v8320_v4, 4  ;;  %v3359_v23 = vrot.slane %v3352_v28, 4 }
 0x4e8   : > { %v3399_v22 = vrot.slane %v3372_v16, 4  ;;  %v3330_v19 = vsel %vm369_vm0, %v3329_v17, %v3312_v26  ;;  %v8316_v37 = vperm.slane %v2720_v53, %v9942_v30 }
 0x4ea   : > { %v3400_v18 = vsel %vm369_vm0, %v3384_v13, %v3399_v22  ;;  %v2743_v61 = vrot.slane %v8316_v37, 4 }
 0x4eb   : > { %v3408_v14 = vperm.slane %v3400_v18, %v9942_v30 }
 0x4ee   : > { %4313 = vrot.lane.b32.xlu0 %v8123_v29, %s5813_s11  ;;  %5333 = vrot.lane.b32.xlu1 %v5332_v50, %s5813_s11  ;;  %v8246_v29 = vsel %vm369_vm0, %v3995_v9, %v3978_v24  ;;  %v3917_v50 = vrot.slane %v8021_v6, 4  ;;  %v4009_v24 = vrot.slane %v3982_v36, 4  ;;  %v5362_v9 = vpack.i.bf16 %v3408_v14, %v3352_v28 }
 0x4ef   : > { %4311 = vrot.lane.b32.xlu2 %v8021_v6, %s5813_s11  ;;  %9943 = vst [vmem:[#allocation43_spill] sm:$0xff] %v8246_v29  ;;  %v8269_v6 = vsel %vm369_vm0, %v3939_v63, %v3922_v56  ;;  %v3380_v56 = vperm.slane %v3374_v45, %v9941_v58 }
 0x4f0   : > { %9944 = vst [vmem:[#allocation25_spill] sm:$0xff] %v8269_v6  ;;  %v3918_v21 = vsel %vm369_vm0, %v8016_v1, %v3917_v50  ;;  %v8284_v0 = vsel %vm369_vm0, %v3994_v40, %v4009_v24  ;;  %v8287_v1 = vperm.slane %v3342_v25, %v9942_v30  ;;  %v2800_v50 = vsel %vm369_vm0, 0.0, %v2799_v33 }
 0x4f1   : > { %v3926_v40 = vperm.slane %v3918_v21, %v9941_v58  ;;  %v3385_v2 = vrot.slane %v3380_v56, 4  ;;  %v3388_v11 = vsel %vm369_vm0, %v3380_v56, %v3387_v7 }
 0x4f2   : > { %v3396_v8 = vperm.slane %v3388_v11, %v9942_v30  ;;  %v3357_v62 = vrot.slane %v8287_v1, 4 }
 0x4f3   : > { %v3386_v52 = vsel %vm369_vm0, %v3385_v2, %v3368_v3 }
 0x4f4   : > { %v8330_v60 = vperm.slane %v3386_v52, %v9942_v30  ;;  %v3411_v57 = vrot.slane %v3396_v8, 4 }
 0x4f6   : > { %5328 = vrot.lane.b32.xlu0 %v5327_v34, %s5813_s11  ;;  %5338 = vrot.lane.b32.xlu1 %v5337_v31, %s5807_s20  ;;  %v3398_v31 = vsel %vm369_vm0, %v3397_v55, %v3372_v16  ;;  %v3953_v34 = vrot.slane %v3926_v40, 4  ;;  %v3409_v63 = vrot.slane %v8330_v60, 4  ;;  %v3412_v46 = vsel %vm369_vm0, 0.0, %v3411_v57 }
 0x4f7   : > { %5348 = vrot.lane.b32.xlu2 %v5347_v59, %s5805_s18  ;;  %v3331_v59 = vrot.slane %v3312_v26, 4  ;;  %v8295_v13 = vperm.slane %v3398_v31, %v9942_v30  ;;  %v2744_v26 = vsel %vm369_vm0, 0.0, %v2743_v61 }
 0x4f8   : > { %v3954_v27 = vsel %vm369_vm0, %v3938_v39, %v3953_v34  ;;  %v3410_v47 = vsel %vm369_vm0, 0.0, %v3409_v63  ;;  %v5367_v45 = vpack.i.bf16 %v2800_v50, %v2744_v26 }
 0x4f9   : > { %v5357_v16 = vpack.i.bf16 %v8295_v13, %v8287_v1  ;;  %v3332_v10 = vsel %vm369_vm0, %v3324_v42, %v3331_v59  ;;  %v8327_v22 = vperm.slane %v3954_v27, %v9942_v30  ;;  %v3360_v42 = vsel %vm369_vm0, 0.0, %v3359_v23 }
 0x4fa   : > { %v3340_v55 = vperm.slane %v3332_v10, %v9942_v30  ;;  %v3413_v28 = vrot.slane %v8295_v13, 4 }
 0x4fb   : > { %9945 = vst [vmem:[#allocation34_spill] sm:$0xff] %v8327_v22 }
 0x4fc   : > { %v5352_v5 = vpack.i.bf16 %v3396_v8, %v3340_v55  ;;  %v3355_v3 = vrot.slane %v3340_v55, 4  ;;  %v3414_v1 = vsel %vm369_vm0, 0.0, %v3413_v28 }
 0x4fe   : > { %5343 = vrot.lane.b32.xlu0 %v5342_v32, %s5806_s19  ;;  %5363 = vrot.lane.b32.xlu1 %v5362_v9, %s5805_s18  ;;  %v8324_v32 = vperm.slane %v3330_v19, %v9942_v30  ;;  %v3356_v18 = vsel %vm369_vm0, 0.0, %v3355_v3 }
 0x4ff   : > { %5358 = vrot.lane.b32.xlu2 %v5357_v16, %s5806_s19  ;;  %v5392_v31 = vpack.i.bf16 %v3412_v46, %v3356_v18 }
 0x500   : > { %v3353_v54 = vrot.slane %v8324_v32, 4 }
 0x502   : > { %v3354_v25 = vsel %vm369_vm0, 0.0, %v3353_v54 }
 0x503   : > { %v5387_v24 = vpack.i.bf16 %v3410_v47, %v3354_v25 }
 0x506   : > { %5353 = vrot.lane.b32.xlu0 %v5352_v5, %s5807_s20  ;;  %4048 = vrot.lane.b32.xlu1 %v8327_v22, %s5805_s18 }
 0x507   : > { %5373 = vrot.lane.b32.xlu2 %v5372_v12, %s5804_s28  ;;  %v3415_v12 = vrot.slane %v3408_v14, 4  ;;  %v3358_v14 = vsel %vm369_vm0, 0.0, %v3357_v62 }
 0x508   : > { %v5397_v15 = vpack.i.bf16 %v3414_v1, %v3358_v14 }
 0x509   : > { %v8343_v36 = vpop.permute.xlu2 %5243  ;;  %v3416_v56 = vsel %vm369_vm0, 0.0, %v3415_v12 }
 0x50a   : > { %v5402_v20 = vpack.i.bf16 %v3416_v56, %v3360_v42  ;;  %v5239_v48 = vpop.permute.xlu1 %5238  ;;  %v5246_v2 = vunpack.i.h.bf16 %v8343_v36  ;;  %v5245_v11 = vunpack.i.l.bf16 %v8343_v36 }
 0x50b   : > { %v5241_v7 = vunpack.i.h.bf16 %v5239_v48  ;;  %v5240_v9 = vunpack.i.l.bf16 %v5239_v48 }
 0x50c   : > { %v2979_v54 = vrot.slane %v5246_v2, 4  ;;  %v2923_v26 = vrot.slane %v5245_v11, 4 }
 0x50d   : > { %v2911_v53 = vrot.slane %v5240_v9, 4 }
 0x50e   : > { %5378 = vrot.lane.b32.xlu1 %v5377_v43, %s5802_s9  ;;  %5368 = vrot.lane.b32.xlu0 %v5367_v45, %s5808_s27  ;;  %v3951_v43 = vrot.slane %v3938_v39, 4  ;;  %v2967_v39 = vrot.slane %v5241_v7, 4 }
 0x50f   : > { %5388 = vrot.lane.b32.xlu2 %v5387_v24, %s5808_s27 }
 0x510   : > { %v3952_v59 = vsel %vm369_vm0, %v3951_v43, %v3926_v40 }
 0x511   : > { %v8355_v21 = vpop.permute.xlu2 %5268  ;;  %v8375_v17 = vperm.slane %v3952_v59, %v9942_v30 }
 0x512   : > { %v5271_v63 = vunpack.i.h.bf16 %v8355_v21  ;;  %v5270_v50 = vunpack.i.l.bf16 %v8355_v21 }
 0x513   : > { %9946 = vst [vmem:[#allocation26_spill] sm:$0xff] %v8375_v17  ;;  %v3967_v13 = vrot.slane %v8375_v17, 4 }
 0x514   : > { %v3171_v42 = vrot.slane %v5271_v63, 4  ;;  %v3115_v46 = vrot.slane %v5270_v50, 4 }
 0x515   : > { %v3968_v40 = vsel %vm369_vm0, 0.0, %v3967_v13 }
 0x516   : > { %5393 = vrot.lane.b32.xlu1 %v5392_v31, %s5804_s28  ;;  %5383 = vrot.lane.b32.xlu0 %v5382_v49, %s5803_s16 }
 0x517   : > { %5403 = vrot.lane.b32.xlu2 %v5402_v20, %s5803_s16 }
 0x519   : > { %v8369_v35 = vpop.permute.xlu2 %5288 }
 0x51e   : > { %5398 = vrot.lane.b32.xlu0 %v5397_v15, %s5802_s9 }
 0x520   : > { %v5249_v51 = vpop.permute.xlu0 %5248 }
 0x521   : > { %v8378_v49 = vpop.permute.xlu2 %5298  ;;  %v5251_v16 = vunpack.i.h.bf16 %v5249_v51  ;;  %v5250_v10 = vunpack.i.l.bf16 %v5249_v51 }
 0x523   : > { %v2965_v34 = vrot.slane %v5251_v16, 4  ;;  %v2968_v19 = vsel %vm369_vm0, %v5251_v16, %v2967_v39  ;;  %v2909_v55 = vrot.slane %v5250_v10, 4  ;;  %v2912_v27 = vsel %vm369_vm0, %v5250_v10, %v2911_v53 }
 0x524   : > { %v2976_v36 = vperm.slane %v2968_v19, %v9941_v58  ;;  %v2920_v25 = vperm.slane %v2912_v27, %v9941_v58 }
 0x525   : > { %v2966_v47 = vsel %vm369_vm0, %v2965_v34, %v5241_v7  ;;  %v2910_v45 = vsel %vm369_vm0, %v2909_v55, %v5240_v9 }
 0x526   : > { %4044 = vrot.lane.b32.xlu0 %v3968_v40, %s5802_s9  ;;  %v8398_v21 = vperm.slane %v2966_v47, %v9941_v58  ;;  %v3003_v20 = vrot.slane %v2976_v36, 4  ;;  %v8403_v62 = vperm.slane %v2910_v45, %v9941_v58  ;;  %v2947_v43 = vrot.slane %v2920_v25, 4 }
 0x528   : > { %v5259_v52 = vpop.permute.xlu0 %5258  ;;  %v5254_v8 = vpop.permute.xlu1 %5253  ;;  %v2935_v45 = vrot.slane %v8403_v62, 4 }
 0x529   : > { %v5256_v5 = vunpack.i.h.bf16 %v5254_v8  ;;  %v5255_v61 = vunpack.i.l.bf16 %v5254_v8  ;;  %v8387_v33 = vpop.permute.xlu2 %5308  ;;  %v5261_v24 = vunpack.i.h.bf16 %v5259_v52  ;;  %v5260_v23 = vunpack.i.l.bf16 %v5259_v52 }
 0x52b   : > { %v2921_v3 = vrot.slane %v5255_v61, 4  ;;  %v2977_v57 = vrot.slane %v5256_v5, 4  ;;  %v2924_v12 = vsel %vm369_vm0, %v5255_v61, %v2923_v26  ;;  %v2980_v18 = vsel %vm369_vm0, %v5256_v5, %v2979_v54 }
 0x52c   : > { %v2932_v31 = vperm.slane %v2924_v12, %v9941_v58  ;;  %v2988_v56 = vperm.slane %v2980_v18, %v9941_v58  ;;  %v3173_v1 = vrot.slane %v5261_v24, 4  ;;  %v3116_v15 = vsel %vm369_vm0, %v3115_v46, %v5260_v23 }
 0x52d   : > { %v2922_v28 = vsel %vm369_vm0, %v2921_v3, %v5245_v11  ;;  %v2978_v51 = vsel %vm369_vm0, %v2977_v57, %v5246_v2  ;;  %v3117_v7 = vrot.slane %v5260_v23, 4  ;;  %v2991_v61 = vrot.slane %v8398_v21, 4 }
 0x52e   : > { %v2945_v48 = vrot.slane %v2932_v31, 4  ;;  %v3001_v9 = vrot.slane %v2988_v56, 4  ;;  %v8411_v40 = vperm.slane %v2922_v28, %v9941_v58  ;;  %v2948_v11 = vsel %vm369_vm0, %v2932_v31, %v2947_v43 }
 0x52f   : > { %v8415_v34 = vperm.slane %v2978_v51, %v9941_v58  ;;  %v8418_v55 = vperm.slane %v2948_v11, %v9942_v30  ;;  %v3004_v2 = vsel %vm369_vm0, %v2988_v56, %v3003_v20  ;;  %v8432_v3 = vperm.slane %v3116_v15, %v9941_v58 }
 0x530   : > { %v5274_v14 = vpop.permute.xlu0 %5273  ;;  %v5264_v59 = vpop.permute.xlu1 %5263  ;;  %v8422_v8 = vperm.slane %v3004_v2, %v9942_v30  ;;  %v2946_v5 = vsel %vm369_vm0, %v2945_v48, %v2920_v25  ;;  %v3002_v47 = vsel %vm369_vm0, %v3001_v9, %v2976_v36  ;;  %v3172_v23 = vsel %vm369_vm0, %v3171_v42, %v5261_v24 }
 0x531   : > { %v8408_v13 = vpop.permute.xlu2 %4323  ;;  %v5276_v16 = vunpack.i.h.bf16 %v5274_v14  ;;  %v5275_v10 = vunpack.i.l.bf16 %v5274_v14  ;;  %v5266_v39 = vunpack.i.h.bf16 %v5264_v59  ;;  %v5265_v53 = vunpack.i.l.bf16 %v5264_v59  ;;  %9947 = vst [vmem:[#allocation24_spill] sm:$0xff] %v8418_v55 }
 0x532   : > { %9948 = vst [vmem:[#allocation21_spill] sm:$0xff] %v8422_v8  ;;  %v8427_v26 = vperm.slane %v2946_v5, %v9942_v30  ;;  %v3118_v12 = vsel %vm369_vm0, %v5270_v50, %v3117_v7  ;;  %v3174_v25 = vsel %vm369_vm0, %v5271_v63, %v3173_v1  ;;  %v5417_v18 = vpack.i.bf16 %v8422_v8, %v8418_v55 }
 0x533   : > { %v3127_v19 = vrot.slane %v5275_v10, 4  ;;  %v3183_v27 = vrot.slane %v5276_v16, 4  ;;  %v3129_v52 = vrot.slane %v5265_v53, 4  ;;  %v3185_v54 = vrot.slane %v5266_v39, 4  ;;  %9949 = vst [vmem:[#allocation22_spill] sm:$0xff] %v8432_v3 }
 0x534   : > { %v8441_v46 = vperm.slane %v3002_v47, %v9942_v30  ;;  %v2936_v42 = vsel %vm369_vm0, %v8411_v40, %v2935_v45  ;;  %v2992_v63 = vsel %vm369_vm0, %v8415_v34, %v2991_v61  ;;  %5418 = vrot.lane.b32.xlu1 %v5417_v18, %s5805_s18  ;;  %v5290_v59 = vunpack.i.l.bf16 %v8369_v35 }
 0x535   : > { %v3128_v57 = vsel %vm369_vm0, %v3127_v19, %v5265_v53  ;;  %v3184_v56 = vsel %vm369_vm0, %v3183_v27, %v5266_v39  ;;  %v3130_v24 = vsel %vm369_vm0, %v5275_v10, %v3129_v52  ;;  %v3186_v20 = vsel %vm369_vm0, %v5276_v16, %v3185_v54 }
 0x536   : > { %v8457_v43 = vperm.slane %v3128_v57, %v9941_v58  ;;  %v5412_v28 = vpack.i.bf16 %v8441_v46, %v8427_v26  ;;  %v8463_v14 = vperm.slane %v2936_v42, %v9942_v30  ;;  %v3126_v1 = vperm.slane %v3118_v12, %v9941_v58 }
 0x537   : > { %v8468_v15 = vperm.slane %v3172_v23, %v9941_v58  ;;  %v8471_v48 = vperm.slane %v2992_v63, %v9942_v30  ;;  %v3141_v51 = vrot.slane %v8432_v3, 4  ;;  %v3182_v7 = vperm.slane %v3174_v25, %v9941_v58 }
 0x538   : > { %v8443_v36 = vpop.permute.xlu0 %5278  ;;  %v8445_v31 = vpop.permute.xlu1 %5283  ;;  %9950 = vst [vmem:[#allocation23_spill] sm:$0xff] %v8457_v43  ;;  %v3138_v9 = vperm.slane %v3130_v24, %v9941_v58  ;;  %5413 = vrot.lane.b32.xlu2 %v5412_v28, %s5806_s19  ;;  %v8479_v10 = vperm.slane %v3184_v56, %v9941_v58  ;;  %v3194_v39 = vperm.slane %v3186_v20, %v9941_v58  ;;  %v5291_v11 = vunpack.i.h.bf16 %v8369_v35 }
 0x539   : > { %v8453_v50 = vpop.permute.xlu2 %5323  ;;  %9951 = vst [vmem:[#allocation37_spill] sm:$0xff] %v8468_v15  ;;  %v5280_v16 = vunpack.i.l.bf16 %v8443_v36  ;;  %v5407_v53 = vpack.i.bf16 %v8471_v48, %v8463_v14  ;;  %v5281_v19 = vunpack.i.h.bf16 %v8443_v36  ;;  %v3142_v2 = vsel %vm369_vm0, %v8457_v43, %v3141_v51 }
 0x53a   : > { %9952 = vst [vmem:[#allocation48_spill] sm:$0xff] %v8479_v10  ;;  %v3519_v27 = vrot.slane %v5290_v59, 4  ;;  %v3197_v52 = vrot.slane %v8468_v15, 4  ;;  %v3153_v5 = vrot.slane %v3126_v1, 4  ;;  %v3209_v61 = vrot.slane %v3182_v7, 4 }
 0x53b   : > { %5408 = vrot.lane.b32.xlu0 %v5407_v53, %s5807_s20  ;;  %v3151_v54 = vrot.slane %v3138_v9, 4  ;;  %v3521_v47 = vrot.slane %v5280_v16, 4  ;;  %v3207_v57 = vrot.slane %v3194_v39, 4  ;;  %v5285_v35 = vunpack.i.l.bf16 %v8445_v31 }
 0x53c   : > { %v8494_v12 = vperm.slane %v3142_v2, %v9942_v30  ;;  %v3198_v25 = vsel %vm369_vm0, %v8479_v10, %v3197_v52  ;;  %v3575_v36 = vrot.slane %v5291_v11, 4  ;;  %v3577_v56 = vrot.slane %v5281_v19, 4 }
 0x53d   : > { %v5286_v24 = vunpack.i.h.bf16 %v8445_v31  ;;  %v3520_v42 = vsel %vm369_vm0, %v3519_v27, %v5280_v16  ;;  %v8503_v63 = vperm.slane %v3198_v25, %v9942_v30  ;;  %v3154_v20 = vsel %vm369_vm0, %v3138_v9, %v3153_v5 }
 0x53e   : > { %v3210_v28 = vsel %vm369_vm0, %v3194_v39, %v3209_v61  ;;  %v3522_v51 = vsel %vm369_vm0, %v5290_v59, %v3521_v47  ;;  %v8509_v53 = vperm.slane %v3154_v20, %v9942_v30  ;;  %v3152_v52 = vsel %vm369_vm0, %v3151_v54, %v3126_v1 }
 0x53f   : > { %v8512_v2 = vperm.slane %v3210_v28, %v9942_v30  ;;  %v3533_v31 = vrot.slane %v5285_v35, 4  ;;  %v5422_v16 = vpack.i.bf16 %v8503_v63, %v8494_v12  ;;  %v8518_v27 = vperm.slane %v3152_v52, %v9942_v30 }
 0x540   : > { %v5294_v45 = vpop.permute.xlu0 %5293  ;;  %v8490_v23 = vpop.permute.xlu1 %5303  ;;  %9953 = vst [vmem:[#allocation33_spill] sm:$0xff] %v8509_v53  ;;  %v3208_v9 = vsel %vm369_vm0, %v3207_v57, %v3182_v7  ;;  %v3530_v47 = vperm.slane %v3522_v51, %v9941_v58  ;;  %v3576_v1 = vsel %vm369_vm0, %v3575_v36, %v5281_v19  ;;  %v3589_v54 = vrot.slane %v5286_v24, 4 }
 0x541   : > { %v8498_v18 = vpop.permute.xlu2 %4319  ;;  %9954 = vst [vmem:[#allocation28_spill] sm:$0xff] %v8512_v2  ;;  %v5432_v59 = vpack.i.bf16 %v8512_v2, %v8509_v53  ;;  %v8524_v39 = vperm.slane %v3208_v9, %v9942_v30  ;;  %v5296_v5 = vunpack.i.h.bf16 %v5294_v45  ;;  %v5295_v61 = vunpack.i.l.bf16 %v5294_v45  ;;  %5423 = vrot.lane.b32.xlu2 %v5422_v16, %s5807_s20 }
 0x542   : > { %v8539_v19 = vperm.slane %v3520_v42, %v9941_v58  ;;  %v3578_v16 = vsel %vm369_vm0, %v5291_v11, %v3577_v56  ;;  %v9957_v11 = vunpack.i.l.bf16 %v8453_v50  ;;  %v5306_v2 = vunpack.i.h.bf16 %v8490_v23 }
 0x543   : > { %5433 = vrot.lane.b32.xlu0 %v5432_v59, %s5805_s18  ;;  %v5427_v7 = vpack.i.bf16 %v8524_v39, %v8518_v27  ;;  %v3587_v57 = vrot.slane %v5296_v5, 4  ;;  %v3531_v20 = vrot.slane %v5295_v61, 4  ;;  %v3534_v28 = vsel %vm369_vm0, %v5295_v61, %v3533_v31 }
 0x544   : > { %9955 = vst [vmem:[#allocation40_spill] sm:$0xff] %v8539_v19  ;;  %v3542_v36 = vperm.slane %v3534_v28, %v9941_v58  ;;  %v3590_v51 = vsel %vm369_vm0, %v5296_v5, %v3589_v54  ;;  %v8551_v61 = vperm.slane %v3576_v1, %v9941_v58  ;;  %v5301_v28 = vunpack.i.h.bf16 %v8378_v49 }
 0x545   : > { %5428 = vrot.lane.b32.xlu1 %v5427_v7, %s5806_s19  ;;  %v3532_v9 = vsel %vm369_vm0, %v3531_v20, %v5285_v35  ;;  %v3588_v59 = vsel %vm369_vm0, %v3587_v57, %v5286_v24  ;;  %v8548_v31 = vperm.slane %v3590_v51, %v9941_v58  ;;  %v3557_v5 = vrot.slane %v3530_v47, 4 }
 0x546   : > { %9956 = vst [vmem:[#allocation35_spill] sm:$0xff] %v8551_v61  ;;  %v3555_v42 = vrot.slane %v3542_v36, 4  ;;  %v4129_v56 = vrot.slane %v9957_v11, 4  ;;  %v5300_v35 = vunpack.i.l.bf16 %v8378_v49  ;;  %v8561_v24 = vperm.slane %v3578_v16, %v9941_v58 }
 0x547   : > { %v3611_v54 = vrot.slane %v8548_v31, 4  ;;  %v8564_v7 = vperm.slane %v3532_v9, %v9941_v58  ;;  %v8567_v1 = vperm.slane %v3588_v59, %v9941_v58  ;;  %v3545_v20 = vrot.slane %v8539_v19, 4 }
 0x548   : > { %v8534_v52 = vpop.permute.xlu0 %4325  ;;  %v8536_v45 = vpop.permute.xlu1 %4321  ;;  %v5326_v51 = vunpack.i.h.bf16 %v8453_v50  ;;  %v3558_v11 = vsel %vm369_vm0, %v3542_v36, %v3557_v5  ;;  %v3601_v22 = vrot.slane %v8551_v61, 4  ;;  %v3556_v16 = vsel %vm369_vm0, %v3555_v42, %v3530_v47 }
 0x549   : > { %v8553_v25 = vpop.permute.xlu2 %4311  ;;  %9958 = vst [vmem:[#allocation38_spill] sm:$0xff] %v8564_v7  ;;  %v8575_v49 = vperm.slane %v3558_v11, %v9942_v30  ;;  %v3612_v9 = vsel %vm369_vm0, %v3611_v54, %v8561_v24  ;;  %v4199_v59 = vrot.slane %v5301_v28, 4  ;;  %v8582_v57 = vperm.slane %v3556_v16, %v9942_v30 }
 0x54a   : > { %9959 = vst [vmem:[#allocation29_spill] sm:$0xff] %v8567_v1  ;;  %v4130_v6 = vsel %vm369_vm0, %v4129_v56, %v5326_v51  ;;  %v8585_v19 = vperm.slane %v3612_v9, %v9942_v30  ;;  %v3546_v47 = vsel %vm369_vm0, %v8564_v7, %v3545_v20  ;;  %v3602_v42 = vsel %vm369_vm0, %v8567_v1, %v3601_v22 }
 0x54b   : > { %9960 = vst [vmem:[#allocation30_spill] sm:$0xff] %v8575_v49  ;;  %3652 = vrot.lane.b32.xlu0 %v8575_v49, %s5805_s18  ;;  %v4197_v56 = vrot.slane %v5300_v35, 4  ;;  %v8600_v11 = vperm.slane %v3546_v47, %v9942_v30  ;;  %v8603_v16 = vperm.slane %v3602_v42, %v9942_v30  ;;  %v9963_v9 = vunpack.i.h.bf16 %v8387_v33 }
 0x54c   : > { %9961 = vst [vmem:[#allocation42_spill] sm:$0xff] %v8582_v57  ;;  %v5442_v54 = vpack.i.bf16 %v8585_v19, %v8582_v57  ;;  %v8608_v49 = vperm.slane %v4130_v6, %v9941_v58  ;;  %v4200_v22 = vsel %vm369_vm0, %v5300_v35, %v4199_v59  ;;  %v4131_v59 = vrot.slane %v5326_v51, 4 }
 0x54d   : > { %9962 = vst [vmem:[#allocation41_spill] sm:$0xff] %v8585_v19  ;;  %v4141_v61 = vrot.slane %v9963_v9, 4  ;;  %v5437_v19 = vpack.i.bf16 %v8603_v16, %v8600_v11  ;;  %v4198_v9 = vsel %vm369_vm0, %v4197_v56, %v5301_v28  ;;  %v8626_v35 = vperm.slane %v4200_v22, %v9941_v58 }
 0x54e   : > { %5443 = vrot.lane.b32.xlu1 %v5442_v54, %s5806_s19  ;;  %v4155_v54 = vrot.slane %v8608_v49, 4  ;;  %v5305_v57 = vunpack.i.l.bf16 %v8490_v23  ;;  %v5310_v28 = vunpack.i.l.bf16 %v8387_v33  ;;  %v8640_v22 = vperm.slane %v4198_v9, %v9941_v58 }
 0x54f   : > { %5438 = vrot.lane.b32.xlu2 %v5437_v19, %s5807_s20  ;;  %v4403_v19 = vrot.slane %v8534_v52, 4  ;;  %v8644_v51 = vperm.slane %v8234_v44, %v9942_v30  ;;  %v8648_v23 = vperm.slane %v8251_v41, %v9942_v30  ;;  %v2933_v9 = vrot.slane %v8411_v40, 4 }
 0x550   : > { %v8587_v36 = vpop.permute.xlu0 %4317  ;;  %v8589_v5 = vpop.permute.xlu1 %5318  ;;  %v3793_v29 = vrot.slane %v5305_v57, 4  ;;  %v2989_v1 = vrot.slane %v8415_v34, 4  ;;  %v3795_v44 = vrot.slane %v5306_v2, 4  ;;  %v4185_v41 = vrot.slane %v5310_v28, 4 }
 0x551   : > { %v9744_v20 = vunpack.i.h.bf16 %v8589_v5  ;;  %v8618_v42 = vpop.permute.xlu2 %5348  ;;  %9965 = vst [vmem:[#allocation31_spill] sm:$0xff] %v8644_v51  ;;  %v5320_v40 = vunpack.i.l.bf16 %v8589_v5  ;;  %v4391_v8 = vrot.slane %v8536_v45, 4  ;;  %v3017_v15 = vrot.slane %v8441_v46, 4 }
 0x552   : > { %9964 = vst [vmem:[#allocation32_spill] sm:$0xff] %v8618_v42  ;;  %v9966_v42 = vunpack.i.l.bf16 %v8453_v50  ;;  %v4405_v50 = vrot.slane %v8587_v36, 4 }
 0x553   : > { %v4142_v47 = vsel %vm369_vm0, %v4141_v61, %v9744_v20 }
 0x554   : > { %v8623_v6 = vperm.slane %v4142_v47, %v9941_v58  ;;  %v4132_v53 = vsel %vm369_vm0, %v9966_v42, %v4131_v59 }
 0x555   : > { %v8665_v42 = vperm.slane %v4132_v53, %v9941_v58  ;;  %v3796_v53 = vsel %vm369_vm0, %v5305_v57, %v3795_v44 }
 0x556   : > { %v4156_v56 = vsel %vm369_vm0, %v8623_v6, %v4155_v54  ;;  %v4404_v54 = vsel %vm369_vm0, %v4403_v19, %v8587_v36  ;;  %v3794_v19 = vsel %vm369_vm0, %v3793_v29, %v5306_v2  ;;  %v2961_v36 = vrot.slane %v8427_v26, 4 }
 0x557   : > { %v8659_v7 = vperm.slane %v4156_v56, %v9942_v30  ;;  %v4410_v59 = vperm.slane %v4404_v54, %v9941_v58  ;;  %v4335_v56 = vrot.slane %v8498_v18, 4  ;;  %v8684_v29 = vsel %vm369_vm0, %v2933_v9, %v8403_v62 }
 0x558   : > { %v8631_v61 = vpop.permute.xlu0 %5313  ;;  %v8633_v20 = vpop.permute.xlu1 %4315  ;;  %v8688_v2 = vsel %vm369_vm0, %v2989_v1, %v8398_v21  ;;  %v4406_v26 = vsel %vm369_vm0, %v8534_v52, %v4405_v50  ;;  %v8697_v62 = vsel %vm369_vm0, 0.0, %v2961_v36  ;;  %v4187_v9 = vrot.slane %v5320_v40, 4 }
 0x559   : > { %9967 = vst [vmem:[#allocation45_spill] sm:$0xff] %v8659_v7  ;;  %v5452_v34 = vpack.i.bf16 %v8659_v7, %v8644_v51  ;;  %v8674_v55 = vpop.permute.xlu2 %5358  ;;  %v4415_v51 = vrot.slane %v4410_v59, 4  ;;  %v4186_v7 = vsel %vm369_vm0, %v4185_v41, %v5320_v40  ;;  %v8703_v52 = vsel %vm369_vm0, 0.0, %v3017_v15 }
 0x55a   : > { %9968 = vst [vmem:[#allocation36_spill] sm:$0xff] %v8688_v2  ;;  %v8712_v36 = vperm.slane %v3794_v19, %v9941_v58  ;;  %v4336_v40 = vsel %vm369_vm0, %v4335_v56, %v8553_v25  ;;  %v4337_v19 = vrot.slane %v8553_v25, 4  ;;  %v4188_v21 = vsel %vm369_vm0, %v5310_v28, %v4187_v9 }
 0x55b   : > { %5453 = vrot.lane.b32.xlu0 %v5452_v34, %s5807_s20  ;;  %9969 = vst [vmem:[#allocation44_spill] sm:$0xff] %v8697_v62  ;;  %v8730_v56 = vperm.slane %v4186_v7, %v9941_v58  ;;  %v4196_v17 = vperm.slane %v4188_v21, %v9941_v58 }
 0x55c   : > { %9970 = vst [vmem:[#allocation46_spill] sm:$0xff] %v8703_v52  ;;  %v4338_v21 = vsel %vm369_vm0, %v8498_v18, %v4337_v19 }
 0x55d   : > { %9972 = vst [vmem:[#allocation47_spill] sm:$0xff] %v8730_v56  ;;  %v4211_v43 = vrot.slane %v8730_v56, 4 }
 0x55f   : > { %v4212_v19 = vsel %vm369_vm0, %v8640_v22, %v4211_v43 }
 0x560   : > { %v4314_v54 = vpop.permute.xlu0 %4313  ;;  %v8679_v47 = vpop.permute.xlu1 %5333 }
 0x561   : > { %v4392_v57 = vsel %vm369_vm0, %v4391_v8, %v4314_v54  ;;  %v4393_v44 = vrot.slane %v4314_v54, 4  ;;  %v9754_v34 = vunpack.i.l.bf16 %v8679_v47  ;;  %v5336_v41 = vunpack.i.h.bf16 %v8679_v47  ;;  %v8749_v9 = vpop.permute.xlu2 %5373 }
 0x562   : > { %v4398_v46 = vperm.slane %v4392_v57, %v9941_v58  ;;  %v5315_v57 = vunpack.i.l.bf16 %v8631_v61 }
 0x563   : > { %v3725_v1 = vrot.slane %v9754_v34, 4  ;;  %v4394_v15 = vsel %vm369_vm0, %v8536_v45, %v4393_v44  ;;  %v8736_v45 = vperm.slane %v4336_v40, %v9941_v58  ;;  %v4349_v44 = vrot.slane %v8633_v20, 4 }
 0x564   : > { %v8706_v8 = vsel %vm369_vm0, %v4415_v51, %v4398_v46  ;;  %v4417_v50 = vrot.slane %v4398_v46, 4  ;;  %v8720_v51 = vperm.slane %v3796_v53, %v9941_v58  ;;  %v8723_v46 = vperm.slane %v4406_v26, %v9941_v58 }
 0x565   : > { %9971 = vst [vmem:[#allocation39_spill] sm:$0xff] %v8706_v8  ;;  %v3726_v34 = vsel %vm369_vm0, %v3725_v1, %v5336_v41  ;;  %v9974_v53 = vunpack.i.h.bf16 %v8631_v61  ;;  %v3781_v28 = vrot.slane %v5315_v57, 4 }
 0x566   : > { %v4418_v54 = vsel %vm369_vm0, %v4410_v59, %v4417_v50  ;;  %v8742_v59 = vperm.slane %v4394_v15, %v9941_v58  ;;  %v8747_v7 = vperm.slane %v3726_v34, %v9941_v58  ;;  %v3817_v40 = vrot.slane %v8720_v51, 4 }
 0x567   : > { %v8733_v8 = vperm.slane %v4418_v54, %v9942_v30  ;;  %v3737_v26 = vrot.slane %v9974_v53, 4  ;;  %v4427_v53 = vrot.slane %v8723_v46, 4  ;;  %v9975_v15 = vunpack.i.h.bf16 %v8589_v5 }
 0x568   : > { %v5329_v25 = vpop.permute.xlu0 %5328  ;;  %v8744_v1 = vpop.permute.xlu1 %5338 }
 0x569   : > { %9973 = vst [vmem:[#allocation27_spill] sm:$0xff] %v8733_v8  ;;  %v5331_v50 = vunpack.i.h.bf16 %v5329_v25  ;;  %v5330_v54 = vunpack.i.l.bf16 %v5329_v25  ;;  %4480 = vrot.lane.b32.xlu2 %v8733_v8, %s5807_s20  ;;  %v4143_v3 = vrot.slane %v9975_v15, 4  ;;  %v4350_v25 = vsel %vm369_vm0, %v8408_v13, %v4349_v44 }
 0x56a   : > { %v4428_v5 = vsel %vm369_vm0, %v4427_v53, %v8742_v59  ;;  %v3727_v15 = vrot.slane %v5336_v41, 4  ;;  %v8784_v52 = vperm.slane %v4350_v25, %v9941_v58  ;;  %v8802_v25 = vperm.slane %v4338_v21, %v9941_v58 }
 0x56b   : > { %v3738_v34 = vsel %vm369_vm0, %v3737_v26, %v5331_v50  ;;  %v3782_v10 = vsel %vm369_vm0, %v3781_v28, %v5330_v54  ;;  %v3783_v2 = vrot.slane %v5330_v54, 4  ;;  %v3751_v26 = vrot.slane %v8747_v7, 4 }
 0x56c   : > { %v8764_v8 = vperm.slane %v3738_v34, %v9941_v58  ;;  %v8767_v62 = vperm.slane %v3782_v10, %v9941_v58  ;;  %v9976_v54 = vunpack.i.h.bf16 %v8387_v33  ;;  %v4223_v34 = vrot.slane %v4196_v17, 4 }
 0x56d   : > { %v3784_v28 = vsel %vm369_vm0, %v5315_v57, %v3783_v2  ;;  %v9977_v10 = vrot.slane %v8408_v13, 4  ;;  %v8788_v41 = vperm.slane %v4428_v5, %v9942_v30 }
 0x56e   : > { %v4144_v44 = vsel %vm369_vm0, %v9976_v54, %v4143_v3  ;;  %v3792_v53 = vperm.slane %v3784_v28, %v9941_v58  ;;  %v3807_v18 = vrot.slane %v8767_v62, 4  ;;  %v3752_v33 = vsel %vm369_vm0, %v8764_v8, %v3751_v26 }
 0x56f   : > { %v4348_v56 = vsel %vm369_vm0, %v9977_v10, %v8633_v20  ;;  %v3739_v3 = vrot.slane %v5331_v50, 4  ;;  %v8797_v20 = vperm.slane %v3752_v33, %v9942_v30  ;;  %v8805_v5 = vperm.slane %v4144_v44, %v9941_v58 }
 0x570   : > { %v3819_v2 = vrot.slane %v3792_v53, 4  ;;  %v8792_v57 = vpop.permute.xlu0 %5343  ;;  %v8794_v13 = vpop.permute.xlu1 %5363  ;;  %v8808_v26 = vperm.slane %v4348_v56, %v9941_v58  ;;  %v9978_v50 = vunpack.i.l.bf16 %v8679_v47  ;;  %v4429_v54 = vrot.slane %v8742_v59, 4 }
 0x571   : > { %4488 = vrot.lane.b32.xlu2 %v8788_v41, %s5806_s19  ;;  %v5462_v43 = vpack.i.bf16 %v8648_v23, %v8797_v20  ;;  %v3808_v21 = vsel %vm369_vm0, %v8712_v36, %v3807_v18  ;;  %v4224_v44 = vsel %vm369_vm0, %v8626_v35, %v4223_v34  ;;  %v5389_v56 = vpop.permute.xlu2 %5388  ;;  %v8826_v47 = vperm.slane %v4212_v19, %v9942_v30 }
 0x572   : > { %v3728_v28 = vsel %vm369_vm0, %v9978_v50, %v3727_v15  ;;  %v8823_v10 = vperm.slane %v3808_v21, %v9942_v30  ;;  %v3820_v15 = vsel %vm369_vm0, %v8720_v51, %v3819_v2  ;;  %v9979_v59 = vrot.slane %v8626_v35, 4 }
 0x573   : > { %v4371_v50 = vrot.slane %v8784_v52, 4  ;;  %v8835_v18 = vperm.slane %v3728_v28, %v9941_v58  ;;  %v9980_v34 = vunpack.i.h.bf16 %v8631_v61  ;;  %5463 = vrot.lane.b32.xlu0 %v5462_v43, %s5807_s20  ;;  %v8842_v19 = vperm.slane %v3820_v15, %v9942_v30 }
 0x574   : > { %v4222_v33 = vsel %vm369_vm0, %v9979_v59, %v4196_v17  ;;  %v5447_v51 = vpack.i.bf16 %v8823_v10, %v8826_v47  ;;  %v8847_v35 = vperm.slane %v4224_v44, %v9942_v30  ;;  %v3165_v17 = vrot.slane %v8494_v12, 4 }
 0x575   : > { %v3740_v21 = vsel %vm369_vm0, %v9980_v34, %v3739_v3  ;;  %v3221_v2 = vrot.slane %v8503_v63, 4  ;;  %v5391_v28 = vunpack.i.h.bf16 %v5389_v56  ;;  %v5390_v59 = vunpack.i.l.bf16 %v5389_v56 }
 0x576   : > { %v4430_v61 = vsel %vm369_vm0, %v8723_v46, %v4429_v54  ;;  %v3818_v3 = vsel %vm369_vm0, %v3817_v40, %v3792_v53  ;;  %v8855_v43 = vperm.slane %v3740_v21, %v9941_v58  ;;  %5448 = vrot.lane.b32.xlu1 %v5447_v51, %s5807_s20  ;;  %v5472_v44 = vpack.i.bf16 %v8842_v19, %v8847_v35 }
 0x577   : > { %v8861_v15 = vsel %vm369_vm0, 0.0, %v3165_v17  ;;  %v8864_v12 = vsel %vm369_vm0, 0.0, %v3221_v2  ;;  %v3763_v63 = vrot.slane %v8835_v18, 4  ;;  %v8870_v40 = vperm.slane %v4222_v33, %v9942_v30 }
 0x578   : > { %v5354_v56 = vpop.permute.xlu0 %5353  ;;  %v8867_v46 = vpop.permute.xlu1 %4048  ;;  %v2959_v53 = vrot.slane %v8463_v14, 4  ;;  %v8877_v21 = vperm.slane %v3818_v3, %v9942_v30  ;;  %v3569_v51 = vrot.slane %v8600_v11, 4  ;;  %v3480_v17 = vsel %vm737_vm4, %v8330_v60, %v5391_v28 }
 0x579   : > { %9981 = vst [vmem:[#allocation19_spill] sm:$0xff] %v8867_v46  ;;  %v5356_v54 = vunpack.i.h.bf16 %v5354_v56  ;;  %v5355_v34 = vunpack.i.l.bf16 %v5354_v56  ;;  %5473 = vrot.lane.b32.xlu2 %v5472_v44, %s5805_s18  ;;  %v3473_v33 = vsel %vm737_vm4, %v8324_v32, %v5390_v59  ;;  %v8885_v2 = vperm.slane %v4430_v61, %v9942_v30 }
 0x57a   : > { %v3625_v14 = vrot.slane %v8603_v16, 4  ;;  %v3764_v11 = vsel %vm369_vm0, %v8855_v43, %v3763_v63  ;;  %v8897_v3 = vsel %vm369_vm0, 0.0, %v3569_v51  ;;  %v4372_v32 = vsel %vm369_vm0, %v4371_v50, %v8802_v25 }
 0x57b   : > { %v8889_v56 = vsel %vm739_vm5, %v3473_v33, %v5355_v34  ;;  %v8892_v44 = vsel %vm739_vm5, %v3480_v17, %v5356_v54  ;;  %4496 = vrot.lane.b32.xlu0 %v8885_v2, %s5805_s18  ;;  %v8907_v16 = vsel %vm369_vm0, 0.0, %v2959_v53  ;;  %v3015_v28 = vrot.slane %v8471_v48, 4 }
 0x57c   : > { %v8904_v60 = vsel %vm369_vm0, 0.0, %v3625_v14  ;;  %v5457_v59 = vpack.i.bf16 %v8877_v21, %v8870_v40  ;;  %v9982_v61 = vrot.slane %v8561_v24, 4  ;;  %v4167_v50 = vrot.slane %v8665_v42, 4 }
 0x57d   : > { %v4361_v34 = vrot.slane %v8736_v45, 4  ;;  %v8921_v53 = vperm.slane %v3764_v11, %v9942_v30  ;;  %v8924_v48 = vsel %vm369_vm0, 0.0, %v3015_v28  ;;  %v4153_v51 = vrot.slane %v8623_v6, 4 }
 0x57e   : > { %v3614_v63 = vsel %vm369_vm0, %v8548_v31, %v9982_v61  ;;  %5458 = vrot.lane.b32.xlu1 %v5457_v59, %s5806_s19  ;;  %v8929_v24 = vperm.slane %v4372_v32, %v9942_v30  ;;  %v3167_v17 = vrot.slane %v8518_v27, 4  ;;  %v4165_v33 = vrot.slane %v8805_v5, 4 }
 0x57f   : > { %v4362_v14 = vsel %vm369_vm0, %v8808_v26, %v4361_v34  ;;  %v8940_v6 = vperm.slane %v3614_v63, %v9942_v30  ;;  %v4168_v32 = vsel %vm369_vm0, %v8805_v5, %v4167_v50  ;;  %v5376_v59 = vunpack.i.h.bf16 %v8749_v9 }
 0x580   : > { %v8937_v11 = vpop.permute.xlu1 %5378  ;;  %v5369_v28 = vpop.permute.xlu0 %5368  ;;  %v3223_v27 = vrot.slane %v8524_v39, 4  ;;  %v5375_v34 = vunpack.i.l.bf16 %v8749_v9  ;;  %v5341_v54 = vunpack.i.h.bf16 %v8744_v1  ;;  %v5340_v58 = vunpack.i.l.bf16 %v8744_v1 }
 0x581   : > { %v5371_v61 = vunpack.i.h.bf16 %v5369_v28  ;;  %v5370_v31 = vunpack.i.l.bf16 %v5369_v28  ;;  %4460 = vrot.lane.b32.xlu2 %v8929_v24, %s5806_s19  ;;  %v5487_v63 = vpack.i.bf16 %v8921_v53, %v8940_v6  ;;  %v8958_v28 = vperm.slane %v4168_v32, %v9942_v30 }
 0x582   : > { %v8961_v39 = vsel %vm369_vm0, 0.0, %v3167_v17  ;;  %v8967_v1 = vperm.slane %v4362_v14, %v9942_v30  ;;  %v8980_v17 = vsel %vm369_vm0, 0.0, %v3223_v27  ;;  %v3761_v27 = vrot.slane %v8855_v43, 4 }
 0x583   : > { %v2870_v5 = vsel %vm737_vm4, %v8320_v4, %v5371_v61  ;;  %v2863_v50 = vsel %vm737_vm4, %v8316_v37, %v5370_v31  ;;  %5488 = vrot.lane.b32.xlu0 %v5487_v63, %s5805_s18  ;;  %v8971_v4 = vperm.slane %v8284_v0, %v9942_v30  ;;  %v5522_v0 = vpack.i.bf16 %v8980_v17, %v8961_v39 }
 0x584   : > { %v2871_v9 = vsel %vm739_vm5, %v2870_v5, %v5341_v54  ;;  %v2864_v46 = vsel %vm739_vm5, %v2863_v50, %v5340_v58  ;;  %v8984_v58 = vsel %vm369_vm0, %v4153_v51, %v8608_v49  ;;  %v4166_v54 = vsel %vm369_vm0, %v4165_v33, %v8665_v42 }
 0x585   : > { %v8974_v37 = vsel %vm741_vm6, %v2864_v46, %v5375_v34  ;;  %v8977_v31 = vsel %vm741_vm6, %v2871_v9, %v5376_v59  ;;  %v5482_v46 = vpack.i.bf16 %v8958_v28, %v8971_v4  ;;  %v8998_v49 = vperm.slane %v4166_v54, %v9942_v30  ;;  %v9984_v9 = vld [vmem:[#allocation44_spill] sm:$0xff] }
 0x586   : > { %4452 = vrot.lane.b32.xlu1 %v8967_v1, %s5807_s20  ;;  %v4373_v42 = vrot.slane %v8802_v25, 4  ;;  %v5361_v51 = vunpack.i.h.bf16 %v8674_v55  ;;  %v5360_v33 = vunpack.i.l.bf16 %v8674_v55  ;;  %v9010_v5 = vperm.slane %v8266_v38, %v9942_v30  ;;  %v9983_v25 = vld [vmem:[#allocation46_spill] sm:$0xff]  ;;  %v9986_v54 = vld [vmem:[#allocation36_spill] sm:$0xff] }
 0x587   : > { %v9014_v50 = vperm.slane %v8684_v29, %v9942_v30  ;;  %v9985_v55 = vpack.i.bf16 %v9983_v25, %v9984_v9  ;;  %v9026_v38 = vperm.slane %v9986_v54, %v9942_v30  ;;  %v3805_v25 = vrot.slane %v8712_v36, 4 }
 0x588   : > { %v5394_v14 = vpop.permute.xlu1 %5393  ;;  %v8994_v32 = vpop.permute.xlu0 %5383  ;;  %v5467_v29 = vpack.i.bf16 %v8998_v49, %v9010_v5 }
 0x589   : > { %v5396_v59 = vunpack.i.h.bf16 %v5394_v14  ;;  %v5395_v61 = vunpack.i.l.bf16 %v5394_v14  ;;  %5483 = vrot.lane.b32.xlu2 %v5482_v46, %s5805_s18  ;;  %v3762_v46 = vsel %vm369_vm0, %v3761_v27, %v8835_v18  ;;  %v9988_v27 = vld [vmem:[#allocation23_spill] sm:$0xff]  ;;  %v3806_v54 = vsel %vm369_vm0, %v3805_v25, %v8767_v62 }
 0x58b   : > { %v3475_v34 = vsel %vm741_vm6, %v8889_v56, %v5395_v61  ;;  %v3482_v63 = vsel %vm741_vm6, %v8892_v44, %v5396_v59  ;;  %5503 = vrot.lane.b32.xlu0 %v9985_v55, %s5802_s9  ;;  %v4374_v44 = vsel %vm369_vm0, %v8784_v52, %v4373_v42  ;;  %v2957_v61 = vrot.slane %v9014_v50, 4 }
 0x58c   : > { %v3476_v43 = vsel %vm743_vm7, %v3475_v34, %v5360_v33  ;;  %v3483_v56 = vsel %vm743_vm7, %v3482_v63, %v5361_v51  ;;  %v9034_v14 = vperm.slane %v4374_v44, %v9942_v30  ;;  %v3013_v52 = vrot.slane %v9026_v38, 4  ;;  %v9987_v34 = vld [vmem:[#allocation48_spill] sm:$0xff] }
 0x58d   : > { %v9041_v33 = vperm.slane %v3762_v46, %v9942_v30  ;;  %v3195_v18 = vrot.slane %v9987_v34, 4  ;;  %v3139_v63 = vrot.slane %v9988_v27, 4  ;;  %v4209_v44 = vrot.slane %v8640_v22, 4  ;;  %v9993_v34 = vld [vmem:[#allocation37_spill] sm:$0xff] }
 0x58e   : > { %5468 = vrot.lane.b32.xlu1 %v5467_v29, %s5806_s19  ;;  %v9989_v29 = vpack.i.bf16 %v8864_v12, %v8861_v15  ;;  %v2958_v46 = vsel %vm369_vm0, 0.0, %v2957_v61  ;;  %v3014_v36 = vsel %vm369_vm0, 0.0, %v3013_v52  ;;  %v9071_v12 = vperm.slane %v3806_v54, %v9942_v30  ;;  %v9994_v61 = vld [vmem:[#allocation24_spill] sm:$0xff]  ;;  %v9995_v27 = vld [vmem:[#allocation21_spill] sm:$0xff] }
 0x58f   : > { %v3196_v62 = vsel %vm369_vm0, %v3195_v18, %v9993_v34  ;;  %v5492_v15 = vpack.i.bf16 %v3014_v36, %v2958_v46  ;;  %v2963_v52 = vrot.slane %v9994_v61, 4  ;;  %v3019_v25 = vrot.slane %v9995_v27, 4 }
 0x590   : > { %v5399_v59 = vpop.permute.xlu0 %5398  ;;  %v9084_v18 = vperm.slane %v3196_v62, %v9942_v30  ;;  %v3829_v54 = vrot.slane %v9071_v12, 4  ;;  %v9996_v46 = vpack.i.bf16 %v8904_v60, %v8897_v3  ;;  %v9997_v3 = vpack.i.bf16 %v8924_v48, %v8907_v16  ;;  %v9118_v48 = vpop.permute.xlu2 %5403 }
 0x591   : > { %v5401_v42 = vunpack.i.h.bf16 %v5399_v59  ;;  %v5400_v51 = vunpack.i.l.bf16 %v5399_v59  ;;  %4468 = vrot.lane.b32.xlu2 %v9034_v14, %s5805_s18  ;;  %v3020_v36 = vsel %vm369_vm0, 0.0, %v3019_v25  ;;  %v9108_v34 = vperm.slane %v8984_v58, %v9942_v30 }
 0x592   : > { %v3629_v62 = vrot.slane %v8940_v6, 4  ;;  %v3831_v16 = vrot.slane %v8823_v10, 4  ;;  %v4239_v10 = vrot.slane %v8847_v35, 4 }
 0x593   : > { %v9047_v9 = vsel %vm745_vm8, %v3476_v43, %v5400_v51  ;;  %v9050_v55 = vsel %vm745_vm8, %v3483_v56, %v5401_v42  ;;  %5518 = vrot.lane.b32.xlu0 %v9989_v29, %s5804_s28  ;;  %v9990_v43 = vld [vmem:[#allocation26_spill] sm:$0xff]  ;;  %v9991_v51 = vld [vmem:[#allocation47_spill] sm:$0xff]  ;;  %v3749_v29 = vrot.slane %v8764_v8, 4  ;;  %v2964_v8 = vsel %vm369_vm0, 0.0, %v2963_v52 }
 0x594   : > { %v5477_v59 = vpack.i.bf16 %v9990_v43, %v9041_v33  ;;  %v4210_v56 = vsel %vm369_vm0, %v4209_v44, %v9991_v51  ;;  %v9992_v42 = vld [vmem:[#allocation22_spill] sm:$0xff]  ;;  %v3219_v51 = vrot.slane %v9084_v18, 4  ;;  %v5507_v60 = vpack.i.bf16 %v3020_v36, %v2964_v8 }
 0x595   : > { %v3140_v22 = vsel %vm369_vm0, %v3139_v63, %v9992_v42  ;;  %v9078_v44 = vperm.slane %v4210_v56, %v9942_v30  ;;  %v9098_v56 = vsel %vm369_vm0, %v3749_v29, %v8747_v7  ;;  %v4235_v42 = vrot.slane %v8826_v47, 4  ;;  %v9999_v7 = vld [vmem:[#allocation29_spill] sm:$0xff]  ;;  %v10000_v47 = vld [vmem:[#allocation43_spill] sm:$0xff] }
 0x596   : > { %5478 = vrot.lane.b32.xlu1 %v5477_v59, %s5806_s19  ;;  %v9081_v63 = vperm.slane %v3140_v22, %v9942_v30  ;;  %v3830_v22 = vsel %vm369_vm0, 0.0, %v3829_v54  ;;  %v3599_v52 = vrot.slane %v9999_v7, 4  ;;  %v9115_v27 = vperm.slane %v10000_v47, %v9942_v30  ;;  %s314_s19 = scalar_lea.vmem [#allocation12], %s4743_s15  ;;  %s5743_s15 = scalar_lea.hbm %s9675_s6, 16 }
 0x597   : > { %v4233_v43 = vrot.slane %v9078_v44, 4  ;;  %v3220_v6 = vsel %vm369_vm0, 0.0, %v3219_v51  ;;  %v3779_v29 = vrot.slane %v8921_v53, 4  ;;  %v9129_v8 = vsel %vm369_vm0, 0.0, %v4235_v42  ;;  %s4631_s20 = sshll.u32 %s314_s19, 4  ;;  %s4632_s20 = int_to_ptr.vmem [resolvable:$true] %s4631_s20 }
 0x598   : > { %v3163_v59 = vrot.slane %v9081_v63, 4  ;;  %v4177_v36 = vrot.slane %v9108_v34, 4  ;;  %v3835_v42 = vrot.slane %v8842_v19, 4  ;;  %v4019_v35 = vrot.slane %v9115_v27, 4 }
 0x599   : > { %5493 = vrot.lane.b32.xlu2 %v5492_v15, %s5808_s27  ;;  %v9998_v15 = vld [vmem:[#allocation38_spill] sm:$0xff]  ;;  %v4234_v25 = vsel %vm369_vm0, 0.0, %v4233_v43  ;;  %v9139_v51 = vsel %vm369_vm0, 0.0, %v3779_v29  ;;  %v9152_v47 = vsel %vm369_vm0, 0.0, %v4239_v10 }
 0x59a   : > { %v3543_v61 = vrot.slane %v9998_v15, 4  ;;  %v3164_v58 = vsel %vm369_vm0, 0.0, %v3163_v59  ;;  %v5542_v54 = vpack.i.bf16 %v3830_v22, %v4234_v25  ;;  %v9136_v59 = vsel %vm369_vm0, 0.0, %v3629_v62  ;;  %v10002_v15 = vld [vmem:[#allocation28_spill] sm:$0xff] }
 0x59b   : > { %5538 = vrot.lane.b32.xlu0 %v9996_v46, %s5804_s28  ;;  %v9126_v46 = vsel %vm369_vm0, 0.0, %v3831_v16  ;;  %v3225_v7 = vrot.slane %v10002_v15, 4  ;;  %v9149_v62 = vsel %vm369_vm0, 0.0, %v3835_v42  ;;  %v4178_v16 = vsel %vm369_vm0, 0.0, %v4177_v36  ;;  %v10003_v25 = vld [vmem:[#allocation40_spill] sm:$0xff] }
 0x59c   : > { %v5552_v43 = vpack.i.bf16 %v9126_v46, %v9129_v8  ;;  %v3544_v19 = vsel %vm369_vm0, %v3543_v61, %v10003_v25  ;;  %v4020_v10 = vsel %vm369_vm0, 0.0, %v4019_v35 }
 0x59d   : > { %v5547_v42 = vpack.i.bf16 %v4178_v16, %v4020_v10  ;;  %v3226_v61 = vsel %vm369_vm0, 0.0, %v3225_v7 }
 0x59e   : > { %5498 = vrot.lane.b32.xlu1 %v9997_v3, %s5804_s28  ;;  %v5512_v3 = vpack.i.bf16 %v3220_v6, %v3164_v58  ;;  %v10004_v58 = vld [vmem:[#allocation35_spill] sm:$0xff] }
 0x59f   : > { %v3600_v6 = vsel %vm369_vm0, %v3599_v52, %v10004_v58 }
 0x5a0   : > { %v9175_v52 = vperm.slane %v3600_v6, %v9942_v30  ;;  %v10008_v6 = vld [vmem:[#allocation39_spill] sm:$0xff] }
 0x5a1   : > { %5508 = vrot.lane.b32.xlu2 %v5507_v60, %s5803_s16  ;;  %v10001_v60 = vld [vmem:[#allocation33_spill] sm:$0xff]  ;;  %v9189_v10 = vperm.slane %v10008_v6, %v9942_v30 }
 0x5a2   : > { %v3169_v22 = vrot.slane %v10001_v60, 4  ;;  %v10005_v60 = vld [vmem:[#allocation42_spill] sm:$0xff]  ;;  %v3623_v17 = vrot.slane %v9175_v52, 4 }
 0x5a3   : > { %5543 = vrot.lane.b32.xlu0 %v5542_v54, %s5808_s27  ;;  %v9162_v54 = vpop.permute.xlu2 %5413  ;;  %v3571_v15 = vrot.slane %v10005_v60, 4  ;;  %v5380_v60 = vunpack.i.l.bf16 %v8937_v11 }
 0x5a4   : > { %v3170_v36 = vsel %vm369_vm0, 0.0, %v3169_v22  ;;  %v10007_v22 = vld [vmem:[#allocation27_spill] sm:$0xff] }
 0x5a5   : > { %v5527_v25 = vpack.i.bf16 %v3226_v61, %v3170_v36  ;;  %v4441_v7 = vrot.slane %v10007_v22, 4  ;;  %v3572_v58 = vsel %vm369_vm0, 0.0, %v3571_v15  ;;  %v5346_v36 = vunpack.i.h.bf16 %v8792_v57 }
 0x5a6   : > { %5513 = vrot.lane.b32.xlu1 %v5512_v3, %s5808_s27  ;;  %v9172_v3 = vperm.slane %v3544_v19, %v9942_v30  ;;  %v4359_v19 = vrot.slane %v8808_v26, 4  ;;  %v5381_v61 = vunpack.i.h.bf16 %v8937_v11  ;;  %v3624_v15 = vsel %vm369_vm0, 0.0, %v3623_v17 }
 0x5a7   : > { %v4442_v6 = vsel %vm369_vm0, 0.0, %v4441_v7  ;;  %v2873_v29 = vsel %vm743_vm7, %v8977_v31, %v5346_v36 }
 0x5a8   : > { %v3567_v39 = vrot.slane %v9172_v3, 4 }
 0x5a9   : > { %5523 = vrot.lane.b32.xlu2 %v5522_v0, %s5802_s9  ;;  %v10006_v0 = vld [vmem:[#allocation32_spill] sm:$0xff] }
 0x5aa   : > { %v5351_v35 = vunpack.i.h.bf16 %v10006_v0  ;;  %v5350_v16 = vunpack.i.l.bf16 %v10006_v0  ;;  %v3568_v26 = vsel %vm369_vm0, 0.0, %v3567_v39  ;;  %v4237_v0 = vrot.slane %v8870_v40, 4 }
 0x5ab   : > { %5548 = vrot.lane.b32.xlu0 %v5547_v42, %s5808_s27  ;;  %v5345_v42 = vunpack.i.l.bf16 %v8792_v57  ;;  %v9200_v22 = vpop.permute.xlu2 %5423  ;;  %v3833_v57 = vrot.slane %v8877_v21, 4  ;;  %v4439_v39 = vrot.slane %v9189_v10, 4  ;;  %v2874_v40 = vsel %vm745_vm8, %v2873_v29, %v5381_v61  ;;  %v9234_v61 = vpop.permute.xlu0 %4044 }
 0x5ac   : > { %v5532_v53 = vpack.i.bf16 %v3624_v15, %v3568_v26  ;;  %v4360_v21 = vsel %vm369_vm0, %v4359_v19, %v8736_v45  ;;  %v2875_v7 = vsel %vm747_vm9, %v2874_v40, %v5351_v35  ;;  %v4238_v45 = vsel %vm369_vm0, 0.0, %v4237_v0  ;;  %10010 = vst [vmem:[#allocation20_spill] sm:$0xff] %v9234_v61 }
 0x5ad   : > { %v2866_v11 = vsel %vm743_vm7, %v8974_v37, %v5345_v42  ;;  %v3834_v37 = vsel %vm369_vm0, 0.0, %v3833_v57  ;;  %v9221_v36 = vperm.slane %v4360_v21, %v9942_v30  ;;  %v5366_v26 = vunpack.i.h.bf16 %v8794_v13 }
 0x5ae   : > { %5528 = vrot.lane.b32.xlu1 %v5527_v25, %s5803_s16  ;;  %v5386_v25 = vunpack.i.h.bf16 %v8994_v32  ;;  %v2867_v17 = vsel %vm745_vm8, %v2866_v11, %v5380_v60  ;;  %v5567_v35 = vpack.i.bf16 %v3834_v37, %v4238_v45  ;;  %v5365_v15 = vunpack.i.l.bf16 %v8794_v13 }
 0x5af   : > { %v2868_v31 = vsel %vm747_vm9, %v2867_v17, %v5350_v16  ;;  %v10009_v16 = vld [vmem:[#allocation30_spill] sm:$0xff]  ;;  %v4383_v60 = vrot.slane %v9221_v36, 4  ;;  %v4385_v0 = vrot.slane %v8967_v1, 4  ;;  %v5405_v57 = vunpack.i.l.bf16 %v9118_v48  ;;  %v10012_v17 = vld [vmem:[#allocation31_spill] sm:$0xff] }
 0x5b0   : > { %v9224_v29 = vsel %vm749_vm10, %v2875_v7, %v5386_v25  ;;  %v3485_v40 = vsel %vm747_vm9, %v9050_v55, %v5366_v26  ;;  %v3478_v13 = vsel %vm747_vm9, %v9047_v9, %v5365_v15  ;;  %v4021_v21 = vrot.slane %v10012_v17, 4 }
 0x5b1   : > { %3648 = vrot.lane.b32.xlu2 %v3572_v58, %s5802_s9  ;;  %v5385_v58 = vunpack.i.l.bf16 %v8994_v32  ;;  %v4440_v32 = vsel %vm369_vm0, 0.0, %v4439_v39  ;;  %v4384_v11 = vsel %vm369_vm0, 0.0, %v4383_v60  ;;  %v9255_v1 = vperm.slane %v9098_v56, %v9942_v30  ;;  %v10013_v56 = vld [vmem:[#allocation25_spill] sm:$0xff] }
 0x5b2   : > { %v9261_v7 = vsel %vm749_vm10, %v3478_v13, %v5405_v57  ;;  %v4386_v37 = vsel %vm369_vm0, 0.0, %v4385_v0  ;;  %v4181_v55 = vrot.slane %v8998_v49, 4  ;;  %v9273_v45 = vperm.slane %v10013_v56, %v9942_v30  ;;  %v10015_v13 = vld [vmem:[#allocation41_spill] sm:$0xff] }
 0x5b3   : > { %4484 = vrot.lane.b32.xlu0 %v4442_v6, %s5804_s28  ;;  %v9227_v42 = vsel %vm749_vm10, %v2868_v31, %v5385_v58  ;;  %v9232_v19 = vpop.permute.xlu2 %5438  ;;  %v5406_v6 = vunpack.i.h.bf16 %v9118_v48  ;;  %v10011_v58 = vld [vmem:[#allocation45_spill] sm:$0xff]  ;;  %v3775_v26 = vrot.slane %v8797_v20, 4  ;;  %v3965_v0 = vrot.slane %v8648_v23, 4 }
 0x5b4   : > { %v4179_v39 = vrot.slane %v10011_v58, 4  ;;  %v4182_v60 = vsel %vm369_vm0, 0.0, %v4181_v55  ;;  %v4387_v58 = vrot.slane %v8929_v24, 4  ;;  %v3777_v23 = vrot.slane %v9041_v33, 4 }
 0x5b5   : > { %v9258_v48 = vsel %vm749_vm10, %v3485_v40, %v5406_v6  ;;  %v3776_v8 = vsel %vm369_vm0, 0.0, %v3775_v26  ;;  %v3966_v20 = vsel %vm369_vm0, 0.0, %v3965_v0  ;;  %v4443_v40 = vrot.slane %v8788_v41, 4 }
 0x5b6   : > { %5533 = vrot.lane.b32.xlu1 %v5532_v53, %s5808_s27  ;;  %v3573_v53 = vrot.slane %v10009_v16, 4  ;;  %v4180_v9 = vsel %vm369_vm0, 0.0, %v4179_v39  ;;  %v4022_v16 = vsel %vm369_vm0, 0.0, %v4021_v21  ;;  %v9300_v39 = vpop.permute.xlu1 %5418  ;;  %v3627_v17 = vrot.slane %v10015_v13, 4 }
 0x5b7   : > { %v5562_v49 = vpack.i.bf16 %v4180_v9, %v4022_v16  ;;  %v3778_v55 = vsel %vm369_vm0, 0.0, %v3777_v23  ;;  %v4444_v24 = vsel %vm369_vm0, 0.0, %v4443_v40  ;;  %v10016_v16 = vpack.i.bf16 %v9139_v51, %v9136_v59 }
 0x5b8   : > { %v3574_v25 = vsel %vm369_vm0, 0.0, %v3573_v53  ;;  %v3773_v53 = vrot.slane %v9255_v1, 4  ;;  %v3628_v33 = vsel %vm369_vm0, 0.0, %v3627_v17  ;;  %v4183_v51 = vrot.slane %v8958_v28, 4 }
 0x5b9   : > { %4476 = vrot.lane.b32.xlu2 %v4440_v32, %s5808_s27  ;;  %v9267_v32 = vpop.permute.xlu0 %5408  ;;  %v5587_v56 = vpack.i.bf16 %v3778_v55, %v3628_v33 }
 0x5ba   : > { %v3774_v15 = vsel %vm369_vm0, 0.0, %v3773_v53  ;;  %v4389_v53 = vrot.slane %v9034_v14, 4  ;;  %v5410_v40 = vunpack.i.l.bf16 %v9267_v32 }
 0x5bb   : > { %5568 = vrot.lane.b32.xlu0 %v5567_v35, %s5802_s9  ;;  %v4023_v35 = vrot.slane %v9010_v5, 4 }
 0x5bd   : > { %v4024_v30 = vsel %vm369_vm0, 0.0, %v4023_v35 }
 0x5be   : > { %3656 = vrot.lane.b32.xlu1 %v3574_v25, %s5803_s16  ;;  %v3963_v25 = vrot.slane %v9273_v45, 4  ;;  %v5577_v5 = vpack.i.bf16 %v4182_v60, %v4024_v30  ;;  %v9315_v41 = vpop.permute.xlu1 %5428  ;;  %v10017_v60 = vpack.i.bf16 %v9149_v62, %v9152_v47  ;;  %v4445_v30 = vrot.slane %v8885_v2, 4 }
 0x5bf   : > { %v4025_v62 = vrot.slane %v8971_v4, 4  ;;  %v5411_v4 = vunpack.i.h.bf16 %v9267_v32 }
 0x5c0   : > { %v3964_v46 = vsel %vm369_vm0, 0.0, %v3963_v25  ;;  %v4390_v25 = vsel %vm369_vm0, 0.0, %v4389_v53  ;;  %v4446_v14 = vsel %vm369_vm0, 0.0, %v4445_v30 }
 0x5c1   : > { %4448 = vrot.lane.b32.xlu2 %v4384_v11, %s5808_s27  ;;  %v9294_v57 = vpop.permute.xlu0 %5433  ;;  %v5572_v11 = vpack.i.bf16 %v3966_v20, %v3776_v8  ;;  %v10019_v20 = vld [vmem:[#allocation34_spill] sm:$0xff] }
 0x5c2   : > { %v3969_v28 = vrot.slane %v10019_v20, 4 }
 0x5c3   : > { %v9263_v31 = vpop.permute.xlu2 %4480  ;;  %4456 = vrot.lane.b32.xlu0 %v4386_v37, %s5804_s28  ;;  %v4388_v37 = vsel %vm369_vm0, 0.0, %v4387_v58 }
 0x5c4   : > { %v3970_v55 = vsel %vm369_vm0, 0.0, %v3969_v28 }
 0x5c6   : > { %5553 = vrot.lane.b32.xlu1 %v5552_v43, %s5804_s28  ;;  %v5557_v43 = vpack.i.bf16 %v3964_v46, %v3774_v15  ;;  %v9332_v26 = vpop.permute.xlu1 %5443  ;;  %v4184_v15 = vsel %vm369_vm0, 0.0, %v4183_v51  ;;  %v4026_v46 = vsel %vm369_vm0, 0.0, %v4025_v62 }
 0x5c7   : > { %v5592_v2 = vpack.i.bf16 %v4184_v15, %v4026_v46  ;;  %v5416_v15 = vunpack.i.h.bf16 %v9162_v54  ;;  %v5415_v46 = vunpack.i.l.bf16 %v9162_v54 }
 0x5c9   : > { %5563 = vrot.lane.b32.xlu2 %v5562_v49, %s5804_s28  ;;  %v9310_v9 = vpop.permute.xlu0 %3652 }
 0x5cb   : > { %v9289_v6 = vpop.permute.xlu2 %4488  ;;  %5578 = vrot.lane.b32.xlu0 %v5577_v5, %s5802_s9 }
 0x5cc   : > { %10014 = vst [vmem:[#allocation17_spill] sm:$0xff] %v9289_v6 }
 0x5ce   : > { %5558 = vrot.lane.b32.xlu1 %v5557_v43, %s5808_s27 }
 0x5d1   : > { %5573 = vrot.lane.b32.xlu2 %v5572_v11, %s5804_s28  ;;  %v9325_v49 = vpop.permute.xlu0 %5453 }
 0x5d3   : > { %v9305_v21 = vpop.permute.xlu2 %5473  ;;  %4464 = vrot.lane.b32.xlu0 %v4388_v37, %s5802_s9 }
 0x5d6   : > { %4492 = vrot.lane.b32.xlu1 %v4444_v24, %s5802_s9 }
 0x5d9   : > { %5588 = vrot.lane.b32.xlu2 %v5587_v56, %s5802_s9  ;;  %s4766_s9 = sshll.u32 %s5874_s5, 3  ;;  %s4618_s5 = scalar_lea.sflag [#allocation6], %s5952_s10 }
 0x5da   : > { %s4629_s18 = scalar_lea.hbm %s9675_s6, %s4766_s9 }
 0x5db   : > { %v9318_v35 = vpop.permute.xlu2 %4460  ;;  %5598 = vrot.lane.b32.xlu0 %v10016_v16, %s5803_s16  ;;  %s4633_s27 = sshll.u32 %s4629_s18, 4  ;;  %s4634_s27 = int_to_ptr.hbm [resolvable:$true] %s4633_s27 }
 0x5dc   : > { %s5737_s30 = sshra.s32 %s4634_s27, 4  ;;  %s5738_s30 = int_to_ptr.hbm [resolvable:$true] %s5737_s30 }
 0x5dd   : > { %s5739_s11 = scalar_lea.hbm %s5738_s30, 8  ;;  %p5744_p9 = scmp.lt.s32.totalorder %s5738_s30, %s9675_s6 }
 0x5de   : > { %5583 = vrot.lane.b32.xlu1 %v10017_v60, %s5803_s16  ;;  %p5740_p1 = scmp.ne.s32.totalorder %s5738_s30, %s5739_s11  ;;  %p5745_p10 = scmp.lt.s32.totalorder %s5743_s15, %s5739_s11 }
 0x5e0   : > { %p5741_p4 = pnand %p5740_p1, %p5925_p3  ;;  %p5746_p2 = por %p5745_p10, %p5744_p9 }
 0x5e1   : > { %4472 = vrot.lane.b32.xlu2 %v4390_v25, %s5803_s16 }
 0x5e2   : > { %p5742_p8 = pneg %p5741_p4 }
 0x5e3   : > { %v9336_v5 = vpop.permute.xlu2 %5483 }
 0x5e4   : > { %p5747_p11 = pnand %p5746_p2, %p5742_p8 }
 0x5e5   : > { %v9338_v59 = vpop.permute.xlu0 %5463 }
 0x5e6   : > { %4500 = vrot.lane.b32.xlu1 %v4446_v14, %s5803_s16 }
 0x5e8   : > { %v5449_v47 = vpop.permute.xlu1 %5448 }
 0x5eb   : > { %v9345_v0 = vpop.permute.xlu2 %4468 }
 0x5ed   : > { %v9348_v8 = vpop.permute.xlu0 %4496 }
 0x5ee   : > { %10018 = vst [vmem:[#allocation18_spill] sm:$0xff] %v9348_v8  ;;  %5593 = vrot.lane.b32.xlu1 %v5592_v2, %s5803_s16 }
 0x5f0   : > { %v9351_v43 = vpop.permute.xlu1 %5458 }
 0x5f3   : > { %v5494_v11 = vpop.permute.xlu2 %5493 }
 0x5f4   : > { %v5496_v58 = vunpack.i.h.bf16 %v5494_v11  ;;  %v5495_v23 = vunpack.i.l.bf16 %v5494_v11 }
 0x5f5   : > { %v9360_v37 = vpop.permute.xlu0 %5488 }
 0x5f6   : > { %v3084_v13 = vsel %vm737_vm4, %v9026_v38, %v5496_v58  ;;  %v3077_v17 = vsel %vm737_vm4, %v9014_v50, %v5495_v23  ;;  %4052 = vrot.lane.b32.xlu1 %v3970_v55, %s5803_s16 }
 0x5f7   : > { %v3078_v24 = vsel %vm739_vm5, %v3077_v17, %v5410_v40  ;;  %v3085_v33 = vsel %vm739_vm5, %v3084_v13, %v5411_v4  ;;  %v5451_v13 = vunpack.i.h.bf16 %v5449_v47  ;;  %v5450_v17 = vunpack.i.l.bf16 %v5449_v47 }
 0x5f8   : > { %v9366_v56 = vpop.permute.xlu1 %4452 }
 0x5fb   : > { %v9368_v16 = vpop.permute.xlu2 %5508 }
 0x5fd   : > { %v9370_v32 = vpop.permute.xlu0 %5503 }
 0x600   : > { %v5469_v38 = vpop.permute.xlu1 %5468 }
 0x603   : > { %v9372_v53 = vpop.permute.xlu2 %5523 }
 0x605   : > { %v5519_v50 = vpop.permute.xlu0 %5518 }
 0x608   : > { %v9374_v60 = vpop.permute.xlu1 %5478 }
 0x60b   : > { %v9376_v25 = vpop.permute.xlu2 %3648 }
 0x60d   : > { %v9378_v30 = vpop.permute.xlu0 %5538 }
 0x610   : > { %v5499_v14 = vpop.permute.xlu1 %5498 }
 0x611   : > { %v5501_v51 = vunpack.i.h.bf16 %v5499_v14  ;;  %v5500_v62 = vunpack.i.l.bf16 %v5499_v14 }
 0x613   : > { %v9382_v2 = vpop.permute.xlu2 %4476  ;;  %v3079_v20 = vsel %vm741_vm6, %v3078_v24, %v5500_v62  ;;  %v3086_v28 = vsel %vm741_vm6, %v3085_v33, %v5501_v51 }
 0x614   : > { %v9387_v11 = vsel %vm743_vm7, %v3079_v20, %v5415_v46  ;;  %v9390_v58 = vsel %vm743_vm7, %v3086_v28, %v5416_v15  ;;  %v5426_v15 = vunpack.i.h.bf16 %v9200_v22  ;;  %v5425_v46 = vunpack.i.l.bf16 %v9200_v22 }
 0x615   : > { %v5544_v23 = vpop.permute.xlu0 %5543  ;;  %v5521_v20 = vunpack.i.h.bf16 %v5519_v50 }
 0x616   : > { %v5546_v4 = vunpack.i.h.bf16 %v5544_v23  ;;  %v5545_v40 = vunpack.i.l.bf16 %v5544_v23 }
 0x618   : > { %v3900_v54 = vsel %vm737_vm4, %v9071_v12, %v5546_v4  ;;  %v4304_v55 = vsel %vm737_vm4, %v9078_v44, %v5545_v40  ;;  %v5514_v24 = vpop.permute.xlu1 %5513  ;;  %v5520_v12 = vunpack.i.l.bf16 %v5519_v50  ;;  %v5456_v50 = vunpack.i.h.bf16 %v9325_v49 }
 0x619   : > { %v5516_v14 = vunpack.i.h.bf16 %v5514_v24  ;;  %v5515_v33 = vunpack.i.l.bf16 %v5514_v24  ;;  %v9397_v51 = vsel %vm739_vm5, %v3900_v54, %v5451_v13  ;;  %v9400_v62 = vsel %vm739_vm5, %v4304_v55, %v5450_v17 }
 0x61b   : > { %v9404_v47 = vpop.permute.xlu2 %4448  ;;  %v3290_v44 = vsel %vm737_vm4, %v9084_v18, %v5516_v14  ;;  %v3283_v28 = vsel %vm737_vm4, %v9081_v63, %v5515_v33  ;;  %v5455_v14 = vunpack.i.l.bf16 %v9325_v49 }
 0x61c   : > { %v3291_v23 = vsel %vm739_vm5, %v3290_v44, %v5426_v15  ;;  %v3284_v4 = vsel %vm739_vm5, %v3283_v28, %v5425_v46 }
 0x61d   : > { %v9413_v40 = vsel %vm741_vm6, %v3291_v23, %v5521_v20  ;;  %v9416_v13 = vsel %vm741_vm6, %v3284_v4, %v5520_v12  ;;  %v5549_v22 = vpop.permute.xlu0 %5548  ;;  %v5471_v20 = vunpack.i.h.bf16 %v5469_v38  ;;  %v5470_v12 = vunpack.i.l.bf16 %v5469_v38 }
 0x61e   : > { %v5551_v17 = vunpack.i.h.bf16 %v5549_v22  ;;  %v5550_v54 = vunpack.i.l.bf16 %v5549_v22  ;;  %v5440_v38 = vunpack.i.l.bf16 %v9232_v19 }
 0x620   : > { %v4297_v18 = vsel %vm737_vm4, %v9108_v34, %v5551_v17  ;;  %v9421_v55 = vpop.permute.xlu1 %5528  ;;  %v4090_v63 = vsel %vm737_vm4, %v9115_v27, %v5550_v54  ;;  %v5441_v54 = vunpack.i.h.bf16 %v9232_v19 }
 0x621   : > { %v4298_v24 = vsel %vm739_vm5, %v4297_v18, %v5456_v50  ;;  %v4091_v44 = vsel %vm739_vm5, %v4090_v63, %v5455_v14  ;;  %v5541_v50 = vunpack.i.h.bf16 %v9378_v30  ;;  %v5540_v18 = vunpack.i.l.bf16 %v9378_v30 }
 0x622   : > { %v5446_v14 = vunpack.i.h.bf16 %v9332_v26 }
 0x623   : > { %v5564_v33 = vpop.permute.xlu2 %5563 }
 0x624   : > { %v5566_v15 = vunpack.i.h.bf16 %v5564_v33  ;;  %v5565_v46 = vunpack.i.l.bf16 %v5564_v33  ;;  %v5445_v33 = vunpack.i.l.bf16 %v9332_v26 }
 0x625   : > { %v9430_v23 = vpop.permute.xlu0 %4484 }
 0x626   : > { %v4299_v28 = vsel %vm741_vm6, %v4298_v24, %v5566_v15  ;;  %v4092_v34 = vsel %vm741_vm6, %v4091_v44, %v5565_v46 }
 0x627   : > { %v9433_v4 = vsel %vm743_vm7, %v4092_v34, %v5470_v12  ;;  %v9436_v27 = vsel %vm743_vm7, %v4299_v28, %v5471_v20  ;;  %v5421_v34 = vunpack.i.h.bf16 %v9300_v39 }
 0x628   : > { %v5534_v49 = vpop.permute.xlu1 %5533 }
 0x629   : > { %v5536_v22 = vunpack.i.h.bf16 %v5534_v49  ;;  %v5535_v17 = vunpack.i.l.bf16 %v5534_v49  ;;  %v5420_v49 = vunpack.i.l.bf16 %v9300_v39  ;;  %v5461_v39 = vunpack.i.h.bf16 %v9351_v43 }
 0x62b   : > { %v3694_v63 = vsel %vm737_vm4, %v9175_v52, %v5536_v22  ;;  %v3687_v24 = vsel %vm737_vm4, %v9172_v3, %v5535_v17  ;;  %v9456_v44 = vpop.permute.xlu2 %5573  ;;  %v5511_v22 = vunpack.i.h.bf16 %v9368_v16  ;;  %v5505_v17 = vunpack.i.l.bf16 %v9370_v32 }
 0x62c   : > { %v3695_v15 = vsel %vm739_vm5, %v3694_v63, %v5441_v54  ;;  %v3688_v46 = vsel %vm739_vm5, %v3687_v24, %v5440_v38  ;;  %v5466_v63 = vunpack.i.h.bf16 %v9338_v59  ;;  %v5465_v24 = vunpack.i.l.bf16 %v9338_v59 }
 0x62d   : > { %v9450_v20 = vpop.permute.xlu0 %5568  ;;  %v3689_v19 = vsel %vm741_vm6, %v3688_v46, %v5540_v18  ;;  %v3696_v30 = vsel %vm741_vm6, %v3695_v15, %v5541_v50  ;;  %v5475_v50 = vunpack.i.l.bf16 %v9305_v21  ;;  %v5485_v18 = vunpack.i.l.bf16 %v9336_v5 }
 0x62e   : > { %v3690_v12 = vsel %vm743_vm7, %v3689_v19, %v5445_v33  ;;  %v3697_v52 = vsel %vm743_vm7, %v3696_v30, %v5446_v14  ;;  %v5460_v33 = vunpack.i.l.bf16 %v9351_v43  ;;  %v4503_v54 = vsel %vm737_vm4, %v9221_v36, %v9404_v47 }
 0x62f   : > { %v9460_v3 = vsel %vm745_vm8, %v3690_v12, %v9376_v25  ;;  %v5490_v12 = vunpack.i.l.bf16 %v9360_v37  ;;  %v5510_v59 = vunpack.i.l.bf16 %v9368_v16  ;;  %v5506_v25 = vunpack.i.h.bf16 %v9370_v32 }
 0x630   : > { %v9462_v26 = vpop.permute.xlu1 %3656  ;;  %v5526_v36 = vunpack.i.h.bf16 %v9372_v53  ;;  %v5480_v47 = vunpack.i.l.bf16 %v9374_v60  ;;  %v5575_v32 = vunpack.i.l.bf16 %v9456_v44 }
 0x631   : > { %10020 = vst [vmem:[#allocation46_spill] sm:$0xff] %v9462_v26  ;;  %v3088_v6 = vsel %vm745_vm8, %v9390_v58, %v5506_v25 }
 0x633   : > { %v9477_v15 = vpop.permute.xlu2 %5588 }
 0x634   : > { %v5590_v30 = vunpack.i.l.bf16 %v9477_v15 }
 0x635   : > { %v4457_v28 = vpop.permute.xlu0 %4456 }
 0x636   : > { %v3698_v16 = vsel %vm745_vm8, %v3697_v52, %v5590_v30  ;;  %v5481_v30 = vunpack.i.h.bf16 %v9374_v60 }
 0x638   : > { %v5554_v14 = vpop.permute.xlu1 %5553 }
 0x639   : > { %v5556_v46 = vunpack.i.h.bf16 %v5554_v14  ;;  %v5555_v19 = vunpack.i.l.bf16 %v5554_v14 }
 0x63b   : > { %v3902_v43 = vsel %vm741_vm6, %v9397_v51, %v5556_v46  ;;  %v4306_v14 = vsel %vm741_vm6, %v9400_v62, %v5555_v19  ;;  %v4504_v51 = vsel %vm739_vm5, %v4503_v54, %v9366_v56  ;;  %v5576_v62 = vunpack.i.h.bf16 %v9456_v44 }
 0x63c   : > { %v3903_v38 = vsel %vm743_vm7, %v3902_v43, %v5461_v39  ;;  %v4307_v61 = vsel %vm743_vm7, %v4306_v14, %v5460_v33  ;;  %v5571_v39 = vunpack.i.h.bf16 %v9450_v20  ;;  %v5570_v33 = vunpack.i.l.bf16 %v9450_v20 }
 0x63d   : > { %v5579_v46 = vpop.permute.xlu0 %5578  ;;  %v5591_v43 = vunpack.i.h.bf16 %v9477_v15  ;;  %v4505_v14 = vsel %vm741_vm6, %v4504_v51, %v4457_v28  ;;  %v3081_v44 = vsel %vm745_vm8, %v9387_v11, %v5505_v17  ;;  %v3089_v15 = vsel %vm747_vm9, %v3088_v6, %v5421_v34 }
 0x63e   : > { %v5581_v19 = vunpack.i.h.bf16 %v5579_v46  ;;  %v5580_v8 = vunpack.i.l.bf16 %v5579_v46  ;;  %v3082_v58 = vsel %vm747_vm9, %v3081_v44, %v5420_v49  ;;  %v4308_v17 = vsel %vm745_vm8, %v4307_v61, %v5570_v33 }
 0x63f   : > { %v9531_v34 = vsel %vm747_vm9, %v4308_v17, %v5475_v50  ;;  %v10021_v50 = vunpack.i.h.bf16 %v9305_v21  ;;  %v4526_v44 = vrot.slane %v9258_v48, 4  ;;  %v10028_v17 = vld [vmem:[#allocation46_spill] sm:$0xff] }
 0x640   : > { %v4094_v56 = vsel %vm745_vm8, %v9433_v4, %v5580_v8  ;;  %v5559_v54 = vpop.permute.xlu1 %5558  ;;  %v4301_v52 = vsel %vm745_vm8, %v9436_v27, %v5581_v19  ;;  %v4506_v8 = vsel %vm743_vm7, %v4505_v14, %v9318_v35  ;;  %v3090_v4 = vsel %vm749_vm10, %v3089_v15, %v5511_v22 }
 0x641   : > { %v5561_v46 = vunpack.i.h.bf16 %v5559_v54  ;;  %v5560_v26 = vunpack.i.l.bf16 %v5559_v54  ;;  %v9514_v20 = vsel %vm747_vm9, %v4094_v56, %v5485_v18  ;;  %v4520_v25 = vrot.slane %v3090_v4, 4 }
 0x642   : > { %v3083_v35 = vsel %vm749_vm10, %v3082_v58, %v5510_v59  ;;  %v3904_v18 = vsel %vm745_vm8, %v3903_v38, %v5571_v39  ;;  %v5531_v59 = vunpack.i.h.bf16 %v9421_v55  ;;  %v5530_v19 = vunpack.i.l.bf16 %v9421_v55 }
 0x643   : > { %v4083_v11 = vsel %vm737_vm4, %v9273_v45, %v5561_v46  ;;  %v3893_v28 = vsel %vm737_vm4, %v9255_v1, %v5560_v26  ;;  %v3699_v45 = vsel %vm747_vm9, %v3698_v16, %v5490_v12  ;;  %v9539_v61 = vsel %vm2422_vm11, %v9224_v29, %v4520_v25  ;;  %v4473_v12 = vpop.permute.xlu2 %4472 }
 0x644   : > { %v4084_v6 = vsel %vm739_vm5, %v4083_v11, %v5466_v63  ;;  %v3894_v27 = vsel %vm739_vm5, %v3893_v28, %v5465_v24  ;;  %v3905_v63 = vsel %vm747_vm9, %v3904_v18, %v10021_v50  ;;  %v4519_v24 = vrot.slane %v3083_v35, 4  ;;  %v10030_v18 = vld [vmem:[#allocation18_spill] sm:$0xff] }
 0x645   : > { %v3895_v49 = vsel %vm741_vm6, %v3894_v27, %v5575_v32  ;;  %v4465_v22 = vpop.permute.xlu0 %4464  ;;  %v4085_v32 = vsel %vm741_vm6, %v4084_v6, %v5576_v62  ;;  %v10023_v39 = vunpack.i.h.bf16 %v9315_v41  ;;  %v5435_v62 = vunpack.i.l.bf16 %v9294_v57 }
 0x646   : > { %v4507_v1 = vsel %vm745_vm8, %v4506_v8, %v4465_v22  ;;  %v3896_v26 = vsel %vm743_vm7, %v3895_v49, %v5480_v47  ;;  %v10022_v47 = vunpack.i.h.bf16 %v9360_v37  ;;  %v9558_v60 = vsel %vm2422_vm11, %v9227_v42, %v4519_v24 }
 0x647   : > { %v4508_v38 = vsel %vm747_vm9, %v4507_v1, %v9345_v0  ;;  %v3897_v29 = vsel %vm745_vm8, %v3896_v26, %v5591_v43  ;;  %v4086_v0 = vsel %vm743_vm7, %v4085_v32, %v5481_v30  ;;  %v3293_v33 = vsel %vm743_vm7, %v9413_v40, %v10023_v39 }
 0x648   : > { %v4493_v16 = vpop.permute.xlu1 %4492  ;;  %v4509_v51 = vsel %vm749_vm10, %v4508_v38, %v4473_v12  ;;  %v3898_v21 = vsel %vm747_vm9, %v3897_v29, %v10022_v47  ;;  %v10024_v37 = vunpack.i.h.bf16 %v9336_v5  ;;  %v3294_v42 = vsel %vm745_vm8, %v3293_v33, %v5526_v36  ;;  %v10031_v29 = vld [vmem:[#allocation20_spill] sm:$0xff] }
 0x649   : > { %4756 = vmatpush.msk.msra.mxu2 %vm2422_vm11, %v4509_v51  ;;  %v10025_v14 = vunpack.i.l.bf16 %v9315_v41  ;;  %v10026_v56 = vunpack.i.h.bf16 %v9294_v57  ;;  %v10027_v40 = vunpack.i.l.bf16 %v9372_v53  ;;  %v4525_v36 = vrot.slane %v9261_v7, 4 }
 0x64a   : > { %v4302_v43 = vsel %vm747_vm9, %v4301_v52, %v10024_v37  ;;  %v4510_v41 = vsel %vm737_vm4, %v9189_v10, %v9382_v2  ;;  %v3692_v8 = vsel %vm747_vm9, %v9460_v3, %v9310_v9  ;;  %v10029_v9 = vld [vmem:[#allocation17_spill] sm:$0xff] }
 0x64b   : > { %v3286_v55 = vsel %vm743_vm7, %v9416_v13, %v10025_v14  ;;  %v3295_v54 = vsel %vm747_vm9, %v3294_v42, %v10026_v56  ;;  %v4511_v4 = vsel %vm739_vm5, %v4510_v41, %v9263_v31  ;;  %v3693_v25 = vsel %vm749_vm10, %v3692_v8, %v10028_v17  ;;  %v4553_v42 = vld.sshfl [vmem:[#allocation1] sm:$0xff pattern:$0x75316420] }
 0x64c   : > { %v3287_v5 = vsel %vm745_vm8, %v3286_v55, %v10027_v40  ;;  %v3296_v46 = vsel %vm749_vm10, %v3295_v54, %v5531_v59  ;;  %v4512_v10 = vsel %vm741_vm6, %v4511_v4, %v9430_v23  ;;  %v5602_v54 = vld [vmem:[%s5958_s21] sm:$0xff] }
 0x64d   : > { %v3288_v15 = vsel %vm747_vm9, %v3287_v5, %v5435_v62  ;;  %v5599_v13 = vpop.permute.xlu0 %5598  ;;  %v4544_v57 = vsel %vm2422_vm11, %v3296_v46, %v4526_v44  ;;  %v4513_v3 = vsel %vm743_vm7, %v4512_v10, %v10029_v9 }
 0x64e   : > { %v3289_v52 = vsel %vm749_vm10, %v3288_v15, %v5530_v19  ;;  %v5601_v48 = vunpack.i.h.bf16 %v5599_v13  ;;  %v5600_v2 = vunpack.i.l.bf16 %v5599_v13  ;;  %v4514_v35 = vsel %vm745_vm8, %v4513_v3, %v4493_v16 }
 0x64f   : > { %v4543_v53 = vsel %vm2422_vm11, %v3289_v52, %v4525_v36  ;;  %v4515_v1 = vsel %vm747_vm9, %v4514_v35, %v10030_v18  ;;  %v4087_v16 = vsel %vm745_vm8, %v4086_v0, %v10031_v29  ;;  %v4554_v0 = vld.sshfl [vmem:[#allocation1 + $0x8] sm:$0xff pattern:$0x75316420] }
 0x650   : > { %v3899_v7 = vsel %vm749_vm10, %v3898_v21, %v5601_v48  ;;  %v5584_v58 = vpop.permute.xlu1 %5583  ;;  %v3700_v49 = vsel %vm749_vm10, %v3699_v45, %v5600_v2  ;;  %v10032_v21 = vld [vmem:[#allocation19_spill] sm:$0xff] }
 0x651   : > { %v5586_v11 = vunpack.i.h.bf16 %v5584_v58  ;;  %v4531_v28 = vrot.slane %v3899_v7, 4  ;;  %v5585_v50 = vunpack.i.l.bf16 %v5584_v58 }
 0x653   : > { %v3906_v6 = vsel %vm749_vm10, %v3905_v63, %v5586_v11  ;;  %v4545_v27 = vsel %vm2422_vm11, %v3693_v25, %v4531_v28  ;;  %v4310_v63 = vsel %vm749_vm10, %v9531_v34, %v5585_v50  ;;  %v4088_v34 = vsel %vm747_vm9, %v4087_v16, %v10032_v21 }
 0x654   : > { %v4532_v31 = vrot.slane %v3906_v6, 4  ;;  %v4538_v12 = vrot.slane %v4310_v63, 4 }
 0x656   : > { %v4546_v23 = vsel %vm2422_vm11, %v3700_v49, %v4532_v31 }
 0x658   : > { %v4501_v22 = vpop.permute.xlu1 %4500 }
 0x659   : > { %v4516_v26 = vsel %vm749_vm10, %v4515_v1, %v4501_v22 }
 0x65a   : > { %4758 = vmatpush.msk.msra.mxu3 %vm2422_vm11, %v4516_v26 }
 0x660   : > { %v5594_v24 = vpop.permute.xlu1 %5593 }
 0x661   : > { %v5596_v30 = vunpack.i.h.bf16 %v5594_v24  ;;  %v5595_v59 = vunpack.i.l.bf16 %v5594_v24 }
 0x663   : > { %v4096_v45 = vsel %vm749_vm10, %v9514_v20, %v5595_v59  ;;  %v4303_v51 = vsel %vm749_vm10, %v4302_v43, %v5596_v30  ;;  %v4549_v20 = vld [vmem:[%s9672_s3] sm:$0xf]  ;;  %v4607_v43 = vstv %s4606_s17 }
 0x664   : > { %v4548_v38 = vsel %vm2422_vm11, %v4096_v45, %v4538_v12  ;;  %v4537_v32 = vrot.slane %v4303_v51, 4 }
 0x665   : > { %4598 = vmatpush.msra.mxu3 %v4548_v38 }
 0x667   : > { %4599 = vmatpush.msra.mxu3 %v4546_v23 }
 0x668   : > { %v4053_v47 = vpop.permute.xlu1 %4052 }
 0x669   : > { %v4089_v19 = vsel %vm749_vm10, %v4088_v34, %v4053_v47  ;;  %4600 = vmatpush.msra.mxu3 %v4544_v57 }
 0x66a   : > { %v4547_v39 = vsel %vm2422_vm11, %v4089_v19, %v4537_v32 }
 0x66b   : > { %4578 = vmatpush.msra.mxu2 %v4547_v39  ;;  %4601 = vmatpush.msra.mxu3 %v9539_v61 }
 0x66c   : > { %4759 = vmatmul.msk.f32.vlgmr.msra.gmra.mxu3 %vm2439_vm12, %v4549_v20 }
 0x66d   : > { %4579 = vmatpush.msra.mxu2 %v4545_v27 }
 0x66f   : > { %4580 = vmatpush.msra.mxu2 %v4543_v53 }
 0x671   : > { %4581 = vmatpush.msra.mxu2 %v9558_v60 }
 0x672   : > { %4757 = vmatmul.msk.f32.vlgmr.msra.gmra.mxu2 %vm2439_vm12, %v4549_v20 }
 0x6ef   : > { %v4603_v33 = vpop.f32.mrf.mxu3 }
 0x6f0   : > { %v4604_v37 = vadd.f32 %v4603_v33, %v4554_v0 }
 0x6f2   : > { %v4609_v62 = vmul.f32 %v4607_v43, %v4604_v37 }
 0x6f4   : > { %v4612_v55 = vrot.slane %v4609_v62, 4 }
 0x6f5   : > { %v4583_v61 = vpop.f32.mrf.mxu2 }
 0x6f6   : > { %v4584_v14 = vadd.f32 %v4583_v61, %v4553_v42 }
 0x6f8   : > { %v4608_v60 = vmul.f32 %v4607_v43, %v4584_v14 }
 0x6fa   : > { %v4613_v56 = vsel %vm2422_vm11, %v4608_v60, %v4612_v55 }
 0x6fb   : > { %v4615_v44 = vadd.f32 %v5602_v54, %v4613_v56 }
 0x6fd   : > { %4616 = vst [vmem:[%s314_s19] sm:$0xff] %v4615_v44 }
 0x6fe   : > { %5750 = shalt.err (!%p5747_p11)
}
 0x6ff   : > { %4781 = dma.vmem_to_hbm [thread:$0]  (%p5925_p3), %s4632_s20, 128, %s4634_s27, %s4618_s5  }
 0x700 PF: > { %s4645_s10 = sand.u32 1, %s5785_s23   ;;  %p10033_p12 = scmp.ge.s32.totalorder %s5797_s26, 2 }
 0x701   : > { %s4646_s21 = scalar_lea.sflag [#allocation6], %s4645_s10 }
 0x702   : > { %p4798_p13 = pnand %p10033_p12, %p5888_p6 }
 0x704   : > { %p4799_p0 = pneg %p4798_p13 }
 0x706   : > { %5780 = dma.done.wait (%p4799_p0), %s4646_s21, 128  }
 0x707   : > { %5782 = vsyncadd (%p4799_p0), %s4646_s21, 4294967168  ;;  %p22_p5 = scmp.ge.s32.totalorder %s5912_s22, 4   ;;  %s10034_s23 = smov %s5789_s24 }
 0x708   : > { %s10035_s24 = smov %s5793_s25  ;;  %s10036_s25 = smov %s5921_s7 }
 0x709   : > { %s10037_s26 = smov %s5912_s22  ;;  %24 = sbr.rel (!%p22_p5) target bundleno = 9 (0x9), region = 108 }
 0x70e   :  { %4652 = vsyncpa [#allocation5], 1 }
 0x70f   :  { %4654 = vsyncpa [#allocation5 + $0x1], 1 }
 0x710   :  { %4655 = vsyncpa [#allocation8], 1 }
 0x711   :  { %4656 = vsyncpa [#allocation11], 1 }
 0x712   :  { %4657 = vsyncpa [#allocation6], 1 }
 0x713   :  { %4659 = vsyncpa [#allocation6 + $0x1], 1 }

</bundles_post_ra>
